<compile_context>
chip_gen: v5e
topology: v5e:2x2
jax: 0.10.0
libtpu: 0.0.40
codegen_flags: <defaults>
</compile_context>

<pallas_src>
import jax
import jax.numpy as jnp
from jax import lax
from jax.experimental import pallas as pl
from jax.experimental.pallas import tpu as pltpu


HIDDEN = 32          # logical hidden size
VOCAB = 64           # logical vocab size
H_PAD = 128          # hidden padded to lane width (zero-padded weights)
V_PAD = 128          # vocab / embedding-table rows padded to lane width
B_PAD = 8            # batch padded to one full sublane tile


# ---------------------------------------------------------------------------
# Fused forward kernel: embed -> enc GRU -> bridge -> dec GRU -> projection.
# ---------------------------------------------------------------------------
def _make_seq2seq_kernel(t_enc, t_dec, bp):
    hp = H_PAD

    def embed(ids_ref, emb_ref):
        # In-kernel embedding lookup as one-hot @ table (single MXU call).
        n = ids_ref.shape[0]
        v = emb_ref.shape[0]
        onehot = (ids_ref[...] ==
                  lax.broadcasted_iota(jnp.int32, (n, v), 1)
                  ).astype(jnp.float32)
        return jnp.dot(onehot, emb_ref[...],
                       preferred_element_type=jnp.float32)

    def gru(x_all, h0, wih_ref, whh_ref, bih_ref, bhn_ref, nsteps,
            hseq_scr=None):
        """PyTorch GRU gate math (gate order r, z, n):
            r = sigmoid(W_ir x + b_ir + W_hr h + b_hr)
            z = sigmoid(W_iz x + b_iz + W_hz h + b_hz)
            n = tanh  (W_in x + b_in + r * (W_hn h + b_hn))
            h' = (1 - z) * n + z * h
        b_hr / b_hz are pre-folded into bih_ref (they are plain additive
        constants there); only b_hn must stay inside the recurrence.
        """
        # Hoisted input-side gate matmul: one MXU call covers every timestep.
        i_all = jnp.dot(x_all, wih_ref[...],
                        preferred_element_type=jnp.float32) + bih_ref[...]
        w_hh = whh_ref[...]                                  # (Hp, 3*Hp)
        b_hn = bhn_ref[...]                                  # (1, Hp)
        h = h0                                               # (bp, Hp)

        # nsteps is a small static Python int -> unrolled recurrence; only the
        # h-side matmul + VPU gate math sit on the serial critical path.
        # TODO(synk): pin w_hh in MXU weight registers across the recurrence
        # (pltpu.matmul_push_rhs / matmul_acc_lhs / matmul_pop) to avoid
        # re-pushing the (128,384) operand every step.
        for t in range(nsteps):
            i_t = i_all[t * bp:(t + 1) * bp, :]              # sublane-aligned
            hh = jnp.dot(h, w_hh, preferred_element_type=jnp.float32)
            r = jax.nn.sigmoid(i_t[:, :hp] + hh[:, :hp])
            z = jax.nn.sigmoid(i_t[:, hp:2 * hp] + hh[:, hp:2 * hp])
            n = jnp.tanh(i_t[:, 2 * hp:] + r * (hh[:, 2 * hp:] + b_hn))
            h = (1.0 - z) * n + z * h
            if hseq_scr is not None:
                # Flat scratch, tile-aligned static-slice store (bp = 8).
                hseq_scr[t * bp:(t + 1) * bp, :] = h
        return h

    def kernel(enc_ids_ref, dec_ids_ref, h0_ref,
               enc_emb_ref, enc_wih_ref, enc_whh_ref, enc_bih_ref, enc_bhn_ref,
               dec_emb_ref, dec_wih_ref, dec_whh_ref, dec_bih_ref, dec_bhn_ref,
               wout_ref, bout_ref,
               logits_ref, ht_ref, hseq_scr):
        # ---- encoder ----
        x_enc = embed(enc_ids_ref, enc_emb_ref)              # (t_enc*bp, Hp)
        h_ctx = gru(x_enc, h0_ref[...], enc_wih_ref, enc_whh_ref,
                    enc_bih_ref, enc_bhn_ref, t_enc)
        # ---- bridge: State(context=context) -> decoder initial state ----
        # (identity; h_ctx stays resident in vregs/VMEM, no HBM round-trip)
        # ---- decoder ----
        x_dec = embed(dec_ids_ref, dec_emb_ref)              # (t_dec*bp, Hp)
        h_t = gru(x_dec, h_ctx, dec_wih_ref, dec_whh_ref,
                  dec_bih_ref, dec_bhn_ref, t_dec, hseq_scr)
        ht_ref[...] = h_t
        # ---- fused vocab projection from the flat VMEM scratch ----
        # One lane-dense (t_dec*bp, V_PAD) store; no reshape needed.
        logits_ref[...] = (jnp.dot(hseq_scr[...], wout_ref[...],
                                   preferred_element_type=jnp.float32)
                           + bout_ref[...])

    return kernel


def _full_spec(shape):
    n = len(shape)
    return pl.BlockSpec(shape, lambda i, _n=n: (0,) * _n)


def seq2seq_fused(enc_ids_flat, dec_ids_flat, h0,
                  enc_emb, enc_wih, enc_whh, enc_bih, enc_bhn,
                  dec_emb, dec_wih, dec_whh, dec_bih, dec_bhn,
                  w_out, b_out):
    """Single fused pallas_call for the whole seq2seq forward.

    enc_ids_flat / dec_ids_flat: (T*B_PAD, 1) int32, time-major, row = t*B_PAD+b.
    Returns (logits_flat (T_dec*B_PAD, V_PAD), h_T (B_PAD, H_PAD)).
    """
    t_enc = enc_ids_flat.shape[0] // B_PAD
    t_dec = dec_ids_flat.shape[0] // B_PAD
    kernel = _make_seq2seq_kernel(t_enc, t_dec, B_PAD)

    operands = (enc_ids_flat, dec_ids_flat, h0,
                enc_emb, enc_wih, enc_whh, enc_bih, enc_bhn,
                dec_emb, dec_wih, dec_whh, dec_bih, dec_bhn,
                w_out, b_out)

    # TODO(synk): on v7x, add a leading "parallel" batch-tile grid axis once
    # the real batch spans >= 2 sublane tiles so both TensorCores are used;
    # chunk the all-timesteps i_all hoist over T once T*B grows toward the
    # 64 MiB VMEM budget.
    return pl.pallas_call(
        kernel,
        out_shape=(jax.ShapeDtypeStruct((t_dec * B_PAD, V_PAD), jnp.float32),
                   jax.ShapeDtypeStruct((B_PAD, H_PAD), jnp.float32)),
        grid=(1,),
        in_specs=[_full_spec(op.shape) for op in operands],
        out_specs=(_full_spec((t_dec * B_PAD, V_PAD)),
                   _full_spec((B_PAD, H_PAD))),
        scratch_shapes=[pltpu.VMEM((t_dec * B_PAD, H_PAD), jnp.float32)],
        compiler_params=pltpu.CompilerParams(
            dimension_semantics=("arbitrary",)),
    )(*operands)


# ---------------------------------------------------------------------------
# Seq2Seq container mirroring the PyTorch module's forward():
#   context = encode(input_encoder); state = bridge(context)
#   output, state = decode(input_decoder, state); return output
# (encode/bridge/decode are fused into one kernel for performance.)
# ---------------------------------------------------------------------------
class Seq2SeqPallas:
    def __init__(self, key, vocab=VOCAB, hidden=HIDDEN):
        self.vocab = vocab
        self.hidden = hidden
        ks = jax.random.split(key, 16)
        s = 1.0 / jnp.sqrt(hidden)

        def u(k, shape):
            return jax.random.uniform(k, shape, jnp.float32, -s, s)

        def pad_emb(k):
            # (V_PAD, H_PAD): real block [:vocab, :hidden], rest zero.
            return jnp.zeros((V_PAD, H_PAD), jnp.float32).at[
                :vocab, :hidden].set(u(k, (vocab, hidden)))

        def stacked_gates(kw, kb):
            # Stack r,z,n gate weights into one (H_PAD, 3*H_PAD) operand
            # (zero padding keeps the padded hidden lanes exactly zero).
            # NOTE: layout is (H_in, H_out) used as x @ W; porting a PyTorch
            # state_dict (weight_ih_l0: (3H, H), applied as x @ W.T) would
            # need a transpose + gate-order check.
            kws = jax.random.split(kw, 3)
            kbs = jax.random.split(kb, 3)
            W = jnp.zeros((H_PAD, 3 * H_PAD), jnp.float32)
            b = jnp.zeros((1, 3 * H_PAD), jnp.float32)
            for g in range(3):
                W = W.at[:hidden, g * H_PAD:g * H_PAD + hidden].set(
                    u(kws[g], (hidden, hidden)))
                b = b.at[:, g * H_PAD:g * H_PAD + hidden].set(
                    u(kbs[g], (1, hidden)))
            return W, b

        def fold_bias(b_ih, b_hh):
            # b_hr, b_hz are plain additive constants on the r/z pre-acts ->
            # fold into b_ih; keep b_hn separate (multiplied by r in-kernel).
            folded = b_ih.at[:, :2 * H_PAD].add(b_hh[:, :2 * H_PAD])
            b_hn = b_hh[:, 2 * H_PAD:]
            return folded, b_hn

        # encoder params
        self.enc_emb = pad_emb(ks[0])
        self.enc_wih, enc_bih = stacked_gates(ks[1], ks[2])
        self.enc_whh, enc_bhh = stacked_gates(ks[3], ks[4])
        self.enc_bih, self.enc_bhn = fold_bias(enc_bih, enc_bhh)
        # decoder params
        self.dec_emb = pad_emb(ks[5])
        self.dec_wih, dec_bih = stacked_gates(ks[6], ks[7])
        self.dec_whh, dec_bhh = stacked_gates(ks[8], ks[9])
        self.dec_bih, self.dec_bhn = fold_bias(dec_bih, dec_bhh)
        # output projection to vocab (padded to lane width)
        self.w_out = jnp.zeros((H_PAD, V_PAD), jnp.float32).at[
            :hidden, :vocab].set(u(ks[10], (hidden, vocab)))
        self.b_out = jnp.zeros((1, V_PAD), jnp.float32).at[:, :vocab].set(
            u(ks[11], (1, vocab)))

    # -- host-side glue (tiny int32 reshapes only; no activation transposes) --
    def _pad_ids_time_major(self, inputs):
        # (B, T) int32 -> (T*B_PAD, 1) time-major, padded batch rows use id 0
        # (they never interact with real rows and are sliced off at the end).
        B, T = inputs.shape
        assert B <= B_PAD, "batch > 8 needs a batch-tile grid axis"
        ids = jnp.zeros((T, B_PAD), jnp.int32).at[:, :B].set(inputs.T)
        return ids.reshape(T * B_PAD, 1)

    def _pad_hidden(self, B, hidden=None):
        # Explicit zero-pad on every entry point keeps padded hidden lanes /
        # batch rows exactly zero (required for the padded-lane invariant).
        h0 = jnp.zeros((B_PAD, H_PAD), jnp.float32)
        if hidden is not None:
            h0 = h0.at[:B, :self.hidden].set(hidden[:, :self.hidden])
        return h0

    def bridge(self, context):
        # State(context=context): decoder consumes encoder final hidden.
        return context

    def forward(self, input_encoder, input_decoder, encoder_hidden=None):
        B, T_dec = input_decoder.shape
        enc_ids = self._pad_ids_time_major(input_encoder)
        dec_ids = self._pad_ids_time_major(input_decoder)
        h0 = self._pad_hidden(B, encoder_hidden)
        logits_flat, _h_t = seq2seq_fused(
            enc_ids, dec_ids, h0,
            self.enc_emb, self.enc_wih, self.enc_whh,
            self.enc_bih, self.enc_bhn,
            self.dec_emb, self.dec_wih, self.dec_whh,
            self.dec_bih, self.dec_bhn,
            self.w_out, self.b_out)
        logits = logits_flat.reshape(T_dec, B_PAD, V_PAD)[:, :B, :self.vocab]
        return jnp.transpose(logits, (1, 0, 2))              # (B, T_dec, V)

    # TODO(synk): generate()/_decode_step() beam search is host-side control
    # flow (SequenceGenerator) and data_parallel device placement; not
    # expressed as Pallas kernels.


if __name__ == "__main__":
    key = jax.random.PRNGKey(0)
    k_model, k_enc, k_dec = jax.random.split(key, 3)

    B, T_ENC, T_DEC = 2, 8, 8
    model = Seq2SeqPallas(k_model)

    input_encoder = jax.random.randint(k_enc, (B, T_ENC), 0, VOCAB, jnp.int32)
    input_decoder = jax.random.randint(k_dec, (B, T_DEC), 0, VOCAB, jnp.int32)

    out = model.forward(input_encoder, input_decoder)
    out = jax.block_until_ready(out)
    assert out.shape == (B, T_DEC, VOCAB)
    assert jnp.all(jnp.isfinite(out))
    print("KERNEL_OK")
</pallas_src>

<mosaic_0001>
module attributes {stable_mosaic.version = 11 : i64} {
  func.func @kernel(%arg0: i32, %arg1: memref<64x1xi32, #tpu.memory_space<vmem>>, %arg2: memref<64x1xi32, #tpu.memory_space<vmem>>, %arg3: memref<8x128xf32, #tpu.memory_space<vmem>>, %arg4: memref<128x128xf32, #tpu.memory_space<vmem>>, %arg5: memref<128x384xf32, #tpu.memory_space<vmem>>, %arg6: memref<128x384xf32, #tpu.memory_space<vmem>>, %arg7: memref<1x384xf32, #tpu.memory_space<vmem>>, %arg8: memref<1x128xf32, #tpu.memory_space<vmem>>, %arg9: memref<128x128xf32, #tpu.memory_space<vmem>>, %arg10: memref<128x384xf32, #tpu.memory_space<vmem>>, %arg11: memref<128x384xf32, #tpu.memory_space<vmem>>, %arg12: memref<1x384xf32, #tpu.memory_space<vmem>>, %arg13: memref<1x128xf32, #tpu.memory_space<vmem>>, %arg14: memref<128x128xf32, #tpu.memory_space<vmem>>, %arg15: memref<1x128xf32, #tpu.memory_space<vmem>>, %arg16: memref<64x128xf32, #tpu.memory_space<vmem>>, %arg17: memref<8x128xf32, #tpu.memory_space<vmem>>, %arg18: memref<64x128xf32, #tpu.memory_space<vmem>>) attributes {dimension_semantics = [#tpu.dimension_semantics<arbitrary>], iteration_bounds = array<i64: 1>, scalar_prefetch = 0 : i64, scratch_operands = 1 : i64, tpu.core_type = #tpu.core_type<tc>, window_params = [{pipeline_mode = #tpu.pipeline_mode<synchronous>, transform_indices = @transform_0, window_bounds = array<i64: 64, 1>}, {pipeline_mode = #tpu.pipeline_mode<synchronous>, transform_indices = @transform_1, window_bounds = array<i64: 64, 1>}, {pipeline_mode = #tpu.pipeline_mode<synchronous>, transform_indices = @transform_2, window_bounds = array<i64: 8, 128>}, {pipeline_mode = #tpu.pipeline_mode<synchronous>, transform_indices = @transform_3, window_bounds = array<i64: 128, 128>}, {pipeline_mode = #tpu.pipeline_mode<synchronous>, transform_indices = @transform_4, window_bounds = array<i64: 128, 384>}, {pipeline_mode = #tpu.pipeline_mode<synchronous>, transform_indices = @transform_5, window_bounds = array<i64: 128, 384>}, {pipeline_mode = #tpu.pipeline_mode<synchronous>, transform_indices = @transform_6, window_bounds = array<i64: 1, 384>}, {pipeline_mode = #tpu.pipeline_mode<synchronous>, transform_indices = @transform_7, window_bounds = array<i64: 1, 128>}, {pipeline_mode = #tpu.pipeline_mode<synchronous>, transform_indices = @transform_8, window_bounds = array<i64: 128, 128>}, {pipeline_mode = #tpu.pipeline_mode<synchronous>, transform_indices = @transform_9, window_bounds = array<i64: 128, 384>}, {pipeline_mode = #tpu.pipeline_mode<synchronous>, transform_indices = @transform_10, window_bounds = array<i64: 128, 384>}, {pipeline_mode = #tpu.pipeline_mode<synchronous>, transform_indices = @transform_11, window_bounds = array<i64: 1, 384>}, {pipeline_mode = #tpu.pipeline_mode<synchronous>, transform_indices = @transform_12, window_bounds = array<i64: 1, 128>}, {pipeline_mode = #tpu.pipeline_mode<synchronous>, transform_indices = @transform_13, window_bounds = array<i64: 128, 128>}, {pipeline_mode = #tpu.pipeline_mode<synchronous>, transform_indices = @transform_14, window_bounds = array<i64: 1, 128>}, {pipeline_mode = #tpu.pipeline_mode<synchronous>, transform_indices = @transform_15, window_bounds = array<i64: 64, 128>}, {pipeline_mode = #tpu.pipeline_mode<synchronous>, transform_indices = @transform_16, window_bounds = array<i64: 8, 128>}]} {
    %c0 = arith.constant 0 : index
    %c0_0 = arith.constant 0 : index
    %0 = vector.load %arg1[%c0, %c0_0] : memref<64x1xi32, #tpu.memory_space<vmem>>, vector<64x1xi32>
    %1 = tpu.iota {dimensions = array<i32: 1>} : vector<64x128xi32>
    %2 = vector.broadcast %0 : vector<64x1xi32> to vector<64x128xi32>
    %3 = arith.cmpi eq, %2, %1 : vector<64x128xi32>
    %4 = arith.extui %3 : vector<64x128xi1> to vector<64x128xi32>
    %5 = arith.sitofp %4 : vector<64x128xi32> to vector<64x128xf32>
    %c0_1 = arith.constant 0 : index
    %c0_2 = arith.constant 0 : index
    %6 = vector.load %arg4[%c0_1, %c0_2] : memref<128x128xf32, #tpu.memory_space<vmem>>, vector<128x128xf32>
    %cst = arith.constant dense<0.000000e+00> : vector<64x128xf32>
    %7 = tpu.matmul %5, %6, %cst {dimension_numbers = #tpu.dot_dimension_numbers<[1], [0], [0], [1], [0, 0, 1, 1], [], []>} : vector<64x128xf32>, vector<128x128xf32>, vector<64x128xf32> -> vector<64x128xf32>
    %c0_3 = arith.constant 0 : index
    %c0_4 = arith.constant 0 : index
    %8 = vector.load %arg3[%c0_3, %c0_4] : memref<8x128xf32, #tpu.memory_space<vmem>>, vector<8x128xf32>
    %c0_5 = arith.constant 0 : index
    %c0_6 = arith.constant 0 : index
    %9 = vector.load %arg5[%c0_5, %c0_6] : memref<128x384xf32, #tpu.memory_space<vmem>>, vector<128x384xf32>
    %cst_7 = arith.constant dense<0.000000e+00> : vector<64x384xf32>
    %10 = tpu.matmul %7, %9, %cst_7 {dimension_numbers = #tpu.dot_dimension_numbers<[1], [0], [0], [1], [0, 0, 1, 1], [], []>} : vector<64x128xf32>, vector<128x384xf32>, vector<64x384xf32> -> vector<64x384xf32>
    %c0_8 = arith.constant 0 : index
    %c0_9 = arith.constant 0 : index
    %11 = vector.load %arg7[%c0_8, %c0_9] : memref<1x384xf32, #tpu.memory_space<vmem>>, vector<1x384xf32>
    %12 = vector.broadcast %11 : vector<1x384xf32> to vector<64x384xf32>
    %13 = arith.addf %10, %12 : vector<64x384xf32>
    %c0_10 = arith.constant 0 : index
    %c0_11 = arith.constant 0 : index
    %14 = vector.load %arg6[%c0_10, %c0_11] : memref<128x384xf32, #tpu.memory_space<vmem>>, vector<128x384xf32>
    %c0_12 = arith.constant 0 : index
    %c0_13 = arith.constant 0 : index
    %15 = vector.load %arg8[%c0_12, %c0_13] : memref<1x128xf32, #tpu.memory_space<vmem>>, vector<1x128xf32>
    %16 = vector.extract_strided_slice %13 {offsets = [0, 0], sizes = [8, 384], strides = [1, 1]} : vector<64x384xf32> to vector<8x384xf32>
    %cst_14 = arith.constant dense<0.000000e+00> : vector<8x384xf32>
    %17 = tpu.matmul %8, %14, %cst_14 {dimension_numbers = #tpu.dot_dimension_numbers<[1], [0], [0], [1], [0, 0, 1, 1], [], []>} : vector<8x128xf32>, vector<128x384xf32>, vector<8x384xf32> -> vector<8x384xf32>
    %18 = vector.extract_strided_slice %16 {offsets = [0, 0], sizes = [8, 128], strides = [1, 1]} : vector<8x384xf32> to vector<8x128xf32>
    %19 = vector.extract_strided_slice %17 {offsets = [0, 0], sizes = [8, 128], strides = [1, 1]} : vector<8x384xf32> to vector<8x128xf32>
    %20 = arith.addf %18, %19 : vector<8x128xf32>
    %21 = arith.negf %20 : vector<8x128xf32>
    %22 = math.exp %21 : vector<8x128xf32>
    %cst_15 = arith.constant 1.000000e+00 : f32
    %23 = vector.broadcast %cst_15 : f32 to vector<8x128xf32>
    %24 = arith.addf %23, %22 : vector<8x128xf32>
    %25 = arith.divf %23, %24 : vector<8x128xf32>
    %26 = vector.extract_strided_slice %16 {offsets = [0, 128], sizes = [8, 128], strides = [1, 1]} : vector<8x384xf32> to vector<8x128xf32>
    %27 = vector.extract_strided_slice %17 {offsets = [0, 128], sizes = [8, 128], strides = [1, 1]} : vector<8x384xf32> to vector<8x128xf32>
    %28 = arith.addf %26, %27 : vector<8x128xf32>
    %29 = arith.negf %28 : vector<8x128xf32>
    %30 = math.exp %29 : vector<8x128xf32>
    %cst_16 = arith.constant 1.000000e+00 : f32
    %31 = vector.broadcast %cst_16 : f32 to vector<8x128xf32>
    %32 = arith.addf %31, %30 : vector<8x128xf32>
    %33 = arith.divf %31, %32 : vector<8x128xf32>
    %34 = vector.extract_strided_slice %16 {offsets = [0, 256], sizes = [8, 128], strides = [1, 1]} : vector<8x384xf32> to vector<8x128xf32>
    %35 = vector.extract_strided_slice %17 {offsets = [0, 256], sizes = [8, 128], strides = [1, 1]} : vector<8x384xf32> to vector<8x128xf32>
    %36 = vector.broadcast %15 : vector<1x128xf32> to vector<8x128xf32>
    %37 = arith.addf %35, %36 : vector<8x128xf32>
    %38 = arith.mulf %25, %37 : vector<8x128xf32>
    %39 = arith.addf %34, %38 : vector<8x128xf32>
    %40 = math.tanh %39 : vector<8x128xf32>
    %cst_17 = arith.constant 1.000000e+00 : f32
    %41 = vector.broadcast %cst_17 : f32 to vector<8x128xf32>
    %42 = arith.subf %41, %33 : vector<8x128xf32>
    %43 = arith.mulf %42, %40 : vector<8x128xf32>
    %44 = arith.mulf %33, %8 : vector<8x128xf32>
    %45 = arith.addf %43, %44 : vector<8x128xf32>
    %46 = vector.extract_strided_slice %13 {offsets = [8, 0], sizes = [8, 384], strides = [1, 1]} : vector<64x384xf32> to vector<8x384xf32>
    %cst_18 = arith.constant dense<0.000000e+00> : vector<8x384xf32>
    %47 = tpu.matmul %45, %14, %cst_18 {dimension_numbers = #tpu.dot_dimension_numbers<[1], [0], [0], [1], [0, 0, 1, 1], [], []>} : vector<8x128xf32>, vector<128x384xf32>, vector<8x384xf32> -> vector<8x384xf32>
    %48 = vector.extract_strided_slice %46 {offsets = [0, 0], sizes = [8, 128], strides = [1, 1]} : vector<8x384xf32> to vector<8x128xf32>
    %49 = vector.extract_strided_slice %47 {offsets = [0, 0], sizes = [8, 128], strides = [1, 1]} : vector<8x384xf32> to vector<8x128xf32>
    %50 = arith.addf %48, %49 : vector<8x128xf32>
    %51 = arith.negf %50 : vector<8x128xf32>
    %52 = math.exp %51 : vector<8x128xf32>
    %cst_19 = arith.constant 1.000000e+00 : f32
    %53 = vector.broadcast %cst_19 : f32 to vector<8x128xf32>
    %54 = arith.addf %53, %52 : vector<8x128xf32>
    %55 = arith.divf %53, %54 : vector<8x128xf32>
    %56 = vector.extract_strided_slice %46 {offsets = [0, 128], sizes = [8, 128], strides = [1, 1]} : vector<8x384xf32> to vector<8x128xf32>
    %57 = vector.extract_strided_slice %47 {offsets = [0, 128], sizes = [8, 128], strides = [1, 1]} : vector<8x384xf32> to vector<8x128xf32>
    %58 = arith.addf %56, %57 : vector<8x128xf32>
    %59 = arith.negf %58 : vector<8x128xf32>
    %60 = math.exp %59 : vector<8x128xf32>
    %cst_20 = arith.constant 1.000000e+00 : f32
    %61 = vector.broadcast %cst_20 : f32 to vector<8x128xf32>
    %62 = arith.addf %61, %60 : vector<8x128xf32>
    %63 = arith.divf %61, %62 : vector<8x128xf32>
    %64 = vector.extract_strided_slice %46 {offsets = [0, 256], sizes = [8, 128], strides = [1, 1]} : vector<8x384xf32> to vector<8x128xf32>
    %65 = vector.extract_strided_slice %47 {offsets = [0, 256], sizes = [8, 128], strides = [1, 1]} : vector<8x384xf32> to vector<8x128xf32>
    %66 = vector.broadcast %15 : vector<1x128xf32> to vector<8x128xf32>
    %67 = arith.addf %65, %66 : vector<8x128xf32>
    %68 = arith.mulf %55, %67 : vector<8x128xf32>
    %69 = arith.addf %64, %68 : vector<8x128xf32>
    %70 = math.tanh %69 : vector<8x128xf32>
    %cst_21 = arith.constant 1.000000e+00 : f32
    %71 = vector.broadcast %cst_21 : f32 to vector<8x128xf32>
    %72 = arith.subf %71, %63 : vector<8x128xf32>
    %73 = arith.mulf %72, %70 : vector<8x128xf32>
    %74 = arith.mulf %63, %45 : vector<8x128xf32>
    %75 = arith.addf %73, %74 : vector<8x128xf32>
    %76 = vector.extract_strided_slice %13 {offsets = [16, 0], sizes = [8, 384], strides = [1, 1]} : vector<64x384xf32> to vector<8x384xf32>
    %cst_22 = arith.constant dense<0.000000e+00> : vector<8x384xf32>
    %77 = tpu.matmul %75, %14, %cst_22 {dimension_numbers = #tpu.dot_dimension_numbers<[1], [0], [0], [1], [0, 0, 1, 1], [], []>} : vector<8x128xf32>, vector<128x384xf32>, vector<8x384xf32> -> vector<8x384xf32>
    %78 = vector.extract_strided_slice %76 {offsets = [0, 0], sizes = [8, 128], strides = [1, 1]} : vector<8x384xf32> to vector<8x128xf32>
    %79 = vector.extract_strided_slice %77 {offsets = [0, 0], sizes = [8, 128], strides = [1, 1]} : vector<8x384xf32> to vector<8x128xf32>
    %80 = arith.addf %78, %79 : vector<8x128xf32>
    %81 = arith.negf %80 : vector<8x128xf32>
    %82 = math.exp %81 : vector<8x128xf32>
    %cst_23 = arith.constant 1.000000e+00 : f32
    %83 = vector.broadcast %cst_23 : f32 to vector<8x128xf32>
    %84 = arith.addf %83, %82 : vector<8x128xf32>
    %85 = arith.divf %83, %84 : vector<8x128xf32>
    %86 = vector.extract_strided_slice %76 {offsets = [0, 128], sizes = [8, 128], strides = [1, 1]} : vector<8x384xf32> to vector<8x128xf32>
    %87 = vector.extract_strided_slice %77 {offsets = [0, 128], sizes = [8, 128], strides = [1, 1]} : vector<8x384xf32> to vector<8x128xf32>
    %88 = arith.addf %86, %87 : vector<8x128xf32>
    %89 = arith.negf %88 : vector<8x128xf32>
    %90 = math.exp %89 : vector<8x128xf32>
    %cst_24 = arith.constant 1.000000e+00 : f32
    %91 = vector.broadcast %cst_24 : f32 to vector<8x128xf32>
    %92 = arith.addf %91, %90 : vector<8x128xf32>
    %93 = arith.divf %91, %92 : vector<8x128xf32>
    %94 = vector.extract_strided_slice %76 {offsets = [0, 256], sizes = [8, 128], strides = [1, 1]} : vector<8x384xf32> to vector<8x128xf32>
    %95 = vector.extract_strided_slice %77 {offsets = [0, 256], sizes = [8, 128], strides = [1, 1]} : vector<8x384xf32> to vector<8x128xf32>
    %96 = vector.broadcast %15 : vector<1x128xf32> to vector<8x128xf32>
    %97 = arith.addf %95, %96 : vector<8x128xf32>
    %98 = arith.mulf %85, %97 : vector<8x128xf32>
    %99 = arith.addf %94, %98 : vector<8x128xf32>
    %100 = math.tanh %99 : vector<8x128xf32>
    %cst_25 = arith.constant 1.000000e+00 : f32
    %101 = vector.broadcast %cst_25 : f32 to vector<8x128xf32>
    %102 = arith.subf %101, %93 : vector<8x128xf32>
    %103 = arith.mulf %102, %100 : vector<8x128xf32>
    %104 = arith.mulf %93, %75 : vector<8x128xf32>
    %105 = arith.addf %103, %104 : vector<8x128xf32>
    %106 = vector.extract_strided_slice %13 {offsets = [24, 0], sizes = [8, 384], strides = [1, 1]} : vector<64x384xf32> to vector<8x384xf32>
    %cst_26 = arith.constant dense<0.000000e+00> : vector<8x384xf32>
    %107 = tpu.matmul %105, %14, %cst_26 {dimension_numbers = #tpu.dot_dimension_numbers<[1], [0], [0], [1], [0, 0, 1, 1], [], []>} : vector<8x128xf32>, vector<128x384xf32>, vector<8x384xf32> -> vector<8x384xf32>
    %108 = vector.extract_strided_slice %106 {offsets = [0, 0], sizes = [8, 128], strides = [1, 1]} : vector<8x384xf32> to vector<8x128xf32>
    %109 = vector.extract_strided_slice %107 {offsets = [0, 0], sizes = [8, 128], strides = [1, 1]} : vector<8x384xf32> to vector<8x128xf32>
    %110 = arith.addf %108, %109 : vector<8x128xf32>
    %111 = arith.negf %110 : vector<8x128xf32>
    %112 = math.exp %111 : vector<8x128xf32>
    %cst_27 = arith.constant 1.000000e+00 : f32
    %113 = vector.broadcast %cst_27 : f32 to vector<8x128xf32>
    %114 = arith.addf %113, %112 : vector<8x128xf32>
    %115 = arith.divf %113, %114 : vector<8x128xf32>
    %116 = vector.extract_strided_slice %106 {offsets = [0, 128], sizes = [8, 128], strides = [1, 1]} : vector<8x384xf32> to vector<8x128xf32>
    %117 = vector.extract_strided_slice %107 {offsets = [0, 128], sizes = [8, 128], strides = [1, 1]} : vector<8x384xf32> to vector<8x128xf32>
    %118 = arith.addf %116, %117 : vector<8x128xf32>
    %119 = arith.negf %118 : vector<8x128xf32>
    %120 = math.exp %119 : vector<8x128xf32>
    %cst_28 = arith.constant 1.000000e+00 : f32
    %121 = vector.broadcast %cst_28 : f32 to vector<8x128xf32>
    %122 = arith.addf %121, %120 : vector<8x128xf32>
    %123 = arith.divf %121, %122 : vector<8x128xf32>
    %124 = vector.extract_strided_slice %106 {offsets = [0, 256], sizes = [8, 128], strides = [1, 1]} : vector<8x384xf32> to vector<8x128xf32>
    %125 = vector.extract_strided_slice %107 {offsets = [0, 256], sizes = [8, 128], strides = [1, 1]} : vector<8x384xf32> to vector<8x128xf32>
    %126 = vector.broadcast %15 : vector<1x128xf32> to vector<8x128xf32>
    %127 = arith.addf %125, %126 : vector<8x128xf32>
    %128 = arith.mulf %115, %127 : vector<8x128xf32>
    %129 = arith.addf %124, %128 : vector<8x128xf32>
    %130 = math.tanh %129 : vector<8x128xf32>
    %cst_29 = arith.constant 1.000000e+00 : f32
    %131 = vector.broadcast %cst_29 : f32 to vector<8x128xf32>
    %132 = arith.subf %131, %123 : vector<8x128xf32>
    %133 = arith.mulf %132, %130 : vector<8x128xf32>
    %134 = arith.mulf %123, %105 : vector<8x128xf32>
    %135 = arith.addf %133, %134 : vector<8x128xf32>
    %136 = vector.extract_strided_slice %13 {offsets = [32, 0], sizes = [8, 384], strides = [1, 1]} : vector<64x384xf32> to vector<8x384xf32>
    %cst_30 = arith.constant dense<0.000000e+00> : vector<8x384xf32>
    %137 = tpu.matmul %135, %14, %cst_30 {dimension_numbers = #tpu.dot_dimension_numbers<[1], [0], [0], [1], [0, 0, 1, 1], [], []>} : vector<8x128xf32>, vector<128x384xf32>, vector<8x384xf32> -> vector<8x384xf32>
    %138 = vector.extract_strided_slice %136 {offsets = [0, 0], sizes = [8, 128], strides = [1, 1]} : vector<8x384xf32> to vector<8x128xf32>
    %139 = vector.extract_strided_slice %137 {offsets = [0, 0], sizes = [8, 128], strides = [1, 1]} : vector<8x384xf32> to vector<8x128xf32>
    %140 = arith.addf %138, %139 : vector<8x128xf32>
    %141 = arith.negf %140 : vector<8x128xf32>
    %142 = math.exp %141 : vector<8x128xf32>
    %cst_31 = arith.constant 1.000000e+00 : f32
    %143 = vector.broadcast %cst_31 : f32 to vector<8x128xf32>
    %144 = arith.addf %143, %142 : vector<8x128xf32>
    %145 = arith.divf %143, %144 : vector<8x128xf32>
    %146 = vector.extract_strided_slice %136 {offsets = [0, 128], sizes = [8, 128], strides = [1, 1]} : vector<8x384xf32> to vector<8x128xf32>
    %147 = vector.extract_strided_slice %137 {offsets = [0, 128], sizes = [8, 128], strides = [1, 1]} : vector<8x384xf32> to vector<8x128xf32>
    %148 = arith.addf %146, %147 : vector<8x128xf32>
    %149 = arith.negf %148 : vector<8x128xf32>
    %150 = math.exp %149 : vector<8x128xf32>
    %cst_32 = arith.constant 1.000000e+00 : f32
    %151 = vector.broadcast %cst_32 : f32 to vector<8x128xf32>
    %152 = arith.addf %151, %150 : vector<8x128xf32>
    %153 = arith.divf %151, %152 : vector<8x128xf32>
    %154 = vector.extract_strided_slice %136 {offsets = [0, 256], sizes = [8, 128], strides = [1, 1]} : vector<8x384xf32> to vector<8x128xf32>
    %155 = vector.extract_strided_slice %137 {offsets = [0, 256], sizes = [8, 128], strides = [1, 1]} : vector<8x384xf32> to vector<8x128xf32>
    %156 = vector.broadcast %15 : vector<1x128xf32> to vector<8x128xf32>
    %157 = arith.addf %155, %156 : vector<8x128xf32>
    %158 = arith.mulf %145, %157 : vector<8x128xf32>
    %159 = arith.addf %154, %158 : vector<8x128xf32>
    %160 = math.tanh %159 : vector<8x128xf32>
    %cst_33 = arith.constant 1.000000e+00 : f32
    %161 = vector.broadcast %cst_33 : f32 to vector<8x128xf32>
    %162 = arith.subf %161, %153 : vector<8x128xf32>
    %163 = arith.mulf %162, %160 : vector<8x128xf32>
    %164 = arith.mulf %153, %135 : vector<8x128xf32>
    %165 = arith.addf %163, %164 : vector<8x128xf32>
    %166 = vector.extract_strided_slice %13 {offsets = [40, 0], sizes = [8, 384], strides = [1, 1]} : vector<64x384xf32> to vector<8x384xf32>
    %cst_34 = arith.constant dense<0.000000e+00> : vector<8x384xf32>
    %167 = tpu.matmul %165, %14, %cst_34 {dimension_numbers = #tpu.dot_dimension_numbers<[1], [0], [0], [1], [0, 0, 1, 1], [], []>} : vector<8x128xf32>, vector<128x384xf32>, vector<8x384xf32> -> vector<8x384xf32>
    %168 = vector.extract_strided_slice %166 {offsets = [0, 0], sizes = [8, 128], strides = [1, 1]} : vector<8x384xf32> to vector<8x128xf32>
    %169 = vector.extract_strided_slice %167 {offsets = [0, 0], sizes = [8, 128], strides = [1, 1]} : vector<8x384xf32> to vector<8x128xf32>
    %170 = arith.addf %168, %169 : vector<8x128xf32>
    %171 = arith.negf %170 : vector<8x128xf32>
    %172 = math.exp %171 : vector<8x128xf32>
    %cst_35 = arith.constant 1.000000e+00 : f32
    %173 = vector.broadcast %cst_35 : f32 to vector<8x128xf32>
    %174 = arith.addf %173, %172 : vector<8x128xf32>
    %175 = arith.divf %173, %174 : vector<8x128xf32>
    %176 = vector.extract_strided_slice %166 {offsets = [0, 128], sizes = [8, 128], strides = [1, 1]} : vector<8x384xf32> to vector<8x128xf32>
    %177 = vector.extract_strided_slice %167 {offsets = [0, 128], sizes = [8, 128], strides = [1, 1]} : vector<8x384xf32> to vector<8x128xf32>
    %178 = arith.addf %176, %177 : vector<8x128xf32>
    %179 = arith.negf %178 : vector<8x128xf32>
    %180 = math.exp %179 : vector<8x128xf32>
    %cst_36 = arith.constant 1.000000e+00 : f32
    %181 = vector.broadcast %cst_36 : f32 to vector<8x128xf32>
    %182 = arith.addf %181, %180 : vector<8x128xf32>
    %183 = arith.divf %181, %182 : vector<8x128xf32>
    %184 = vector.extract_strided_slice %166 {offsets = [0, 256], sizes = [8, 128], strides = [1, 1]} : vector<8x384xf32> to vector<8x128xf32>
    %185 = vector.extract_strided_slice %167 {offsets = [0, 256], sizes = [8, 128], strides = [1, 1]} : vector<8x384xf32> to vector<8x128xf32>
    %186 = vector.broadcast %15 : vector<1x128xf32> to vector<8x128xf32>
    %187 = arith.addf %185, %186 : vector<8x128xf32>
    %188 = arith.mulf %175, %187 : vector<8x128xf32>
    %189 = arith.addf %184, %188 : vector<8x128xf32>
    %190 = math.tanh %189 : vector<8x128xf32>
    %cst_37 = arith.constant 1.000000e+00 : f32
    %191 = vector.broadcast %cst_37 : f32 to vector<8x128xf32>
    %192 = arith.subf %191, %183 : vector<8x128xf32>
    %193 = arith.mulf %192, %190 : vector<8x128xf32>
    %194 = arith.mulf %183, %165 : vector<8x128xf32>
    %195 = arith.addf %193, %194 : vector<8x128xf32>
    %196 = vector.extract_strided_slice %13 {offsets = [48, 0], sizes = [8, 384], strides = [1, 1]} : vector<64x384xf32> to vector<8x384xf32>
    %cst_38 = arith.constant dense<0.000000e+00> : vector<8x384xf32>
    %197 = tpu.matmul %195, %14, %cst_38 {dimension_numbers = #tpu.dot_dimension_numbers<[1], [0], [0], [1], [0, 0, 1, 1], [], []>} : vector<8x128xf32>, vector<128x384xf32>, vector<8x384xf32> -> vector<8x384xf32>
    %198 = vector.extract_strided_slice %196 {offsets = [0, 0], sizes = [8, 128], strides = [1, 1]} : vector<8x384xf32> to vector<8x128xf32>
    %199 = vector.extract_strided_slice %197 {offsets = [0, 0], sizes = [8, 128], strides = [1, 1]} : vector<8x384xf32> to vector<8x128xf32>
    %200 = arith.addf %198, %199 : vector<8x128xf32>
    %201 = arith.negf %200 : vector<8x128xf32>
    %202 = math.exp %201 : vector<8x128xf32>
    %cst_39 = arith.constant 1.000000e+00 : f32
    %203 = vector.broadcast %cst_39 : f32 to vector<8x128xf32>
    %204 = arith.addf %203, %202 : vector<8x128xf32>
    %205 = arith.divf %203, %204 : vector<8x128xf32>
    %206 = vector.extract_strided_slice %196 {offsets = [0, 128], sizes = [8, 128], strides = [1, 1]} : vector<8x384xf32> to vector<8x128xf32>
    %207 = vector.extract_strided_slice %197 {offsets = [0, 128], sizes = [8, 128], strides = [1, 1]} : vector<8x384xf32> to vector<8x128xf32>
    %208 = arith.addf %206, %207 : vector<8x128xf32>
    %209 = arith.negf %208 : vector<8x128xf32>
    %210 = math.exp %209 : vector<8x128xf32>
    %cst_40 = arith.constant 1.000000e+00 : f32
    %211 = vector.broadcast %cst_40 : f32 to vector<8x128xf32>
    %212 = arith.addf %211, %210 : vector<8x128xf32>
    %213 = arith.divf %211, %212 : vector<8x128xf32>
    %214 = vector.extract_strided_slice %196 {offsets = [0, 256], sizes = [8, 128], strides = [1, 1]} : vector<8x384xf32> to vector<8x128xf32>
    %215 = vector.extract_strided_slice %197 {offsets = [0, 256], sizes = [8, 128], strides = [1, 1]} : vector<8x384xf32> to vector<8x128xf32>
    %216 = vector.broadcast %15 : vector<1x128xf32> to vector<8x128xf32>
    %217 = arith.addf %215, %216 : vector<8x128xf32>
    %218 = arith.mulf %205, %217 : vector<8x128xf32>
    %219 = arith.addf %214, %218 : vector<8x128xf32>
    %220 = math.tanh %219 : vector<8x128xf32>
    %cst_41 = arith.constant 1.000000e+00 : f32
    %221 = vector.broadcast %cst_41 : f32 to vector<8x128xf32>
    %222 = arith.subf %221, %213 : vector<8x128xf32>
    %223 = arith.mulf %222, %220 : vector<8x128xf32>
    %224 = arith.mulf %213, %195 : vector<8x128xf32>
    %225 = arith.addf %223, %224 : vector<8x128xf32>
    %226 = vector.extract_strided_slice %13 {offsets = [56, 0], sizes = [8, 384], strides = [1, 1]} : vector<64x384xf32> to vector<8x384xf32>
    %cst_42 = arith.constant dense<0.000000e+00> : vector<8x384xf32>
    %227 = tpu.matmul %225, %14, %cst_42 {dimension_numbers = #tpu.dot_dimension_numbers<[1], [0], [0], [1], [0, 0, 1, 1], [], []>} : vector<8x128xf32>, vector<128x384xf32>, vector<8x384xf32> -> vector<8x384xf32>
    %228 = vector.extract_strided_slice %226 {offsets = [0, 0], sizes = [8, 128], strides = [1, 1]} : vector<8x384xf32> to vector<8x128xf32>
    %229 = vector.extract_strided_slice %227 {offsets = [0, 0], sizes = [8, 128], strides = [1, 1]} : vector<8x384xf32> to vector<8x128xf32>
    %230 = arith.addf %228, %229 : vector<8x128xf32>
    %231 = arith.negf %230 : vector<8x128xf32>
    %232 = math.exp %231 : vector<8x128xf32>
    %cst_43 = arith.constant 1.000000e+00 : f32
    %233 = vector.broadcast %cst_43 : f32 to vector<8x128xf32>
    %234 = arith.addf %233, %232 : vector<8x128xf32>
    %235 = arith.divf %233, %234 : vector<8x128xf32>
    %236 = vector.extract_strided_slice %226 {offsets = [0, 128], sizes = [8, 128], strides = [1, 1]} : vector<8x384xf32> to vector<8x128xf32>
    %237 = vector.extract_strided_slice %227 {offsets = [0, 128], sizes = [8, 128], strides = [1, 1]} : vector<8x384xf32> to vector<8x128xf32>
    %238 = arith.addf %236, %237 : vector<8x128xf32>
    %239 = arith.negf %238 : vector<8x128xf32>
    %240 = math.exp %239 : vector<8x128xf32>
    %cst_44 = arith.constant 1.000000e+00 : f32
    %241 = vector.broadcast %cst_44 : f32 to vector<8x128xf32>
    %242 = arith.addf %241, %240 : vector<8x128xf32>
    %243 = arith.divf %241, %242 : vector<8x128xf32>
    %244 = vector.extract_strided_slice %226 {offsets = [0, 256], sizes = [8, 128], strides = [1, 1]} : vector<8x384xf32> to vector<8x128xf32>
    %245 = vector.extract_strided_slice %227 {offsets = [0, 256], sizes = [8, 128], strides = [1, 1]} : vector<8x384xf32> to vector<8x128xf32>
    %246 = vector.broadcast %15 : vector<1x128xf32> to vector<8x128xf32>
    %247 = arith.addf %245, %246 : vector<8x128xf32>
    %248 = arith.mulf %235, %247 : vector<8x128xf32>
    %249 = arith.addf %244, %248 : vector<8x128xf32>
    %250 = math.tanh %249 : vector<8x128xf32>
    %cst_45 = arith.constant 1.000000e+00 : f32
    %251 = vector.broadcast %cst_45 : f32 to vector<8x128xf32>
    %252 = arith.subf %251, %243 : vector<8x128xf32>
    %253 = arith.mulf %252, %250 : vector<8x128xf32>
    %254 = arith.mulf %243, %225 : vector<8x128xf32>
    %255 = arith.addf %253, %254 : vector<8x128xf32>
    %c0_46 = arith.constant 0 : index
    %c0_47 = arith.constant 0 : index
    %256 = vector.load %arg2[%c0_46, %c0_47] : memref<64x1xi32, #tpu.memory_space<vmem>>, vector<64x1xi32>
    %257 = tpu.iota {dimensions = array<i32: 1>} : vector<64x128xi32>
    %258 = vector.broadcast %256 : vector<64x1xi32> to vector<64x128xi32>
    %259 = arith.cmpi eq, %258, %257 : vector<64x128xi32>
    %260 = arith.extui %259 : vector<64x128xi1> to vector<64x128xi32>
    %261 = arith.sitofp %260 : vector<64x128xi32> to vector<64x128xf32>
    %c0_48 = arith.constant 0 : index
    %c0_49 = arith.constant 0 : index
    %262 = vector.load %arg9[%c0_48, %c0_49] : memref<128x128xf32, #tpu.memory_space<vmem>>, vector<128x128xf32>
    %cst_50 = arith.constant dense<0.000000e+00> : vector<64x128xf32>
    %263 = tpu.matmul %261, %262, %cst_50 {dimension_numbers = #tpu.dot_dimension_numbers<[1], [0], [0], [1], [0, 0, 1, 1], [], []>} : vector<64x128xf32>, vector<128x128xf32>, vector<64x128xf32> -> vector<64x128xf32>
    %c0_51 = arith.constant 0 : index
    %c0_52 = arith.constant 0 : index
    %264 = vector.load %arg10[%c0_51, %c0_52] : memref<128x384xf32, #tpu.memory_space<vmem>>, vector<128x384xf32>
    %cst_53 = arith.constant dense<0.000000e+00> : vector<64x384xf32>
    %265 = tpu.matmul %263, %264, %cst_53 {dimension_numbers = #tpu.dot_dimension_numbers<[1], [0], [0], [1], [0, 0, 1, 1], [], []>} : vector<64x128xf32>, vector<128x384xf32>, vector<64x384xf32> -> vector<64x384xf32>
    %c0_54 = arith.constant 0 : index
    %c0_55 = arith.constant 0 : index
    %266 = vector.load %arg12[%c0_54, %c0_55] : memref<1x384xf32, #tpu.memory_space<vmem>>, vector<1x384xf32>
    %267 = vector.broadcast %266 : vector<1x384xf32> to vector<64x384xf32>
    %268 = arith.addf %265, %267 : vector<64x384xf32>
    %c0_56 = arith.constant 0 : index
    %c0_57 = arith.constant 0 : index
    %269 = vector.load %arg11[%c0_56, %c0_57] : memref<128x384xf32, #tpu.memory_space<vmem>>, vector<128x384xf32>
    %c0_58 = arith.constant 0 : index
    %c0_59 = arith.constant 0 : index
    %270 = vector.load %arg13[%c0_58, %c0_59] : memref<1x128xf32, #tpu.memory_space<vmem>>, vector<1x128xf32>
    %271 = vector.extract_strided_slice %268 {offsets = [0, 0], sizes = [8, 384], strides = [1, 1]} : vector<64x384xf32> to vector<8x384xf32>
    %cst_60 = arith.constant dense<0.000000e+00> : vector<8x384xf32>
    %272 = tpu.matmul %255, %269, %cst_60 {dimension_numbers = #tpu.dot_dimension_numbers<[1], [0], [0], [1], [0, 0, 1, 1], [], []>} : vector<8x128xf32>, vector<128x384xf32>, vector<8x384xf32> -> vector<8x384xf32>
    %273 = vector.extract_strided_slice %271 {offsets = [0, 0], sizes = [8, 128], strides = [1, 1]} : vector<8x384xf32> to vector<8x128xf32>
    %274 = vector.extract_strided_slice %272 {offsets = [0, 0], sizes = [8, 128], strides = [1, 1]} : vector<8x384xf32> to vector<8x128xf32>
    %275 = arith.addf %273, %274 : vector<8x128xf32>
    %276 = arith.negf %275 : vector<8x128xf32>
    %277 = math.exp %276 : vector<8x128xf32>
    %cst_61 = arith.constant 1.000000e+00 : f32
    %278 = vector.broadcast %cst_61 : f32 to vector<8x128xf32>
    %279 = arith.addf %278, %277 : vector<8x128xf32>
    %280 = arith.divf %278, %279 : vector<8x128xf32>
    %281 = vector.extract_strided_slice %271 {offsets = [0, 128], sizes = [8, 128], strides = [1, 1]} : vector<8x384xf32> to vector<8x128xf32>
    %282 = vector.extract_strided_slice %272 {offsets = [0, 128], sizes = [8, 128], strides = [1, 1]} : vector<8x384xf32> to vector<8x128xf32>
    %283 = arith.addf %281, %282 : vector<8x128xf32>
    %284 = arith.negf %283 : vector<8x128xf32>
    %285 = math.exp %284 : vector<8x128xf32>
    %cst_62 = arith.constant 1.000000e+00 : f32
    %286 = vector.broadcast %cst_62 : f32 to vector<8x128xf32>
    %287 = arith.addf %286, %285 : vector<8x128xf32>
    %288 = arith.divf %286, %287 : vector<8x128xf32>
    %289 = vector.extract_strided_slice %271 {offsets = [0, 256], sizes = [8, 128], strides = [1, 1]} : vector<8x384xf32> to vector<8x128xf32>
    %290 = vector.extract_strided_slice %272 {offsets = [0, 256], sizes = [8, 128], strides = [1, 1]} : vector<8x384xf32> to vector<8x128xf32>
    %291 = vector.broadcast %270 : vector<1x128xf32> to vector<8x128xf32>
    %292 = arith.addf %290, %291 : vector<8x128xf32>
    %293 = arith.mulf %280, %292 : vector<8x128xf32>
    %294 = arith.addf %289, %293 : vector<8x128xf32>
    %295 = math.tanh %294 : vector<8x128xf32>
    %cst_63 = arith.constant 1.000000e+00 : f32
    %296 = vector.broadcast %cst_63 : f32 to vector<8x128xf32>
    %297 = arith.subf %296, %288 : vector<8x128xf32>
    %298 = arith.mulf %297, %295 : vector<8x128xf32>
    %299 = arith.mulf %288, %255 : vector<8x128xf32>
    %300 = arith.addf %298, %299 : vector<8x128xf32>
    %c0_64 = arith.constant 0 : index
    %c0_65 = arith.constant 0 : index
    %301 = vector.load %arg18[%c0_64, %c0_65] : memref<64x128xf32, #tpu.memory_space<vmem>>, vector<8x128xf32>
    tpu.vector_store %arg18[%c0_64, %c0_65], %300 {strides = array<i32>} : memref<64x128xf32, #tpu.memory_space<vmem>>, vector<8x128xf32>,
    %302 = vector.extract_strided_slice %268 {offsets = [8, 0], sizes = [8, 384], strides = [1, 1]} : vector<64x384xf32> to vector<8x384xf32>
    %cst_66 = arith.constant dense<0.000000e+00> : vector<8x384xf32>
    %303 = tpu.matmul %300, %269, %cst_66 {dimension_numbers = #tpu.dot_dimension_numbers<[1], [0], [0], [1], [0, 0, 1, 1], [], []>} : vector<8x128xf32>, vector<128x384xf32>, vector<8x384xf32> -> vector<8x384xf32>
    %304 = vector.extract_strided_slice %302 {offsets = [0, 0], sizes = [8, 128], strides = [1, 1]} : vector<8x384xf32> to vector<8x128xf32>
    %305 = vector.extract_strided_slice %303 {offsets = [0, 0], sizes = [8, 128], strides = [1, 1]} : vector<8x384xf32> to vector<8x128xf32>
    %306 = arith.addf %304, %305 : vector<8x128xf32>
    %307 = arith.negf %306 : vector<8x128xf32>
    %308 = math.exp %307 : vector<8x128xf32>
    %cst_67 = arith.constant 1.000000e+00 : f32
    %309 = vector.broadcast %cst_67 : f32 to vector<8x128xf32>
    %310 = arith.addf %309, %308 : vector<8x128xf32>
    %311 = arith.divf %309, %310 : vector<8x128xf32>
    %312 = vector.extract_strided_slice %302 {offsets = [0, 128], sizes = [8, 128], strides = [1, 1]} : vector<8x384xf32> to vector<8x128xf32>
    %313 = vector.extract_strided_slice %303 {offsets = [0, 128], sizes = [8, 128], strides = [1, 1]} : vector<8x384xf32> to vector<8x128xf32>
    %314 = arith.addf %312, %313 : vector<8x128xf32>
    %315 = arith.negf %314 : vector<8x128xf32>
    %316 = math.exp %315 : vector<8x128xf32>
    %cst_68 = arith.constant 1.000000e+00 : f32
    %317 = vector.broadcast %cst_68 : f32 to vector<8x128xf32>
    %318 = arith.addf %317, %316 : vector<8x128xf32>
    %319 = arith.divf %317, %318 : vector<8x128xf32>
    %320 = vector.extract_strided_slice %302 {offsets = [0, 256], sizes = [8, 128], strides = [1, 1]} : vector<8x384xf32> to vector<8x128xf32>
    %321 = vector.extract_strided_slice %303 {offsets = [0, 256], sizes = [8, 128], strides = [1, 1]} : vector<8x384xf32> to vector<8x128xf32>
    %322 = vector.broadcast %270 : vector<1x128xf32> to vector<8x128xf32>
    %323 = arith.addf %321, %322 : vector<8x128xf32>
    %324 = arith.mulf %311, %323 : vector<8x128xf32>
    %325 = arith.addf %320, %324 : vector<8x128xf32>
    %326 = math.tanh %325 : vector<8x128xf32>
    %cst_69 = arith.constant 1.000000e+00 : f32
    %327 = vector.broadcast %cst_69 : f32 to vector<8x128xf32>
    %328 = arith.subf %327, %319 : vector<8x128xf32>
    %329 = arith.mulf %328, %326 : vector<8x128xf32>
    %330 = arith.mulf %319, %300 : vector<8x128xf32>
    %331 = arith.addf %329, %330 : vector<8x128xf32>
    %c8 = arith.constant 8 : index
    %c0_70 = arith.constant 0 : index
    %332 = vector.load %arg18[%c8, %c0_70] : memref<64x128xf32, #tpu.memory_space<vmem>>, vector<8x128xf32>
    tpu.vector_store %arg18[%c8, %c0_70], %331 {strides = array<i32>} : memref<64x128xf32, #tpu.memory_space<vmem>>, vector<8x128xf32>,
    %333 = vector.extract_strided_slice %268 {offsets = [16, 0], sizes = [8, 384], strides = [1, 1]} : vector<64x384xf32> to vector<8x384xf32>
    %cst_71 = arith.constant dense<0.000000e+00> : vector<8x384xf32>
    %334 = tpu.matmul %331, %269, %cst_71 {dimension_numbers = #tpu.dot_dimension_numbers<[1], [0], [0], [1], [0, 0, 1, 1], [], []>} : vector<8x128xf32>, vector<128x384xf32>, vector<8x384xf32> -> vector<8x384xf32>
    %335 = vector.extract_strided_slice %333 {offsets = [0, 0], sizes = [8, 128], strides = [1, 1]} : vector<8x384xf32> to vector<8x128xf32>
    %336 = vector.extract_strided_slice %334 {offsets = [0, 0], sizes = [8, 128], strides = [1, 1]} : vector<8x384xf32> to vector<8x128xf32>
    %337 = arith.addf %335, %336 : vector<8x128xf32>
    %338 = arith.negf %337 : vector<8x128xf32>
    %339 = math.exp %338 : vector<8x128xf32>
    %cst_72 = arith.constant 1.000000e+00 : f32
    %340 = vector.broadcast %cst_72 : f32 to vector<8x128xf32>
    %341 = arith.addf %340, %339 : vector<8x128xf32>
    %342 = arith.divf %340, %341 : vector<8x128xf32>
    %343 = vector.extract_strided_slice %333 {offsets = [0, 128], sizes = [8, 128], strides = [1, 1]} : vector<8x384xf32> to vector<8x128xf32>
    %344 = vector.extract_strided_slice %334 {offsets = [0, 128], sizes = [8, 128], strides = [1, 1]} : vector<8x384xf32> to vector<8x128xf32>
    %345 = arith.addf %343, %344 : vector<8x128xf32>
    %346 = arith.negf %345 : vector<8x128xf32>
    %347 = math.exp %346 : vector<8x128xf32>
    %cst_73 = arith.constant 1.000000e+00 : f32
    %348 = vector.broadcast %cst_73 : f32 to vector<8x128xf32>
    %349 = arith.addf %348, %347 : vector<8x128xf32>
    %350 = arith.divf %348, %349 : vector<8x128xf32>
    %351 = vector.extract_strided_slice %333 {offsets = [0, 256], sizes = [8, 128], strides = [1, 1]} : vector<8x384xf32> to vector<8x128xf32>
    %352 = vector.extract_strided_slice %334 {offsets = [0, 256], sizes = [8, 128], strides = [1, 1]} : vector<8x384xf32> to vector<8x128xf32>
    %353 = vector.broadcast %270 : vector<1x128xf32> to vector<8x128xf32>
    %354 = arith.addf %352, %353 : vector<8x128xf32>
    %355 = arith.mulf %342, %354 : vector<8x128xf32>
    %356 = arith.addf %351, %355 : vector<8x128xf32>
    %357 = math.tanh %356 : vector<8x128xf32>
    %cst_74 = arith.constant 1.000000e+00 : f32
    %358 = vector.broadcast %cst_74 : f32 to vector<8x128xf32>
    %359 = arith.subf %358, %350 : vector<8x128xf32>
    %360 = arith.mulf %359, %357 : vector<8x128xf32>
    %361 = arith.mulf %350, %331 : vector<8x128xf32>
    %362 = arith.addf %360, %361 : vector<8x128xf32>
    %c16 = arith.constant 16 : index
    %c0_75 = arith.constant 0 : index
    %363 = vector.load %arg18[%c16, %c0_75] : memref<64x128xf32, #tpu.memory_space<vmem>>, vector<8x128xf32>
    tpu.vector_store %arg18[%c16, %c0_75], %362 {strides = array<i32>} : memref<64x128xf32, #tpu.memory_space<vmem>>, vector<8x128xf32>,
    %364 = vector.extract_strided_slice %268 {offsets = [24, 0], sizes = [8, 384], strides = [1, 1]} : vector<64x384xf32> to vector<8x384xf32>
    %cst_76 = arith.constant dense<0.000000e+00> : vector<8x384xf32>
    %365 = tpu.matmul %362, %269, %cst_76 {dimension_numbers = #tpu.dot_dimension_numbers<[1], [0], [0], [1], [0, 0, 1, 1], [], []>} : vector<8x128xf32>, vector<128x384xf32>, vector<8x384xf32> -> vector<8x384xf32>
    %366 = vector.extract_strided_slice %364 {offsets = [0, 0], sizes = [8, 128], strides = [1, 1]} : vector<8x384xf32> to vector<8x128xf32>
    %367 = vector.extract_strided_slice %365 {offsets = [0, 0], sizes = [8, 128], strides = [1, 1]} : vector<8x384xf32> to vector<8x128xf32>
    %368 = arith.addf %366, %367 : vector<8x128xf32>
    %369 = arith.negf %368 : vector<8x128xf32>
    %370 = math.exp %369 : vector<8x128xf32>
    %cst_77 = arith.constant 1.000000e+00 : f32
    %371 = vector.broadcast %cst_77 : f32 to vector<8x128xf32>
    %372 = arith.addf %371, %370 : vector<8x128xf32>
    %373 = arith.divf %371, %372 : vector<8x128xf32>
    %374 = vector.extract_strided_slice %364 {offsets = [0, 128], sizes = [8, 128], strides = [1, 1]} : vector<8x384xf32> to vector<8x128xf32>
    %375 = vector.extract_strided_slice %365 {offsets = [0, 128], sizes = [8, 128], strides = [1, 1]} : vector<8x384xf32> to vector<8x128xf32>
    %376 = arith.addf %374, %375 : vector<8x128xf32>
    %377 = arith.negf %376 : vector<8x128xf32>
    %378 = math.exp %377 : vector<8x128xf32>
    %cst_78 = arith.constant 1.000000e+00 : f32
    %379 = vector.broadcast %cst_78 : f32 to vector<8x128xf32>
    %380 = arith.addf %379, %378 : vector<8x128xf32>
    %381 = arith.divf %379, %380 : vector<8x128xf32>
    %382 = vector.extract_strided_slice %364 {offsets = [0, 256], sizes = [8, 128], strides = [1, 1]} : vector<8x384xf32> to vector<8x128xf32>
    %383 = vector.extract_strided_slice %365 {offsets = [0, 256], sizes = [8, 128], strides = [1, 1]} : vector<8x384xf32> to vector<8x128xf32>
    %384 = vector.broadcast %270 : vector<1x128xf32> to vector<8x128xf32>
    %385 = arith.addf %383, %384 : vector<8x128xf32>
    %386 = arith.mulf %373, %385 : vector<8x128xf32>
    %387 = arith.addf %382, %386 : vector<8x128xf32>
    %388 = math.tanh %387 : vector<8x128xf32>
    %cst_79 = arith.constant 1.000000e+00 : f32
    %389 = vector.broadcast %cst_79 : f32 to vector<8x128xf32>
    %390 = arith.subf %389, %381 : vector<8x128xf32>
    %391 = arith.mulf %390, %388 : vector<8x128xf32>
    %392 = arith.mulf %381, %362 : vector<8x128xf32>
    %393 = arith.addf %391, %392 : vector<8x128xf32>
    %c24 = arith.constant 24 : index
    %c0_80 = arith.constant 0 : index
    %394 = vector.load %arg18[%c24, %c0_80] : memref<64x128xf32, #tpu.memory_space<vmem>>, vector<8x128xf32>
    tpu.vector_store %arg18[%c24, %c0_80], %393 {strides = array<i32>} : memref<64x128xf32, #tpu.memory_space<vmem>>, vector<8x128xf32>,
    %395 = vector.extract_strided_slice %268 {offsets = [32, 0], sizes = [8, 384], strides = [1, 1]} : vector<64x384xf32> to vector<8x384xf32>
    %cst_81 = arith.constant dense<0.000000e+00> : vector<8x384xf32>
    %396 = tpu.matmul %393, %269, %cst_81 {dimension_numbers = #tpu.dot_dimension_numbers<[1], [0], [0], [1], [0, 0, 1, 1], [], []>} : vector<8x128xf32>, vector<128x384xf32>, vector<8x384xf32> -> vector<8x384xf32>
    %397 = vector.extract_strided_slice %395 {offsets = [0, 0], sizes = [8, 128], strides = [1, 1]} : vector<8x384xf32> to vector<8x128xf32>
    %398 = vector.extract_strided_slice %396 {offsets = [0, 0], sizes = [8, 128], strides = [1, 1]} : vector<8x384xf32> to vector<8x128xf32>
    %399 = arith.addf %397, %398 : vector<8x128xf32>
    %400 = arith.negf %399 : vector<8x128xf32>
    %401 = math.exp %400 : vector<8x128xf32>
    %cst_82 = arith.constant 1.000000e+00 : f32
    %402 = vector.broadcast %cst_82 : f32 to vector<8x128xf32>
    %403 = arith.addf %402, %401 : vector<8x128xf32>
    %404 = arith.divf %402, %403 : vector<8x128xf32>
    %405 = vector.extract_strided_slice %395 {offsets = [0, 128], sizes = [8, 128], strides = [1, 1]} : vector<8x384xf32> to vector<8x128xf32>
    %406 = vector.extract_strided_slice %396 {offsets = [0, 128], sizes = [8, 128], strides = [1, 1]} : vector<8x384xf32> to vector<8x128xf32>
    %407 = arith.addf %405, %406 : vector<8x128xf32>
    %408 = arith.negf %407 : vector<8x128xf32>
    %409 = math.exp %408 : vector<8x128xf32>
    %cst_83 = arith.constant 1.000000e+00 : f32
    %410 = vector.broadcast %cst_83 : f32 to vector<8x128xf32>
    %411 = arith.addf %410, %409 : vector<8x128xf32>
    %412 = arith.divf %410, %411 : vector<8x128xf32>
    %413 = vector.extract_strided_slice %395 {offsets = [0, 256], sizes = [8, 128], strides = [1, 1]} : vector<8x384xf32> to vector<8x128xf32>
    %414 = vector.extract_strided_slice %396 {offsets = [0, 256], sizes = [8, 128], strides = [1, 1]} : vector<8x384xf32> to vector<8x128xf32>
    %415 = vector.broadcast %270 : vector<1x128xf32> to vector<8x128xf32>
    %416 = arith.addf %414, %415 : vector<8x128xf32>
    %417 = arith.mulf %404, %416 : vector<8x128xf32>
    %418 = arith.addf %413, %417 : vector<8x128xf32>
    %419 = math.tanh %418 : vector<8x128xf32>
    %cst_84 = arith.constant 1.000000e+00 : f32
    %420 = vector.broadcast %cst_84 : f32 to vector<8x128xf32>
    %421 = arith.subf %420, %412 : vector<8x128xf32>
    %422 = arith.mulf %421, %419 : vector<8x128xf32>
    %423 = arith.mulf %412, %393 : vector<8x128xf32>
    %424 = arith.addf %422, %423 : vector<8x128xf32>
    %c32 = arith.constant 32 : index
    %c0_85 = arith.constant 0 : index
    %425 = vector.load %arg18[%c32, %c0_85] : memref<64x128xf32, #tpu.memory_space<vmem>>, vector<8x128xf32>
    tpu.vector_store %arg18[%c32, %c0_85], %424 {strides = array<i32>} : memref<64x128xf32, #tpu.memory_space<vmem>>, vector<8x128xf32>,
    %426 = vector.extract_strided_slice %268 {offsets = [40, 0], sizes = [8, 384], strides = [1, 1]} : vector<64x384xf32> to vector<8x384xf32>
    %cst_86 = arith.constant dense<0.000000e+00> : vector<8x384xf32>
    %427 = tpu.matmul %424, %269, %cst_86 {dimension_numbers = #tpu.dot_dimension_numbers<[1], [0], [0], [1], [0, 0, 1, 1], [], []>} : vector<8x128xf32>, vector<128x384xf32>, vector<8x384xf32> -> vector<8x384xf32>
    %428 = vector.extract_strided_slice %426 {offsets = [0, 0], sizes = [8, 128], strides = [1, 1]} : vector<8x384xf32> to vector<8x128xf32>
    %429 = vector.extract_strided_slice %427 {offsets = [0, 0], sizes = [8, 128], strides = [1, 1]} : vector<8x384xf32> to vector<8x128xf32>
    %430 = arith.addf %428, %429 : vector<8x128xf32>
    %431 = arith.negf %430 : vector<8x128xf32>
    %432 = math.exp %431 : vector<8x128xf32>
    %cst_87 = arith.constant 1.000000e+00 : f32
    %433 = vector.broadcast %cst_87 : f32 to vector<8x128xf32>
    %434 = arith.addf %433, %432 : vector<8x128xf32>
    %435 = arith.divf %433, %434 : vector<8x128xf32>
    %436 = vector.extract_strided_slice %426 {offsets = [0, 128], sizes = [8, 128], strides = [1, 1]} : vector<8x384xf32> to vector<8x128xf32>
    %437 = vector.extract_strided_slice %427 {offsets = [0, 128], sizes = [8, 128], strides = [1, 1]} : vector<8x384xf32> to vector<8x128xf32>
    %438 = arith.addf %436, %437 : vector<8x128xf32>
    %439 = arith.negf %438 : vector<8x128xf32>
    %440 = math.exp %439 : vector<8x128xf32>
    %cst_88 = arith.constant 1.000000e+00 : f32
    %441 = vector.broadcast %cst_88 : f32 to vector<8x128xf32>
    %442 = arith.addf %441, %440 : vector<8x128xf32>
    %443 = arith.divf %441, %442 : vector<8x128xf32>
    %444 = vector.extract_strided_slice %426 {offsets = [0, 256], sizes = [8, 128], strides = [1, 1]} : vector<8x384xf32> to vector<8x128xf32>
    %445 = vector.extract_strided_slice %427 {offsets = [0, 256], sizes = [8, 128], strides = [1, 1]} : vector<8x384xf32> to vector<8x128xf32>
    %446 = vector.broadcast %270 : vector<1x128xf32> to vector<8x128xf32>
    %447 = arith.addf %445, %446 : vector<8x128xf32>
    %448 = arith.mulf %435, %447 : vector<8x128xf32>
    %449 = arith.addf %444, %448 : vector<8x128xf32>
    %450 = math.tanh %449 : vector<8x128xf32>
    %cst_89 = arith.constant 1.000000e+00 : f32
    %451 = vector.broadcast %cst_89 : f32 to vector<8x128xf32>
    %452 = arith.subf %451, %443 : vector<8x128xf32>
    %453 = arith.mulf %452, %450 : vector<8x128xf32>
    %454 = arith.mulf %443, %424 : vector<8x128xf32>
    %455 = arith.addf %453, %454 : vector<8x128xf32>
    %c40 = arith.constant 40 : index
    %c0_90 = arith.constant 0 : index
    %456 = vector.load %arg18[%c40, %c0_90] : memref<64x128xf32, #tpu.memory_space<vmem>>, vector<8x128xf32>
    tpu.vector_store %arg18[%c40, %c0_90], %455 {strides = array<i32>} : memref<64x128xf32, #tpu.memory_space<vmem>>, vector<8x128xf32>,
    %457 = vector.extract_strided_slice %268 {offsets = [48, 0], sizes = [8, 384], strides = [1, 1]} : vector<64x384xf32> to vector<8x384xf32>
    %cst_91 = arith.constant dense<0.000000e+00> : vector<8x384xf32>
    %458 = tpu.matmul %455, %269, %cst_91 {dimension_numbers = #tpu.dot_dimension_numbers<[1], [0], [0], [1], [0, 0, 1, 1], [], []>} : vector<8x128xf32>, vector<128x384xf32>, vector<8x384xf32> -> vector<8x384xf32>
    %459 = vector.extract_strided_slice %457 {offsets = [0, 0], sizes = [8, 128], strides = [1, 1]} : vector<8x384xf32> to vector<8x128xf32>
    %460 = vector.extract_strided_slice %458 {offsets = [0, 0], sizes = [8, 128], strides = [1, 1]} : vector<8x384xf32> to vector<8x128xf32>
    %461 = arith.addf %459, %460 : vector<8x128xf32>
    %462 = arith.negf %461 : vector<8x128xf32>
    %463 = math.exp %462 : vector<8x128xf32>
    %cst_92 = arith.constant 1.000000e+00 : f32
    %464 = vector.broadcast %cst_92 : f32 to vector<8x128xf32>
    %465 = arith.addf %464, %463 : vector<8x128xf32>
    %466 = arith.divf %464, %465 : vector<8x128xf32>
    %467 = vector.extract_strided_slice %457 {offsets = [0, 128], sizes = [8, 128], strides = [1, 1]} : vector<8x384xf32> to vector<8x128xf32>
    %468 = vector.extract_strided_slice %458 {offsets = [0, 128], sizes = [8, 128], strides = [1, 1]} : vector<8x384xf32> to vector<8x128xf32>
    %469 = arith.addf %467, %468 : vector<8x128xf32>
    %470 = arith.negf %469 : vector<8x128xf32>
    %471 = math.exp %470 : vector<8x128xf32>
    %cst_93 = arith.constant 1.000000e+00 : f32
    %472 = vector.broadcast %cst_93 : f32 to vector<8x128xf32>
    %473 = arith.addf %472, %471 : vector<8x128xf32>
    %474 = arith.divf %472, %473 : vector<8x128xf32>
    %475 = vector.extract_strided_slice %457 {offsets = [0, 256], sizes = [8, 128], strides = [1, 1]} : vector<8x384xf32> to vector<8x128xf32>
    %476 = vector.extract_strided_slice %458 {offsets = [0, 256], sizes = [8, 128], strides = [1, 1]} : vector<8x384xf32> to vector<8x128xf32>
    %477 = vector.broadcast %270 : vector<1x128xf32> to vector<8x128xf32>
    %478 = arith.addf %476, %477 : vector<8x128xf32>
    %479 = arith.mulf %466, %478 : vector<8x128xf32>
    %480 = arith.addf %475, %479 : vector<8x128xf32>
    %481 = math.tanh %480 : vector<8x128xf32>
    %cst_94 = arith.constant 1.000000e+00 : f32
    %482 = vector.broadcast %cst_94 : f32 to vector<8x128xf32>
    %483 = arith.subf %482, %474 : vector<8x128xf32>
    %484 = arith.mulf %483, %481 : vector<8x128xf32>
    %485 = arith.mulf %474, %455 : vector<8x128xf32>
    %486 = arith.addf %484, %485 : vector<8x128xf32>
    %c48 = arith.constant 48 : index
    %c0_95 = arith.constant 0 : index
    %487 = vector.load %arg18[%c48, %c0_95] : memref<64x128xf32, #tpu.memory_space<vmem>>, vector<8x128xf32>
    tpu.vector_store %arg18[%c48, %c0_95], %486 {strides = array<i32>} : memref<64x128xf32, #tpu.memory_space<vmem>>, vector<8x128xf32>,
    %488 = vector.extract_strided_slice %268 {offsets = [56, 0], sizes = [8, 384], strides = [1, 1]} : vector<64x384xf32> to vector<8x384xf32>
    %cst_96 = arith.constant dense<0.000000e+00> : vector<8x384xf32>
    %489 = tpu.matmul %486, %269, %cst_96 {dimension_numbers = #tpu.dot_dimension_numbers<[1], [0], [0], [1], [0, 0, 1, 1], [], []>} : vector<8x128xf32>, vector<128x384xf32>, vector<8x384xf32> -> vector<8x384xf32>
    %490 = vector.extract_strided_slice %488 {offsets = [0, 0], sizes = [8, 128], strides = [1, 1]} : vector<8x384xf32> to vector<8x128xf32>
    %491 = vector.extract_strided_slice %489 {offsets = [0, 0], sizes = [8, 128], strides = [1, 1]} : vector<8x384xf32> to vector<8x128xf32>
    %492 = arith.addf %490, %491 : vector<8x128xf32>
    %493 = arith.negf %492 : vector<8x128xf32>
    %494 = math.exp %493 : vector<8x128xf32>
    %cst_97 = arith.constant 1.000000e+00 : f32
    %495 = vector.broadcast %cst_97 : f32 to vector<8x128xf32>
    %496 = arith.addf %495, %494 : vector<8x128xf32>
    %497 = arith.divf %495, %496 : vector<8x128xf32>
    %498 = vector.extract_strided_slice %488 {offsets = [0, 128], sizes = [8, 128], strides = [1, 1]} : vector<8x384xf32> to vector<8x128xf32>
    %499 = vector.extract_strided_slice %489 {offsets = [0, 128], sizes = [8, 128], strides = [1, 1]} : vector<8x384xf32> to vector<8x128xf32>
    %500 = arith.addf %498, %499 : vector<8x128xf32>
    %501 = arith.negf %500 : vector<8x128xf32>
    %502 = math.exp %501 : vector<8x128xf32>
    %cst_98 = arith.constant 1.000000e+00 : f32
    %503 = vector.broadcast %cst_98 : f32 to vector<8x128xf32>
    %504 = arith.addf %503, %502 : vector<8x128xf32>
    %505 = arith.divf %503, %504 : vector<8x128xf32>
    %506 = vector.extract_strided_slice %488 {offsets = [0, 256], sizes = [8, 128], strides = [1, 1]} : vector<8x384xf32> to vector<8x128xf32>
    %507 = vector.extract_strided_slice %489 {offsets = [0, 256], sizes = [8, 128], strides = [1, 1]} : vector<8x384xf32> to vector<8x128xf32>
    %508 = vector.broadcast %270 : vector<1x128xf32> to vector<8x128xf32>
    %509 = arith.addf %507, %508 : vector<8x128xf32>
    %510 = arith.mulf %497, %509 : vector<8x128xf32>
    %511 = arith.addf %506, %510 : vector<8x128xf32>
    %512 = math.tanh %511 : vector<8x128xf32>
    %cst_99 = arith.constant 1.000000e+00 : f32
    %513 = vector.broadcast %cst_99 : f32 to vector<8x128xf32>
    %514 = arith.subf %513, %505 : vector<8x128xf32>
    %515 = arith.mulf %514, %512 : vector<8x128xf32>
    %516 = arith.mulf %505, %486 : vector<8x128xf32>
    %517 = arith.addf %515, %516 : vector<8x128xf32>
    %c56 = arith.constant 56 : index
    %c0_100 = arith.constant 0 : index
    %518 = vector.load %arg18[%c56, %c0_100] : memref<64x128xf32, #tpu.memory_space<vmem>>, vector<8x128xf32>
    tpu.vector_store %arg18[%c56, %c0_100], %517 {strides = array<i32>} : memref<64x128xf32, #tpu.memory_space<vmem>>, vector<8x128xf32>,
    %c0_101 = arith.constant 0 : index
    %c0_102 = arith.constant 0 : index
    %519 = vector.load %arg17[%c0_101, %c0_102] : memref<8x128xf32, #tpu.memory_space<vmem>>, vector<8x128xf32>
    tpu.vector_store %arg17[%c0_101, %c0_102], %517 {strides = array<i32>} : memref<8x128xf32, #tpu.memory_space<vmem>>, vector<8x128xf32>,
    %c0_103 = arith.constant 0 : index
    %c0_104 = arith.constant 0 : index
    %520 = vector.load %arg18[%c0_103, %c0_104] : memref<64x128xf32, #tpu.memory_space<vmem>>, vector<64x128xf32>
    %c0_105 = arith.constant 0 : index
    %c0_106 = arith.constant 0 : index
    %521 = vector.load %arg14[%c0_105, %c0_106] : memref<128x128xf32, #tpu.memory_space<vmem>>, vector<128x128xf32>
    %cst_107 = arith.constant dense<0.000000e+00> : vector<64x128xf32>
    %522 = tpu.matmul %520, %521, %cst_107 {dimension_numbers = #tpu.dot_dimension_numbers<[1], [0], [0], [1], [0, 0, 1, 1], [], []>} : vector<64x128xf32>, vector<128x128xf32>, vector<64x128xf32> -> vector<64x128xf32>
    %c0_108 = arith.constant 0 : index
    %c0_109 = arith.constant 0 : index
    %523 = vector.load %arg15[%c0_108, %c0_109] : memref<1x128xf32, #tpu.memory_space<vmem>>, vector<1x128xf32>
    %524 = vector.broadcast %523 : vector<1x128xf32> to vector<64x128xf32>
    %525 = arith.addf %522, %524 : vector<64x128xf32>
    %c0_110 = arith.constant 0 : index
    %c0_111 = arith.constant 0 : index
    %526 = vector.load %arg16[%c0_110, %c0_111] : memref<64x128xf32, #tpu.memory_space<vmem>>, vector<64x128xf32>
    tpu.vector_store %arg16[%c0_110, %c0_111], %525 {strides = array<i32>} : memref<64x128xf32, #tpu.memory_space<vmem>>, vector<64x128xf32>,
    return
  }
  func.func @transform_0(%arg0: i32) -> (i32, i32) {
    %c0_i32 = arith.constant 0 : i32
    %c0_i32_0 = arith.constant 0 : i32
    %c0_i32_1 = arith.constant 0 : i32
    return %c0_i32, %c0_i32_0 : i32, i32
  }
  func.func @transform_1(%arg0: i32) -> (i32, i32) {
    %c0_i32 = arith.constant 0 : i32
    %c0_i32_0 = arith.constant 0 : i32
    %c0_i32_1 = arith.constant 0 : i32
    return %c0_i32, %c0_i32_0 : i32, i32
  }
  func.func @transform_2(%arg0: i32) -> (i32, i32) {
    %c0_i32 = arith.constant 0 : i32
    %c0_i32_0 = arith.constant 0 : i32
    %c0_i32_1 = arith.constant 0 : i32
    return %c0_i32, %c0_i32_0 : i32, i32
  }
  func.func @transform_3(%arg0: i32) -> (i32, i32) {
    %c0_i32 = arith.constant 0 : i32
    %c0_i32_0 = arith.constant 0 : i32
    %c0_i32_1 = arith.constant 0 : i32
    return %c0_i32, %c0_i32_0 : i32, i32
  }
  func.func @transform_4(%arg0: i32) -> (i32, i32) {
    %c0_i32 = arith.constant 0 : i32
    %c0_i32_0 = arith.constant 0 : i32
    %c0_i32_1 = arith.constant 0 : i32
    return %c0_i32, %c0_i32_0 : i32, i32
  }
  func.func @transform_5(%arg0: i32) -> (i32, i32) {
    %c0_i32 = arith.constant 0 : i32
    %c0_i32_0 = arith.constant 0 : i32
    %c0_i32_1 = arith.constant 0 : i32
    return %c0_i32, %c0_i32_0 : i32, i32
  }
  func.func @transform_6(%arg0: i32) -> (i32, i32) {
    %c0_i32 = arith.constant 0 : i32
    %c0_i32_0 = arith.constant 0 : i32
    %c0_i32_1 = arith.constant 0 : i32
    return %c0_i32, %c0_i32_0 : i32, i32
  }
  func.func @transform_7(%arg0: i32) -> (i32, i32) {
    %c0_i32 = arith.constant 0 : i32
    %c0_i32_0 = arith.constant 0 : i32
    %c0_i32_1 = arith.constant 0 : i32
    return %c0_i32, %c0_i32_0 : i32, i32
  }
  func.func @transform_8(%arg0: i32) -> (i32, i32) {
    %c0_i32 = arith.constant 0 : i32
    %c0_i32_0 = arith.constant 0 : i32
    %c0_i32_1 = arith.constant 0 : i32
    return %c0_i32, %c0_i32_0 : i32, i32
  }
  func.func @transform_9(%arg0: i32) -> (i32, i32) {
    %c0_i32 = arith.constant 0 : i32
    %c0_i32_0 = arith.constant 0 : i32
    %c0_i32_1 = arith.constant 0 : i32
    return %c0_i32, %c0_i32_0 : i32, i32
  }
  func.func @transform_10(%arg0: i32) -> (i32, i32) {
    %c0_i32 = arith.constant 0 : i32
    %c0_i32_0 = arith.constant 0 : i32
    %c0_i32_1 = arith.constant 0 : i32
    return %c0_i32, %c0_i32_0 : i32, i32
  }
  func.func @transform_11(%arg0: i32) -> (i32, i32) {
    %c0_i32 = arith.constant 0 : i32
    %c0_i32_0 = arith.constant 0 : i32
    %c0_i32_1 = arith.constant 0 : i32
    return %c0_i32, %c0_i32_0 : i32, i32
  }
  func.func @transform_12(%arg0: i32) -> (i32, i32) {
    %c0_i32 = arith.constant 0 : i32
    %c0_i32_0 = arith.constant 0 : i32
    %c0_i32_1 = arith.constant 0 : i32
    return %c0_i32, %c0_i32_0 : i32, i32
  }
  func.func @transform_13(%arg0: i32) -> (i32, i32) {
    %c0_i32 = arith.constant 0 : i32
    %c0_i32_0 = arith.constant 0 : i32
    %c0_i32_1 = arith.constant 0 : i32
    return %c0_i32, %c0_i32_0 : i32, i32
  }
  func.func @transform_14(%arg0: i32) -> (i32, i32) {
    %c0_i32 = arith.constant 0 : i32
    %c0_i32_0 = arith.constant 0 : i32
    %c0_i32_1 = arith.constant 0 : i32
    return %c0_i32, %c0_i32_0 : i32, i32
  }
  func.func @transform_15(%arg0: i32) -> (i32, i32) {
    %c0_i32 = arith.constant 0 : i32
    %c0_i32_0 = arith.constant 0 : i32
    %c0_i32_1 = arith.constant 0 : i32
    return %c0_i32, %c0_i32_0 : i32, i32
  }
  func.func @transform_16(%arg0: i32) -> (i32, i32) {
    %c0_i32 = arith.constant 0 : i32
    %c0_i32_0 = arith.constant 0 : i32
    %c0_i32_1 = arith.constant 0 : i32
    return %c0_i32, %c0_i32_0 : i32, i32
  }
}

</mosaic_0001>

<bundles_post_ra>
// kernel: tpu_custom_call.1
= control target key start
LH: loop header
LB: loop body
LE: loop exit
PB: predicated region body
PF: predicated region fallthrough
CT: control target
= control target key end

     0   :  { %s5103_s0 = inlined_call_operand.vmem [shape: s32[64,1], index: 0, kind: input, shape index: {}]   ;;  %s5104_s1 = inlined_call_operand.vmem [shape: s32[64,1], index: 1, kind: input, shape index: {}]   ;;  %s5105_s2 = inlined_call_operand.hbm [shape: f32[8,128], index: 2, kind: input, shape index: {}]   ;;  %s5106_s3 = inlined_call_operand.vmem [shape: f32[128,128], index: 3, kind: input, shape index: {}]   ;;  %s5107_s4 = inlined_call_operand.hbm [shape: f32[128,384], index: 4, kind: input, shape index: {}]   ;;  %s5108_s5 = inlined_call_operand.hbm [shape: f32[128,384], index: 5, kind: input, shape index: {}]   ;;  %s5109_s6 = inlined_call_operand.vmem [shape: f32[1,384], index: 6, kind: input, shape index: {}]   ;;  %s5110_s7 = inlined_call_operand.hbm [shape: f32[1,128], index: 7, kind: input, shape index: {}]   ;;  %s5111_s8 = inlined_call_operand.hbm [shape: f32[128,128], index: 8, kind: input, shape index: {}]   ;;  %s5112_s9 = inlined_call_operand.hbm [shape: f32[128,384], index: 9, kind: input, shape index: {}]   ;;  %s5113_s10 = inlined_call_operand.hbm [shape: f32[128,384], index: 10, kind: input, shape index: {}]   ;;  %s5114_s11 = inlined_call_operand.vmem [shape: f32[1,384], index: 11, kind: input, shape index: {}]   ;;  %s5115_s12 = inlined_call_operand.vmem [shape: f32[1,128], index: 12, kind: input, shape index: {}]   ;;  %s5116_s13 = inlined_call_operand.hbm [shape: f32[128,128], index: 13, kind: input, shape index: {}]   ;;  %s5117_s14 = inlined_call_operand.vmem [shape: f32[1,128], index: 14, kind: input, shape index: {}]   ;;  %s5118_s15 = inlined_call_operand.hbm [shape: f32[64,128], index: 15, kind: output, shape index: {0}]   ;;  %s5119_s16 = inlined_call_operand.hbm [shape: f32[8,128], index: 16, kind: output, shape index: {1}]  }
   0x1   :  { %5186 = sst [smem:[#allocation60_spill]] %s5103_s0 }
   0x2   :  { %22 = vsyncpa [#allocation4], 0 }
   0x3   :  { %23 = vsyncpa [#allocation7], 0 }
   0x4   :  { %24 = vsyncpa [#allocation10], 0 }
   0x5   :  { %25 = vsyncpa [#allocation13], 0 }
   0x6   :  { %26 = vsyncpa [#allocation16], 0 }
   0x7   :  { %27 = vsyncpa [#allocation5], 0  ;;  %s50_s23 = sshll.u32 %s5107_s4, 4  ;;  %s51_s23 = int_to_ptr.hbm [resolvable:$true] %s50_s23 }
   0x8   :  { %28 = vsyncpa [#allocation19], 0  ;;  %s3333_s24 = smov [#allocation6]   ;;  %s79_s28 = sshll.u32 %s5110_s7, 4  ;;  %s80_s28 = int_to_ptr.hbm [resolvable:$true] %s79_s28 }
   0x9   :  { %s52_s25 = sshll.u32 %s3333_s24, 4  ;;  %s3334_s29 = smov 384   ;;  %s53_s25 = int_to_ptr.vmem [resolvable:$true] %s52_s25 }
   0xa   :  { %s3335_s30 = smov 24   ;;  %s3336_s0 = smov [#allocation9]  }
   0xb   :  { %58 = dma.hbm_to_vmem [thread:$0]  %s51_s23, 6144, %s53_s25, [#allocation7], %s3334_s29, %s3334_s29, %s3335_s30  }
   0xc   :  { %s81_s17 = sshll.u32 %s3336_s0, 4  ;;  %s102_s19 = sshll.u32 %s5112_s9, 4  ;;  %s82_s17 = int_to_ptr.vmem [resolvable:$true] %s81_s17  ;;  %s103_s19 = int_to_ptr.hbm [resolvable:$true] %s102_s19 }
   0xd   :  { %84 = dma.hbm_to_vmem [thread:$0]  %s80_s28, 16, %s82_s17, [#allocation10]  }
   0xe   :  { %s38_s7 = sshll.u32 %s5105_s2, 4  ;;  %s3337_s22 = smov [#allocation12]   ;;  %s39_s7 = int_to_ptr.hbm [resolvable:$true] %s38_s7 }
   0xf   :  { %s104_s24 = sshll.u32 %s3337_s22, 4  ;;  %s3338_s23 = smov [#allocation3]   ;;  %s105_s24 = int_to_ptr.vmem [resolvable:$true] %s104_s24 }
  0x10   :  { %110 = dma.hbm_to_vmem [thread:$0]  %s103_s19, 6144, %s105_s24, [#allocation13], %s3334_s29, %s3334_s29, %s3335_s30  }
  0x11   :  { %s40_s25 = sshll.u32 %s3338_s23, 4  ;;  %s63_s9 = sshll.u32 %s5108_s5, 4  ;;  %s41_s25 = int_to_ptr.vmem [resolvable:$true] %s40_s25  ;;  %s64_s9 = int_to_ptr.hbm [resolvable:$true] %s63_s9 }
  0x12   :  { %43 = dma.hbm_to_vmem [thread:$0]  %s39_s7, 128, %s41_s25, [#allocation4]  }
  0x13   :  { %s89_s2 = sshll.u32 %s5111_s8, 4  ;;  %s3339_s17 = smov [#allocation8]   ;;  %s90_s2 = int_to_ptr.hbm [resolvable:$true] %s89_s2 }
  0x14   :  { %s65_s18 = sshll.u32 %s3339_s17, 4  ;;  %s3340_s4 = smov [#allocation11]   ;;  %s66_s18 = int_to_ptr.vmem [resolvable:$true] %s65_s18 }
  0x15   :  { %71 = dma.hbm_to_vmem [thread:$0]  %s64_s9, 6144, %s66_s18, [#allocation7], %s3334_s29, %s3334_s29, %s3335_s30  }
  0x16   :  { %s91_s19 = sshll.u32 %s3340_s4, 4  ;;  %s3341_s20 = smov 128   ;;  %s92_s19 = int_to_ptr.vmem [resolvable:$true] %s91_s19 }
  0x17   :  { %s3342_s5 = smov 8   ;;  %s115_s8 = sshll.u32 %s5113_s10, 4  ;;  %s116_s8 = int_to_ptr.hbm [resolvable:$true] %s115_s8 }
  0x18   :  { %97 = dma.hbm_to_vmem [thread:$0]  %s90_s2, 2048, %s92_s19, [#allocation10], %s3341_s20, %s3341_s20, %s3342_s5  }
  0x19   :  { %s3343_s22 = smov [#allocation14]   ;;  %s132_s26 = sshll.u32 %s5116_s13, 4  ;;  %s133_s26 = int_to_ptr.hbm [resolvable:$true] %s132_s26 }
  0x1a   :  { %s117_s24 = sshll.u32 %s3343_s22, 4  ;;  %s3344_s27 = smov [#allocation15]   ;;  %s118_s24 = int_to_ptr.vmem [resolvable:$true] %s117_s24 }
  0x1b   :  { %123 = dma.hbm_to_vmem [thread:$0]  %s116_s8, 6144, %s118_s24, [#allocation13], %s3334_s29, %s3334_s29, %s3335_s30  }
  0x1c   :  { %s134_s9 = sshll.u32 %s3344_s27, 4  ;;  %s135_s9 = int_to_ptr.vmem [resolvable:$true] %s134_s9 }
  0x1d   :  { %140 = dma.hbm_to_vmem [thread:$0]  %s133_s26, 2048, %s135_s9, [#allocation16], %s3341_s20, %s3341_s20, %s3342_s5  }
  0x1e   :  { %3319 = dma.done.wait [#allocation4], 128  }
  0x1f   :  { %3320 = vsyncadd [#allocation4], 4294967168 }
  0x20   :  { %3321 = dma.done.wait [#allocation7], 12288  }
  0x21   :  { %3322 = vsyncadd [#allocation7], 4294955008 }
  0x22   :  { %3323 = dma.done.wait [#allocation10], 2064  }
  0x23   :  { %3324 = vsyncadd [#allocation10], 4294965232 }
  0x24   :  { %3325 = dma.done.wait [#allocation13], 12288  }
  0x25   :  { %3326 = vsyncadd [#allocation13], 4294955008 }
  0x26   :  { %3327 = dma.done.wait [#allocation16], 2048  }
  0x27   :  { %3328 = vsyncadd [#allocation16], 4294965248  ;;  %v3345_v0 = vmov 0   ;;  %s5187_s29 = sld [smem:[#allocation60_spill]]  ;;  %v248_v7 = vld [vmem:[%s5106_s3 + $0x78] sm:$0xff]  ;;  %v247_v8 = vld [vmem:[%s5106_s3 + $0x70] sm:$0xff]  ;;  %v183_v33 = vlaneseq }
  0x28   :  { %2816 = vset.pattern.permute.xlu1 %v3345_v0  ;;  %2815 = vset.pattern.permute.xlu0 %v3345_v0  ;;  %v246_v9 = vld [vmem:[%s5106_s3 + $0x68] sm:$0xff]  ;;  %v245_v10 = vld [vmem:[%s5106_s3 + $0x60] sm:$0xff]  ;;  %v244_v13 = vld [vmem:[%s5106_s3 + $0x58] sm:$0xff]  ;;  %v5121_v36 = vmov 1.0   ;;  %s3348_s21 = smov [#allocation17]   ;;  %s2686_s24 = sshll.u32 %s5118_s15, 4  ;;  %s2687_s24 = int_to_ptr.hbm [resolvable:$true] %s2686_s24 }
  0x29   :  { %2817 = vset.pattern.permute.xlu2 %v3345_v0  ;;  %249 = vmatpush.msra.mxu1 %v248_v7  ;;  %v1386_v14 = vld [vmem:[%s5104_s1] sm:$0xff]  ;;  %v243_v15 = vld [vmem:[%s5106_s3 + $0x50] sm:$0xff]  ;;  %v242_v16 = vld [vmem:[%s5106_s3 + $0x48] sm:$0xff]  ;;  %v3572_v34 = vand.u32 127, %v183_v33  ;;  %s2684_s7 = sshll.u32 %s3348_s21, 4  ;;  %s2685_s7 = int_to_ptr.vmem [resolvable:$true] %s2684_s7 }
  0x2a   :  { %2783 = vmatpush.msra.mxu2 %v248_v7  ;;  %v241_v17 = vld [vmem:[%s5106_s3 + $0x40] sm:$0xff]  ;;  %v1388_v18 = vld [vmem:[%s5104_s1 + $0x10] sm:$0xff]  ;;  %v1387_v19 = vld [vmem:[%s5104_s1 + $0x8] sm:$0xff] }
  0x2b   :  { %250 = vmatpush.msra.mxu1 %v247_v8  ;;  %v240_v20 = vld [vmem:[%s5106_s3 + $0x38] sm:$0xff]  ;;  %v239_v22 = vld [vmem:[%s5106_s3 + $0x30] sm:$0xff]  ;;  %v238_v23 = vld [vmem:[%s5106_s3 + $0x28] sm:$0xff]  ;;  %5188 = vst [vmem:[#allocation27_spill] sm:$0xff] %v3572_v34 }
  0x2c   :  { %2784 = vmatpush.msra.mxu2 %v247_v8  ;;  %v1389_v21 = vld [vmem:[%s5104_s1 + $0x18] sm:$0xff]  ;;  %v237_v24 = vld [vmem:[%s5106_s3 + $0x20] sm:$0xff]  ;;  %v1391_v25 = vld [vmem:[%s5104_s1 + $0x28] sm:$0xff] }
  0x2d   :  { %v177_v1 = vld [vmem:[%s5187_s29 + $0x10] sm:$0xff]  ;;  %v175_v2 = vld [vmem:[%s5187_s29] sm:$0xff]  ;;  %v178_v4 = vld [vmem:[%s5187_s29 + $0x18] sm:$0xff]  ;;  %251 = vmatpush.msra.mxu1 %v246_v9 }
  0x2e   :  { %192 = vperm.xlu1 %2816, %v177_v1   ;;  %186 = vperm.xlu0 %2815, %v175_v2   ;;  %v179_v3 = vld [vmem:[%s5187_s29 + $0x20] sm:$0xff]  ;;  %v176_v5 = vld [vmem:[%s5187_s29 + $0x8] sm:$0xff]  ;;  %v182_v11 = vld [vmem:[%s5187_s29 + $0x38] sm:$0xff] }
  0x2f   :  { %198 = vperm.xlu2 %2817, %v179_v3   ;;  %v180_v6 = vld [vmem:[%s5187_s29 + $0x28] sm:$0xff]  ;;  %v181_v12 = vld [vmem:[%s5187_s29 + $0x30] sm:$0xff]  ;;  %2785 = vmatpush.msra.mxu2 %v246_v9  ;;  %v1390_v26 = vld [vmem:[%s5104_s1 + $0x20] sm:$0xff]  ;;  %s2700_s29 = sshll.u32 %s5119_s16, 4  ;;  %s2701_s29 = int_to_ptr.hbm [resolvable:$true] %s2700_s29 }
  0x30   :  { %252 = vmatpush.msra.mxu1 %v245_v10  ;;  %v1392_v27 = vld [vmem:[%s5104_s1 + $0x30] sm:$0xff]  ;;  %v1393_v28 = vld [vmem:[%s5104_s1 + $0x38] sm:$0xff]  ;;  %v234_v31 = vld [vmem:[%s5106_s3 + $0x8] sm:$0xff] }
  0x31   :  { %2786 = vmatpush.msra.mxu2 %v245_v10  ;;  %v236_v29 = vld [vmem:[%s5106_s3 + $0x18] sm:$0xff]  ;;  %v235_v30 = vld [vmem:[%s5106_s3 + $0x10] sm:$0xff]  ;;  %v233_v32 = vld [vmem:[%s5106_s3] sm:$0xff] }
  0x32   :  { %253 = vmatpush.msra.mxu1 %v244_v13  ;;  %v336_v41 = vld [vmem:[#allocation6 + $0x168] sm:$0xff]  ;;  %v337_v42 = vld [vmem:[#allocation6 + $0x170] sm:$0xff]  ;;  %v338_v43 = vld [vmem:[#allocation6 + $0x178] sm:$0xff] }
  0x33   :  { %2787 = vmatpush.msra.mxu2 %v244_v13  ;;  %v333_v44 = vld [vmem:[#allocation6 + $0x150] sm:$0xff]  ;;  %v334_v45 = vld [vmem:[#allocation6 + $0x158] sm:$0xff]  ;;  %v335_v46 = vld [vmem:[#allocation6 + $0x160] sm:$0xff]  ;;  %429 = vmatpush.msra.mxu3 %v338_v43 }
  0x34   :  { %254 = vmatpush.msra.mxu1 %v243_v15  ;;  %v3582_v47 = vld [vmem:[#allocation8 + $0x168] sm:$0xff]  ;;  %v331_v48 = vld [vmem:[#allocation6 + $0x140] sm:$0xff]  ;;  %v330_v50 = vld [vmem:[#allocation6 + $0x138] sm:$0xff] }
  0x35   :  { %2788 = vmatpush.msra.mxu2 %v243_v15  ;;  %519 = vmatpush.msra.mxu0 %v3582_v47  ;;  %v332_v51 = vld [vmem:[#allocation6 + $0x148] sm:$0xff]  ;;  %v3585_v52 = vld [vmem:[#allocation8 + $0x150] sm:$0xff]  ;;  %v3587_v54 = vld [vmem:[#allocation8 + $0x138] sm:$0xff] }
  0x36   :  { %195 = vperm.xlu1 %2816, %v178_v4   ;;  %189 = vperm.xlu0 %2815, %v176_v5   ;;  %v328_v53 = vld [vmem:[#allocation6 + $0x128] sm:$0xff]  ;;  %v327_v55 = vld [vmem:[#allocation6 + $0x120] sm:$0xff]  ;;  %v329_v56 = vld [vmem:[#allocation6 + $0x130] sm:$0xff] }
  0x37   :  { %201 = vperm.xlu2 %2817, %v180_v6   ;;  %255 = vmatpush.msra.mxu1 %v242_v16  ;;  %v324_v58 = vld [vmem:[#allocation6 + $0x108] sm:$0xff]  ;;  %v325_v59 = vld [vmem:[#allocation6 + $0x110] sm:$0xff]  ;;  %v326_v60 = vld [vmem:[#allocation6 + $0x118] sm:$0xff] }
  0x38   :  { %2789 = vmatpush.msra.mxu2 %v242_v16  ;;  %430 = vmatpush.msra.mxu3 %v335_v46  ;;  %v3593_v61 = vld [vmem:[#allocation8 + $0x120] sm:$0xff]  ;;  %v321_v62 = vld [vmem:[#allocation6 + $0xf0] sm:$0xff]  ;;  %v322_v63 = vld [vmem:[#allocation6 + $0xf8] sm:$0xff] }
  0x39   :  { %256 = vmatpush.msra.mxu1 %v241_v17  ;;  %520 = vmatpush.msra.mxu0 %v3585_v52  ;;  %v323_v0 = vld [vmem:[#allocation6 + $0x100] sm:$0xff]  ;;  %v3597_v1 = vld [vmem:[#allocation8 + $0x108] sm:$0xff]  ;;  %v318_v2 = vld [vmem:[#allocation6 + $0xd8] sm:$0xff] }
  0x3a   :  { %2790 = vmatpush.msra.mxu2 %v241_v17  ;;  %431 = vmatpush.msra.mxu3 %v332_v51  ;;  %v319_v3 = vld [vmem:[#allocation6 + $0xe0] sm:$0xff]  ;;  %v320_v4 = vld [vmem:[#allocation6 + $0xe8] sm:$0xff]  ;;  %v3600_v5 = vld [vmem:[#allocation8 + $0xf0] sm:$0xff] }
  0x3b   :  { %257 = vmatpush.msra.mxu1 %v240_v20  ;;  %521 = vmatpush.msra.mxu0 %v3587_v54  ;;  %v315_v7 = vld [vmem:[#allocation6 + $0xc0] sm:$0xff]  ;;  %v316_v8 = vld [vmem:[#allocation6 + $0xc8] sm:$0xff]  ;;  %v317_v9 = vld [vmem:[#allocation6 + $0xd0] sm:$0xff] }
  0x3c   :  { %2791 = vmatpush.msra.mxu2 %v240_v20  ;;  %432 = vmatpush.msra.mxu3 %v329_v56  ;;  %v3604_v10 = vld [vmem:[#allocation8 + $0xd8] sm:$0xff]  ;;  %v309_v15 = vld [vmem:[#allocation6 + $0x90] sm:$0xff]  ;;  %v311_v17 = vld [vmem:[#allocation6 + $0xa0] sm:$0xff] }
  0x3d   :  { %258 = vmatpush.msra.mxu1 %v239_v22  ;;  %522 = vmatpush.msra.mxu0 %v3593_v61  ;;  %v314_v13 = vld [vmem:[#allocation6 + $0xb8] sm:$0xff]  ;;  %v307_v20 = vld [vmem:[#allocation6 + $0x80] sm:$0xff]  ;;  %v293_v43 = vld [vmem:[#allocation6 + $0x10] sm:$0xff] }
  0x3e   :  { %207 = vperm.xlu1 %2816, %v182_v11   ;;  %204 = vperm.xlu0 %2815, %v181_v12   ;;  %v312_v11 = vld [vmem:[#allocation6 + $0xa8] sm:$0xff]  ;;  %v313_v12 = vld [vmem:[#allocation6 + $0xb0] sm:$0xff]  ;;  %v310_v16 = vld [vmem:[#allocation6 + $0x98] sm:$0xff] }
  0x3f   :  { %1395 = vperm.xlu2 %2817, %v1386_v14   ;;  %2792 = vmatpush.msra.mxu2 %v239_v22  ;;  %v3610_v14 = vld [vmem:[#allocation8 + $0xc0] sm:$0xff]  ;;  %v3616_v22 = vld [vmem:[#allocation8 + $0x90] sm:$0xff]  ;;  %v3655_v51 = vld [vmem:[#allocation8 + $0x128] sm:$0xff] }
  0x40   :  { %259 = vmatpush.msra.mxu1 %v238_v23  ;;  %433 = vmatpush.msra.mxu3 %v326_v60  ;;  %v299_v33 = vld [vmem:[#allocation6 + $0x40] sm:$0xff]  ;;  %v3688_v60 = vld [vmem:[#allocation8 + $0x130] sm:$0xff] }
  0x41   :  { %2793 = vmatpush.msra.mxu2 %v238_v23  ;;  %523 = vmatpush.msra.mxu0 %v3597_v1  ;;  %v303_v23 = vld [vmem:[#allocation6 + $0x60] sm:$0xff] }
  0x42   :  { %260 = vmatpush.msra.mxu1 %v237_v24  ;;  %434 = vmatpush.msra.mxu3 %v323_v0  ;;  %v3638_v46 = vld [vmem:[#allocation8] sm:$0xff] }
  0x43   :  { %2794 = vmatpush.msra.mxu2 %v237_v24  ;;  %524 = vmatpush.msra.mxu0 %v3600_v5  ;;  %v304_v24 = vld [vmem:[#allocation6 + $0x68] sm:$0xff]  ;;  %5190 = vst [vmem:[#allocation29_spill] sm:$0xff] %v3638_v46  ;;  %v3670_v56 = vld [vmem:[#allocation8 + $0x160] sm:$0xff] }
  0x44   :  { %261 = vmatpush.msra.mxu1 %v236_v29  ;;  %435 = vmatpush.msra.mxu3 %v320_v4  ;;  %v3708_v4 = vld [vmem:[#allocation8 + $0x98] sm:$0xff] }
  0x45   :  { %2795 = vmatpush.msra.mxu2 %v236_v29  ;;  %525 = vmatpush.msra.mxu0 %v3604_v10  ;;  %v302_v29 = vld [vmem:[#allocation6 + $0x58] sm:$0xff] }
  0x46   :  { %1401 = vperm.xlu1 %2816, %v1388_v18   ;;  %1398 = vperm.xlu0 %2815, %v1387_v19   ;;  %v3613_v18 = vld [vmem:[#allocation8 + $0xa8] sm:$0xff]  ;;  %v306_v19 = vld [vmem:[#allocation6 + $0x78] sm:$0xff] }
  0x47   :  { %1404 = vperm.xlu2 %2817, %v1389_v21   ;;  %262 = vmatpush.msra.mxu1 %v235_v30  ;;  %v308_v21 = vld [vmem:[#allocation6 + $0x88] sm:$0xff] }
  0x48   :  { %2796 = vmatpush.msra.mxu2 %v235_v30  ;;  %436 = vmatpush.msra.mxu3 %v317_v9  ;;  %v3622_v30 = vld [vmem:[#allocation8 + $0x60] sm:$0xff]  ;;  %v3723_v9 = vld [vmem:[#allocation8 + $0xd0] sm:$0xff] }
  0x49   :  { %263 = vmatpush.msra.mxu1 %v234_v31  ;;  %526 = vmatpush.msra.mxu0 %v3610_v14 }
  0x4a   :  { %2797 = vmatpush.msra.mxu2 %v234_v31  ;;  %437 = vmatpush.msra.mxu3 %v314_v13  ;;  %v297_v31 = vld [vmem:[#allocation6 + $0x30] sm:$0xff] }
  0x4b   :  { %264 = vmatpush.msra.mxu1 %v233_v32  ;;  %527 = vmatpush.msra.mxu0 %v3613_v18 }
  0x4c   :  { %2798 = vmatpush.msra.mxu2 %v233_v32  ;;  %438 = vmatpush.msra.mxu3 %v311_v17  ;;  %v298_v32 = vld [vmem:[#allocation6 + $0x38] sm:$0xff] }
  0x4d   :  { %347 = vmatpush.msrb.mxu1 %v336_v41  ;;  %528 = vmatpush.msra.mxu0 %v3616_v22  ;;  %v291_v41 = vld [vmem:[#allocation6] sm:$0xff]  ;;  %v3742_v17 = vld [vmem:[#allocation8 + $0x38] sm:$0xff] }
  0x4e   :  { %1410 = vperm.xlu1 %2816, %v1391_v25   ;;  %1407 = vperm.xlu0 %2815, %v1390_v26   ;;  %v305_v25 = vld [vmem:[#allocation6 + $0x70] sm:$0xff]  ;;  %v3619_v26 = vld [vmem:[#allocation8 + $0x78] sm:$0xff]  ;;  %5191 = vst [vmem:[#allocation30_spill] sm:$0xff] %v3742_v17 }
  0x4f   :  { %1413 = vperm.xlu2 %2817, %v1392_v27   ;;  %388 = vmatpush.msrb.mxu2 %v337_v42  ;;  %v300_v27 = vld [vmem:[#allocation6 + $0x48] sm:$0xff] }
  0x50   :  { %348 = vmatpush.msrb.mxu1 %v333_v44  ;;  %439 = vmatpush.msra.mxu3 %v308_v21  ;;  %v292_v42 = vld [vmem:[#allocation6 + $0x8] sm:$0xff]  ;;  %v3632_v44 = vld [vmem:[#allocation8 + $0x18] sm:$0xff] }
  0x51   :  { %389 = vmatpush.msrb.mxu2 %v334_v45  ;;  %529 = vmatpush.msra.mxu0 %v3619_v26  ;;  %5189 = vst [vmem:[#allocation28_spill] sm:$0xff] %v3632_v44  ;;  %v3636_v45 = vld [vmem:[#allocation8 + $0x170] sm:$0xff] }
  0x52   :  { %349 = vmatpush.msrb.mxu1 %v330_v50  ;;  %440 = vmatpush.msra.mxu3 %v305_v25  ;;  %v3653_v50 = vld [vmem:[#allocation8 + $0x140] sm:$0xff]  ;;  %v3760_v25 = vld [vmem:[#allocation8 + $0x58] sm:$0xff] }
  0x53   :  { %390 = vmatpush.msrb.mxu2 %v331_v48  ;;  %530 = vmatpush.msra.mxu0 %v3622_v30  ;;  %v3640_v48 = vld [vmem:[#allocation3] sm:$0xff] }
  0x54   :  { %350 = vmatpush.msrb.mxu1 %v327_v55  ;;  %441 = vmatpush.msra.mxu3 %v302_v29  ;;  %v3668_v55 = vld [vmem:[#allocation8 + $0x110] sm:$0xff]  ;;  %v3768_v29 = vld [vmem:[#allocation8 + $0x28] sm:$0xff] }
  0x55   :  { %391 = vmatpush.msrb.mxu2 %v328_v53  ;;  %v3657_v53 = vld [vmem:[#allocation8 + $0x178] sm:$0xff]  ;;  %5194 = vst [vmem:[#allocation33_spill] sm:$0xff] %v3768_v29 }
  0x56   :  { %1416 = vperm.xlu0 %2815, %v1393_v28   ;;  %351 = vmatpush.msrb.mxu1 %v324_v58  ;;  %v301_v28 = vld [vmem:[#allocation6 + $0x50] sm:$0xff]  ;;  %v3680_v58 = vld [vmem:[#allocation8 + $0x148] sm:$0xff] }
  0x57   :  { %392 = vmatpush.msrb.mxu2 %v325_v59  ;;  %442 = vmatpush.msra.mxu3 %v299_v33  ;;  %v3686_v59 = vld [vmem:[#allocation8 + $0xe0] sm:$0xff] }
  0x58   :  { %352 = vmatpush.msrb.mxu1 %v321_v62  ;;  %v3690_v62 = vld [vmem:[#allocation8 + $0xc8] sm:$0xff] }
  0x59   :  { %393 = vmatpush.msrb.mxu2 %v322_v63  ;;  %v3698_v63 = vld [vmem:[#allocation8 + $0x118] sm:$0xff] }
  0x5a   :  { %353 = vmatpush.msrb.mxu1 %v318_v2  ;;  %v3704_v2 = vld [vmem:[#allocation8 + $0xb0] sm:$0xff] }
  0x5b   :  { %394 = vmatpush.msrb.mxu2 %v319_v3  ;;  %v3706_v3 = vld [vmem:[#allocation8 + $0x100] sm:$0xff] }
  0x5c   :  { %354 = vmatpush.msrb.mxu1 %v315_v7 }
  0x5d   :  { %395 = vmatpush.msrb.mxu2 %v316_v8  ;;  %v3721_v8 = vld [vmem:[#allocation8 + $0x80] sm:$0xff] }
  0x5e   :  { %355 = vmatpush.msrb.mxu1 %v312_v11  ;;  %v3725_v11 = vld [vmem:[#allocation8 + $0x68] sm:$0xff] }
  0x5f   :  { %396 = vmatpush.msrb.mxu2 %v313_v12  ;;  %v3729_v12 = vld [vmem:[#allocation8 + $0xb8] sm:$0xff] }
  0x60   :  { %356 = vmatpush.msrb.mxu1 %v309_v15  ;;  %v3738_v15 = vld [vmem:[#allocation8 + $0x50] sm:$0xff] }
  0x61   :  { %397 = vmatpush.msrb.mxu2 %v310_v16  ;;  %v3740_v16 = vld [vmem:[#allocation8 + $0xa0] sm:$0xff] }
  0x62   :  { %357 = vmatpush.msrb.mxu1 %v306_v19  ;;  %v3746_v19 = vld [vmem:[#allocation8 + $0x88] sm:$0xff] }
  0x63   :  { %398 = vmatpush.msrb.mxu2 %v307_v20  ;;  %v3748_v20 = vld [vmem:[#allocation8 + $0x70] sm:$0xff] }
  0x64   :  { %358 = vmatpush.msrb.mxu1 %v303_v23 }
  0x65   :  { %399 = vmatpush.msrb.mxu2 %v304_v24  ;;  %v3758_v24 = vld [vmem:[#allocation8 + $0x20] sm:$0xff] }
  0x66   :  { %359 = vmatpush.msrb.mxu1 %v300_v27  ;;  %5192 = vst [vmem:[#allocation31_spill] sm:$0xff] %v3758_v24  ;;  %v3762_v27 = vld [vmem:[#allocation8 + $0x40] sm:$0xff] }
  0x67   :  { %400 = vmatpush.msrb.mxu2 %v301_v28  ;;  %v3766_v28 = vld [vmem:[#allocation8 + $0x8] sm:$0xff] }
  0x68   :  { %360 = vmatpush.msrb.mxu1 %v297_v31  ;;  %5193 = vst [vmem:[#allocation32_spill] sm:$0xff] %v3766_v28  ;;  %v3777_v31 = vld [vmem:[#allocation8 + $0x10] sm:$0xff] }
  0x69   :  { %401 = vmatpush.msrb.mxu2 %v298_v32  ;;  %5195 = vst [vmem:[#allocation34_spill] sm:$0xff] %v3777_v31 }
  0x89   :  { %v199_v35 = vpop.permute.xlu2 %198 }
  0x8a   :  { %vm213_vm0 = vcmp.eq.s32.totalorder %v199_v35, %v3572_v34  ;;  %v3625_v35 = vld [vmem:[#allocation8 + $0x48] sm:$0xff] }
  0x8b   :  { %2731 = vmatmul.msk.f32.vlgmr.msra.gmra.mxu2 %vm213_vm0, %v5121_v36  ;;  %531 = vmatpush.msra.mxu0 %v3625_v35 }
  0x91   :  { %v202_v37 = vpop.permute.xlu2 %201 }
  0x92   :  { %vm214_vm1 = vcmp.eq.s32.totalorder %v202_v37, %v3572_v34  ;;  %v294_v37 = vld [vmem:[#allocation6 + $0x18] sm:$0xff] }
  0x93   :  { %2732 = vmatmul.msk.f32.gmra.mxu2 %vm214_vm1, %v5121_v36  ;;  %361 = vmatpush.msrb.mxu1 %v294_v37 }
  0x95   :  { %362 = vmatpush.msrb.mxu1 %v291_v41 }
  0xa0   :  { %v187_v38 = vpop.permute.xlu0 %186  ;;  %v193_v39 = vpop.permute.xlu1 %192 }
  0xa1   :  { %vm209_vm2 = vcmp.eq.s32.totalorder %v187_v38, %v3572_v34  ;;  %vm211_vm4 = vcmp.eq.s32.totalorder %v193_v39, %v3572_v34  ;;  %v295_v38 = vld [vmem:[#allocation6 + $0x20] sm:$0xff]  ;;  %v296_v39 = vld [vmem:[#allocation6 + $0x28] sm:$0xff] }
  0xa2   :  { %2727 = vmatmul.msk.f32.vlgmr.msra.gmra.mxu1 %vm209_vm2, %v5121_v36  ;;  %402 = vmatpush.msrb.mxu2 %v295_v38 }
  0xa3   :  { %443 = vmatpush.msra.mxu3 %v296_v39  ;;  %539 = vmatpush.msra.mxu1 %v3636_v45 }
  0xa4   :  { %403 = vmatpush.msrb.mxu2 %v292_v42 }
  0xa5   :  { %444 = vmatpush.msra.mxu3 %v293_v43 }
  0xa6   :  { %559 = vmatpush.msra.mxu2 %v3657_v53 }
  0xa7   :  { %630 = vmatpush.msrb.mxu3 %v3582_v47 }
  0xa8   :  { %v190_v40 = vpop.permute.xlu0 %189  ;;  %v196_v49 = vpop.permute.xlu1 %195  ;;  %560 = vmatpush.msra.mxu2 %v3670_v56 }
  0xa9   :  { %vm210_vm3 = vcmp.eq.s32.totalorder %v190_v40, %v3572_v34  ;;  %vm212_vm6 = vcmp.eq.s32.totalorder %v196_v49, %v3572_v34  ;;  %v3628_v40 = vld [vmem:[#allocation8 + $0x30] sm:$0xff]  ;;  %v3644_v49 = vld [vmem:[#allocation8 + $0x158] sm:$0xff]  ;;  %631 = vmatpush.msrb.mxu3 %v3585_v52 }
  0xaa   :  { %2728 = vmatmul.msk.f32.gmra.mxu1 %vm210_vm3, %v5121_v36  ;;  %532 = vmatpush.msra.mxu0 %v3628_v40 }
  0xab   :  { %540 = vmatpush.msra.mxu1 %v3644_v49  ;;  %632 = vmatpush.msrb.mxu3 %v3587_v54 }
  0xac   :  { %533 = vmatpush.msra.mxu0 %v3632_v44  ;;  %561 = vmatpush.msra.mxu2 %v3680_v58 }
  0xad   :  { %633 = vmatpush.msrb.mxu3 %v3593_v61  ;;  %541 = vmatpush.msra.mxu1 %v3653_v50 }
  0xae   :  { %534 = vmatpush.msra.mxu0 %v3638_v46  ;;  %562 = vmatpush.msra.mxu2 %v3688_v60 }
  0xaf   :  { %535 = vmatmul.f32.vlgmr.msra.gmra.mxu0 %v3640_v48  ;;  %634 = vmatpush.msrb.mxu3 %v3597_v1 }
  0xb0   :  { %v205_v57 = vpop.permute.xlu0 %204  ;;  %v208_v6 = vpop.permute.xlu1 %207  ;;  %650 = vmatpush.msrb.mxu0 %v3636_v45  ;;  %542 = vmatpush.msra.mxu1 %v3655_v51 }
  0xb1   :  { %vm215_vm5 = vcmp.eq.s32.totalorder %v205_v57, %v3572_v34  ;;  %vm216_vm7 = vcmp.eq.s32.totalorder %v208_v6, %v3572_v34  ;;  %635 = vmatpush.msrb.mxu3 %v3600_v5  ;;  %v3672_v57 = vld [vmem:[#allocation8 + $0xf8] sm:$0xff]  ;;  %563 = vmatpush.msra.mxu2 %v3698_v63  ;;  %v3712_v6 = vld [vmem:[#allocation8 + $0xe8] sm:$0xff] }
  0xb2   :  { %2729 = vmatmul.msk.f32.gmra.mxu1 %vm211_vm4, %v5121_v36  ;;  %2733 = vmatmul.msk.f32.gmra.mxu2 %vm215_vm5, %v5121_v36 }
  0xb3   :  { %651 = vmatpush.msrb.mxu0 %v3644_v49  ;;  %636 = vmatpush.msrb.mxu3 %v3604_v10 }
  0xb4   :  { %543 = vmatpush.msra.mxu1 %v3668_v55  ;;  %564 = vmatpush.msra.mxu2 %v3706_v3 }
  0xb5   :  { %652 = vmatpush.msrb.mxu0 %v3653_v50  ;;  %637 = vmatpush.msrb.mxu3 %v3610_v14 }
  0xb6   :  { %544 = vmatpush.msra.mxu1 %v3672_v57  ;;  %565 = vmatpush.msra.mxu2 %v3712_v6 }
  0xb7   :  { %653 = vmatpush.msrb.mxu0 %v3655_v51  ;;  %638 = vmatpush.msrb.mxu3 %v3613_v18 }
  0xb8   :  { %545 = vmatpush.msra.mxu1 %v3686_v59  ;;  %566 = vmatpush.msra.mxu2 %v3723_v9 }
  0xb9   :  { %639 = vmatpush.msrb.mxu3 %v3616_v22  ;;  %654 = vmatpush.msrb.mxu0 %v3668_v55 }
  0xba   :  { %2730 = vmatmul.msk.f32.gmra.mxu1 %vm212_vm6, %v5121_v36  ;;  %2734 = vmatmul.msk.f32.gmra.mxu2 %vm216_vm7, %v5121_v36 }
  0xbb   :  { %640 = vmatpush.msrb.mxu3 %v3619_v26  ;;  %655 = vmatpush.msrb.mxu0 %v3672_v57 }
  0xbc   :  { %546 = vmatpush.msra.mxu1 %v3690_v62  ;;  %567 = vmatpush.msra.mxu2 %v3729_v12 }
  0xbd   :  { %641 = vmatpush.msrb.mxu3 %v3622_v30  ;;  %656 = vmatpush.msrb.mxu0 %v3686_v59 }
  0xbe   :  { %547 = vmatpush.msra.mxu1 %v3704_v2  ;;  %568 = vmatpush.msra.mxu2 %v3740_v16 }
  0xbf   :  { %642 = vmatpush.msrb.mxu3 %v3625_v35  ;;  %657 = vmatpush.msrb.mxu0 %v3690_v62 }
  0xc0   :  { %548 = vmatpush.msra.mxu1 %v3708_v4  ;;  %569 = vmatpush.msra.mxu2 %v3746_v19 }
  0xc1   :  { %643 = vmatpush.msrb.mxu3 %v3628_v40  ;;  %658 = vmatpush.msrb.mxu0 %v3704_v2 }
  0xc2   :  { %549 = vmatpush.msra.mxu1 %v3721_v8  ;;  %570 = vmatpush.msra.mxu2 %v3748_v20 }
  0xc3   :  { %644 = vmatpush.msrb.mxu3 %v3632_v44  ;;  %659 = vmatpush.msrb.mxu0 %v3708_v4 }
  0xc4   :  { %550 = vmatpush.msra.mxu1 %v3725_v11  ;;  %571 = vmatpush.msra.mxu2 %v3760_v25 }
  0xc5   :  { %645 = vmatpush.msrb.mxu3 %v3638_v46  ;;  %660 = vmatpush.msrb.mxu0 %v3721_v8 }
  0xc6   :  { %551 = vmatpush.msra.mxu1 %v3738_v15  ;;  %572 = vmatpush.msra.mxu2 %v3762_v27 }
  0xc7   :  { %661 = vmatpush.msrb.mxu0 %v3725_v11 }
  0xc8   :  { %552 = vmatpush.msra.mxu1 %v3742_v17  ;;  %573 = vmatpush.msra.mxu2 %v3768_v29 }
  0xc9   :  { %662 = vmatpush.msrb.mxu0 %v3738_v15 }
  0xca   :  { %553 = vmatpush.msra.mxu1 %v3758_v24  ;;  %574 = vmatpush.msra.mxu2 %v3777_v31 }
  0xcb   :  { %663 = vmatpush.msrb.mxu0 %v3742_v17 }
  0xcc   :  { %554 = vmatpush.msra.mxu1 %v3766_v28 }
  0xcd   :  { %664 = vmatpush.msrb.mxu0 %v3758_v24 }
  0xcf   :  { %665 = vmatpush.msrb.mxu0 %v3766_v28 }
  0xd1   :  { %778 = vmatpush.msra.mxu0 %v3657_v53 }
  0xd3   :  { %779 = vmatpush.msra.mxu0 %v3670_v56 }
  0xd5   :  { %780 = vmatpush.msra.mxu0 %v3680_v58 }
  0xd7   :  { %781 = vmatpush.msra.mxu0 %v3688_v60 }
  0xd9   :  { %782 = vmatpush.msra.mxu0 %v3698_v63 }
  0xdb   :  { %783 = vmatpush.msra.mxu0 %v3706_v3 }
  0xdd   :  { %784 = vmatpush.msra.mxu0 %v3712_v6 }
  0xdf   :  { %785 = vmatpush.msra.mxu0 %v3723_v9 }
  0xe1   :  { %786 = vmatpush.msra.mxu0 %v3729_v12 }
  0xe3   :  { %787 = vmatpush.msra.mxu0 %v3740_v16 }
  0xe5   :  { %788 = vmatpush.msra.mxu0 %v3746_v19 }
  0xe7   :  { %789 = vmatpush.msra.mxu0 %v3748_v20 }
  0xe9   :  { %790 = vmatpush.msra.mxu0 %v3760_v25 }
  0xeb   :  { %791 = vmatpush.msra.mxu0 %v3762_v27 }
  0xed   :  { %792 = vmatpush.msra.mxu0 %v3768_v29 }
  0xef   :  { %793 = vmatpush.msra.mxu0 %v3777_v31 }
 0x10e   :  { %v278_v23 = vpop.f32.mrf.mxu2 }
 0x116   :  { %v281_v32 = vpop.f32.mrf.mxu2 }
 0x11f   :  { %v266_v0 = vpop.f32.mrf.mxu1 }
 0x120   :  { %363 = vmatmul.f32.vlgmr.msrb.gmra.mxu1 %v266_v0  ;;  %404 = vmatmul.f32.vlgmr.msrb.gmra.mxu2 %v266_v0 }
 0x121   :  { %445 = vmatmul.f32.vlgmr.msra.gmra.mxu3 %v266_v0  ;;  %670 = vmatpush.msrb.mxu1 %v3657_v53 }
 0x122   :  { %758 = vmatpush.msra.mxu3 %v3636_v45  ;;  %738 = vmatpush.msrb.mxu2 %v3582_v47 }
 0x123   :  { %671 = vmatpush.msrb.mxu1 %v3670_v56 }
 0x124   :  { %759 = vmatpush.msra.mxu3 %v3644_v49  ;;  %739 = vmatpush.msrb.mxu2 %v3585_v52 }
 0x125   :  { %672 = vmatpush.msrb.mxu1 %v3680_v58 }
 0x126   :  { %760 = vmatpush.msra.mxu3 %v3653_v50  ;;  %740 = vmatpush.msrb.mxu2 %v3587_v54 }
 0x127   :  { %v269_v7 = vpop.f32.mrf.mxu1  ;;  %673 = vmatpush.msrb.mxu1 %v3688_v60 }
 0x128   :  { %366 = vmatmul.f32.gmra.mxu1 %v269_v7  ;;  %407 = vmatmul.f32.gmra.mxu2 %v269_v7 }
 0x129   :  { %448 = vmatmul.f32.gmra.mxu3 %v269_v7  ;;  %674 = vmatpush.msrb.mxu1 %v3698_v63 }
 0x12a   :  { %761 = vmatpush.msra.mxu3 %v3655_v51  ;;  %741 = vmatpush.msrb.mxu2 %v3593_v61 }
 0x12b   :  { %675 = vmatpush.msrb.mxu1 %v3706_v3 }
 0x12c   :  { %762 = vmatpush.msra.mxu3 %v3668_v55  ;;  %742 = vmatpush.msrb.mxu2 %v3597_v1  ;;  %v536_v36 = vpop.f32.mrf.mxu0 }
 0x12d   :  { %676 = vmatpush.msrb.mxu1 %v3712_v6 }
 0x12e   :  { %763 = vmatpush.msra.mxu3 %v3672_v57  ;;  %743 = vmatpush.msrb.mxu2 %v3600_v5 }
 0x12f   :  { %v272_v13 = vpop.f32.mrf.mxu1  ;;  %677 = vmatpush.msrb.mxu1 %v3723_v9 }
 0x130   :  { %369 = vmatmul.f32.gmra.mxu1 %v272_v13  ;;  %410 = vmatmul.f32.gmra.mxu2 %v272_v13 }
 0x131   :  { %451 = vmatmul.f32.gmra.mxu3 %v272_v13  ;;  %678 = vmatpush.msrb.mxu1 %v3729_v12  ;;  %v339_v13 = vld [vmem:[%s5109_s6] sm:$0x7] }
 0x132   :  { %764 = vmatpush.msra.mxu3 %v3686_v59  ;;  %744 = vmatpush.msrb.mxu2 %v3604_v10 }
 0x133   :  { %679 = vmatpush.msrb.mxu1 %v3740_v16 }
 0x134   :  { %765 = vmatpush.msra.mxu3 %v3690_v62  ;;  %745 = vmatpush.msrb.mxu2 %v3610_v14 }
 0x135   :  { %v284_v33 = vpop.f32.mrf.mxu2  ;;  %680 = vmatpush.msrb.mxu1 %v3746_v19 }
 0x136   :  { %766 = vmatpush.msra.mxu3 %v3704_v2  ;;  %746 = vmatpush.msrb.mxu2 %v3613_v18 }
 0x137   :  { %v275_v21 = vpop.f32.mrf.mxu1  ;;  %681 = vmatpush.msrb.mxu1 %v3748_v20 }
 0x138   :  { %372 = vmatmul.f32.gmra.mxu1 %v275_v21  ;;  %413 = vmatmul.f32.gmra.mxu2 %v275_v21 }
 0x139   :  { %454 = vmatmul.f32.gmra.mxu3 %v275_v21  ;;  %682 = vmatpush.msrb.mxu1 %v3760_v25 }
 0x13a   :  { %767 = vmatpush.msra.mxu3 %v3708_v4  ;;  %747 = vmatpush.msrb.mxu2 %v3616_v22 }
 0x13b   :  { %683 = vmatpush.msrb.mxu1 %v3762_v27 }
 0x13c   :  { %768 = vmatpush.msra.mxu3 %v3721_v8  ;;  %748 = vmatpush.msrb.mxu2 %v3619_v26 }
 0x13d   :  { %v287_v37 = vpop.f32.mrf.mxu2  ;;  %684 = vmatpush.msrb.mxu1 %v3768_v29 }
 0x13e   :  { %769 = vmatpush.msra.mxu3 %v3725_v11  ;;  %749 = vmatpush.msrb.mxu2 %v3622_v30 }
 0x13f   :  { %685 = vmatpush.msrb.mxu1 %v3777_v31 }
 0x140   :  { %375 = vmatmul.f32.gmra.mxu1 %v278_v23  ;;  %416 = vmatmul.f32.gmra.mxu2 %v278_v23 }
 0x141   :  { %457 = vmatmul.f32.gmra.mxu3 %v278_v23  ;;  %750 = vmatpush.msrb.mxu2 %v3625_v35 }
 0x142   :  { %770 = vmatpush.msra.mxu3 %v3738_v15 }
 0x143   :  { %751 = vmatpush.msrb.mxu2 %v3628_v40 }
 0x144   :  { %771 = vmatpush.msra.mxu3 %v3742_v17 }
 0x145   :  { %752 = vmatpush.msrb.mxu2 %v3632_v44 }
 0x146   :  { %772 = vmatpush.msra.mxu3 %v3758_v24 }
 0x147   :  { %753 = vmatpush.msrb.mxu2 %v3638_v46 }
 0x148   :  { %378 = vmatmul.f32.gmra.mxu1 %v281_v32  ;;  %419 = vmatmul.f32.gmra.mxu2 %v281_v32 }
 0x149   :  { %460 = vmatmul.f32.gmra.mxu3 %v281_v32  ;;  %v3884_v32 = vperm.slane %v339_v13, 0 }
 0x14a   :  { %773 = vmatpush.msra.mxu3 %v3766_v28 }
 0x14b   :  { %5202 = vst [vmem:[#allocation41_spill] sm:$0xff] %v3884_v32 }
 0x150   :  { %381 = vmatmul.f32.gmra.mxu1 %v284_v33  ;;  %422 = vmatmul.f32.gmra.mxu2 %v284_v33 }
 0x151   :  { %463 = vmatmul.f32.gmra.mxu3 %v284_v33 }
 0x158   :  { %384 = vmatmul.f32.gmra.mxu1 %v287_v37  ;;  %425 = vmatmul.f32.gmra.mxu2 %v287_v37 }
 0x159   :  { %466 = vmatmul.f32.gmra.mxu3 %v287_v37 }
 0x160   :  { %555 = vmatmul.f32.vlgmr.msra.gmra.mxu1 %v3640_v48  ;;  %575 = vmatmul.f32.vlgmr.msra.gmra.mxu2 %v3640_v48 }
 0x161   :  { %846 = vmatpush.msra.mxu1 %v3582_v47  ;;  %866 = vmatpush.msra.mxu2 %v3636_v45 }
 0x163   :  { %847 = vmatpush.msra.mxu1 %v3585_v52  ;;  %867 = vmatpush.msra.mxu2 %v3644_v49 }
 0x165   :  { %848 = vmatpush.msra.mxu1 %v3587_v54  ;;  %868 = vmatpush.msra.mxu2 %v3653_v50 }
 0x167   :  { %849 = vmatpush.msra.mxu1 %v3593_v61  ;;  %869 = vmatpush.msra.mxu2 %v3655_v51 }
 0x169   :  { %850 = vmatpush.msra.mxu1 %v3597_v1  ;;  %870 = vmatpush.msra.mxu2 %v3668_v55 }
 0x16b   :  { %851 = vmatpush.msra.mxu1 %v3600_v5  ;;  %871 = vmatpush.msra.mxu2 %v3672_v57 }
 0x16d   :  { %852 = vmatpush.msra.mxu1 %v3604_v10  ;;  %872 = vmatpush.msra.mxu2 %v3686_v59 }
 0x16f   :  { %853 = vmatpush.msra.mxu1 %v3610_v14  ;;  %873 = vmatpush.msra.mxu2 %v3690_v62 }
 0x171   :  { %854 = vmatpush.msra.mxu1 %v3613_v18  ;;  %874 = vmatpush.msra.mxu2 %v3704_v2 }
 0x173   :  { %855 = vmatpush.msra.mxu1 %v3616_v22  ;;  %875 = vmatpush.msra.mxu2 %v3708_v4 }
 0x175   :  { %856 = vmatpush.msra.mxu1 %v3619_v26  ;;  %876 = vmatpush.msra.mxu2 %v3721_v8 }
 0x177   :  { %857 = vmatpush.msra.mxu1 %v3622_v30  ;;  %877 = vmatpush.msra.mxu2 %v3725_v11 }
 0x179   :  { %858 = vmatpush.msra.mxu1 %v3625_v35  ;;  %878 = vmatpush.msra.mxu2 %v3738_v15 }
 0x17b   :  { %859 = vmatpush.msra.mxu1 %v3628_v40  ;;  %879 = vmatpush.msra.mxu2 %v3742_v17 }
 0x17d   :  { %860 = vmatpush.msra.mxu1 %v3632_v44  ;;  %880 = vmatpush.msra.mxu2 %v3758_v24 }
 0x17f   :  { %861 = vmatpush.msra.mxu1 %v3638_v46  ;;  %881 = vmatpush.msra.mxu2 %v3766_v28 }
 0x19d   :  { %v364_v38 = vpop.f32.mrf.mxu1 }
 0x19e   :  { %v365_v37 = vadd.f32 %v364_v38, %v3884_v32 }
 0x1a3   :  { %v405_v39 = vpop.f32.mrf.mxu2 }
 0x1a4   :  { %v3867_v41 = vpop.f32.mrf.mxu3 }
 0x1a5   :  { %v3869_v42 = vpop.f32.mrf.mxu1 }
 0x1a6   :  { %5196 = vst [vmem:[#allocation35_spill] sm:$0xff] %v3869_v42 }
 0x1ab   :  { %v3871_v43 = vpop.f32.mrf.mxu2 }
 0x1ac   :  { %5197 = vst [vmem:[#allocation36_spill] sm:$0xff] %v3871_v43  ;;  %v3873_v0 = vpop.f32.mrf.mxu3 }
 0x1ad   :  { %5198 = vst [vmem:[#allocation37_spill] sm:$0xff] %v3873_v0  ;;  %v3875_v7 = vpop.f32.mrf.mxu1 }
 0x1ae   :  { %5199 = vst [vmem:[#allocation38_spill] sm:$0xff] %v3875_v7  ;;  %v579_v7 = vadd.f32 %v536_v36, %v365_v37 }
 0x1b0   :  { %v2735_v28 = vmul.f32 -1.442695, %v579_v7 }
 0x1b2   :  { %2821 = vpow2.f32 %v2735_v28 }
 0x1b3   :  { %v3880_v21 = vpop.f32.mrf.mxu2 }
 0x1b4   :  { %5200 = vst [vmem:[#allocation39_spill] sm:$0xff] %v3880_v21  ;;  %v3882_v23 = vpop.f32.mrf.mxu3  ;;  %v3896_v21 = vperm.slane %v339_v13, 1 }
 0x1b5   :  { %5201 = vst [vmem:[#allocation40_spill] sm:$0xff] %v3882_v23  ;;  %v3886_v33 = vpop.f32.mrf.mxu1  ;;  %v3898_v23 = vperm.slane %v339_v13, 2 }
 0x1b6   :  { %5203 = vst [vmem:[#allocation42_spill] sm:$0xff] %v3886_v33 }
 0x1b7   :  { %5207 = vst [vmem:[#allocation46_spill] sm:$0xff] %v3896_v21 }
 0x1bb   :  { %v3889_v34 = vpop.f32.mrf.mxu2 }
 0x1bc   :  { %5204 = vst [vmem:[#allocation43_spill] sm:$0xff] %v3889_v34  ;;  %v3891_v0 = vpop.f32.mrf.mxu3 }
 0x1bd   :  { %5205 = vst [vmem:[#allocation44_spill] sm:$0xff] %v3891_v0  ;;  %v376_v42 = vpop.f32.mrf.mxu1 }
 0x1be   :  { %v3894_v43 = vadd.f32 %v376_v42, %v3884_v32  ;;  %v2822_v42 = vpop.eup %2821 }
 0x1c0   :  { %5206 = vst [vmem:[#allocation45_spill] sm:$0xff] %v3894_v43 }
 0x1c3   :  { %v417_v46 = vpop.f32.mrf.mxu2 }
 0x1c4   :  { %v3901_v33 = vadd.f32 %v417_v46, %v3896_v21  ;;  %v458_v38 = vpop.f32.mrf.mxu3 }
 0x1c5   :  { %v3904_v34 = vadd.f32 %v458_v38, %v3898_v23  ;;  %v379_v0 = vpop.f32.mrf.mxu1 }
 0x1c6   :  { %5208 = vst [vmem:[#allocation47_spill] sm:$0xff] %v3901_v33  ;;  %v3907_v36 = vadd.f32 %v379_v0, %v3884_v32  ;;  %v583_v33 = vadd.f32 1.0, %v2822_v42  ;;  %v406_v42 = vadd.f32 %v405_v39, %v3896_v21 }
 0x1c7   :  { %5209 = vst [vmem:[#allocation48_spill] sm:$0xff] %v3904_v34 }
 0x1c8   :  { %5210 = vst [vmem:[#allocation49_spill] sm:$0xff] %v3907_v36  ;;  %2823 = vrcp.f32 %v583_v33  ;;  %vm589_vm9 = vweird.f32 %v583_v33  ;;  %v593_v17 = vand.u32 2147483647, %v583_v33 }
 0x1ca   :  { %vm594_vm11 = vcmp.eq.f32.partialorder %v593_v17, 8.507059e+37 }
 0x1cb   :  { %v420_v37 = vpop.f32.mrf.mxu2 }
 0x1cc   :  { %v3910_v7 = vadd.f32 %v420_v37, %v3896_v21  ;;  %v461_v13 = vpop.f32.mrf.mxu3 }
 0x1cd   :  { %v3913_v43 = vadd.f32 %v461_v13, %v3898_v23  ;;  %v382_v46 = vpop.f32.mrf.mxu1 }
 0x1ce   :  { %5211 = vst [vmem:[#allocation50_spill] sm:$0xff] %v3910_v7  ;;  %v3916_v28 = vadd.f32 %v382_v46, %v3884_v32  ;;  %v2824_v13 = vpop.eup %2823 }
 0x1cf   :  { %5212 = vst [vmem:[#allocation51_spill] sm:$0xff] %v3913_v43  ;;  %v585_v31 = vmul.f32 %v2824_v13, %v583_v33  ;;  %vm590_vm8 = vweird.f32 %v2824_v13 }
 0x1d0   :  { %5213 = vst [vmem:[#allocation52_spill] sm:$0xff] %v3916_v28  ;;  %vm591_vm10 = vmor %vm589_vm9, %vm590_vm8 }
 0x1d3   :  { %v423_v38 = vpop.f32.mrf.mxu2 }
 0x1d4   :  { %v3919_v34 = vadd.f32 %v423_v38, %v3896_v21  ;;  %v464_v0 = vpop.f32.mrf.mxu3  ;;  %v586_v38 = vsub.f32 1.0, %v585_v31 }
 0x1d5   :  { %v3922_v36 = vadd.f32 %v464_v0, %v3898_v23  ;;  %v385_v37 = vpop.f32.mrf.mxu1 }
 0x1d6   :  { %5214 = vst [vmem:[#allocation53_spill] sm:$0xff] %v3919_v34  ;;  %v3925_v7 = vadd.f32 %v385_v37, %v3884_v32  ;;  %v587_v44 = vmul.f32 %v2824_v13, %v586_v38  ;;  %v595_v32 = vand.u32 2147483648, %v583_v33 }
 0x1d7   :  { %5215 = vst [vmem:[#allocation54_spill] sm:$0xff] %v3922_v36  ;;  %v3931_v36 = vld [vmem:[#allocation9] ss:$0 sm:$0xff] }
 0x1d8   :  { %5216 = vst [vmem:[#allocation55_spill] sm:$0xff] %v3925_v7  ;;  %v588_v0 = vadd.f32 %v2824_v13, %v587_v44  ;;  %v447_v44 = vadd.f32 %v3867_v41, %v3898_v23 }
 0x1da   :  { %v592_v39 = vsel %vm591_vm10, %v2824_v13, %v588_v0 }
 0x1db   :  { %v426_v43 = vpop.f32.mrf.mxu2 }
 0x1dc   :  { %v3929_v46 = vadd.f32 %v426_v43, %v3896_v21 }
 0x1dd   :  { %v556_v28 = vpop.f32.mrf.mxu1 }
 0x1de   :  { %5217 = vst [vmem:[#allocation56_spill] sm:$0xff] %v3929_v46  ;;  %v599_v24 = vadd.f32 %v556_v28, %v406_v42  ;;  %v596_v28 = vor.u32 1.1754944e-38, %v595_v32 }
 0x1e0   :  { %v2736_v34 = vmul.f32 -1.442695, %v599_v24  ;;  %v597_v24 = vsel %vm594_vm11, %v596_v28, %v592_v39 }
 0x1e2   :  { %2825 = vpow2.f32 %v2736_v34 }
 0x1e3   :  { %v576_v7 = vpop.f32.mrf.mxu2 }
 0x1e4   :  { %v622_v43 = vadd.f32 %v3931_v36, %v576_v7 }
 0x1e6   :  { %v623_v34 = vmul.f32 %v622_v43, %v597_v24 }
 0x1e8   :  { %v2826_v37 = vpop.eup %2825  ;;  %v624_v38 = vadd.f32 %v623_v34, %v447_v44  ;;  %v5228_v34 = vld [vmem:[#allocation41_spill] sm:$0xff] }
 0x1e9   :  { %v603_v29 = vadd.f32 1.0, %v2826_v37 }
 0x1eb   :  { %2827 = vrcp.f32 %v603_v29  ;;  %v615_v21 = vand.u32 2147483648, %v603_v29  ;;  %v613_v33 = vand.u32 2147483647, %v603_v29  ;;  %vm609_vm13 = vweird.f32 %v603_v29 }
 0x1ec   :  { %2829 = vtanh.f32 %v624_v38 }
 0x1ed   :  { %v616_v7 = vor.u32 1.1754944e-38, %v615_v21  ;;  %vm614_vm15 = vcmp.eq.f32.partialorder %v613_v33, 8.507059e+37 }
 0x1f1   :  { %v2828_v31 = vpop.eup %2827 }
 0x1f2   :  { %v605_v42 = vmul.f32 %v2828_v31, %v603_v29  ;;  %vm610_vm12 = vweird.f32 %v2828_v31  ;;  %v2830_v39 = vpop.eup %2829 }
 0x1f3   :  { %vm611_vm14 = vmor %vm609_vm13, %vm610_vm12 }
 0x1f4   :  { %v606_v46 = vsub.f32 1.0, %v605_v42 }
 0x1f6   :  { %v607_v37 = vmul.f32 %v2828_v31, %v606_v46 }
 0x1f8   :  { %v608_v13 = vadd.f32 %v2828_v31, %v607_v37 }
 0x1fa   :  { %v612_v32 = vsel %vm611_vm14, %v2828_v31, %v608_v13  ;;  %v5229_v31 = vld [vmem:[#allocation35_spill] sm:$0xff] }
 0x1fb   :  { %v617_v17 = vsel %vm614_vm15, %v616_v7, %v612_v32  ;;  %v368_v44 = vadd.f32 %v5229_v31, %v5228_v34 }
 0x1fc   :  { %v626_v0 = vsub.f32 1.0, %v617_v17  ;;  %v628_v41 = vmul.f32 %v617_v17, %v3640_v48  ;;  %v5227_v48 = vld [vmem:[#allocation36_spill] sm:$0xff] }
 0x1fe   :  { %v627_v43 = vmul.f32 %v2830_v39, %v626_v0 }
 0x200   :  { %v3937_v28 = vadd.f32 %v628_v41, %v627_v43 }
 0x202   :  { %646 = vmatmul.f32.vlgmr.msrb.gmra.mxu3 %v3937_v28  ;;  %666 = vmatmul.f32.vlgmr.msrb.gmra.mxu0 %v3937_v28 }
 0x203   :  { %686 = vmatmul.f32.vlgmr.msrb.gmra.mxu1 %v3937_v28  ;;  %886 = vmatpush.msrb.mxu3 %v3657_v53 }
 0x204   :  { %954 = vmatpush.msrb.mxu0 %v3582_v47  ;;  %974 = vmatpush.msrb.mxu1 %v3636_v45  ;;  %v5218_v47 = vld [vmem:[#allocation30_spill] sm:$0xff] }
 0x205   :  { %887 = vmatpush.msrb.mxu3 %v3670_v56 }
 0x206   :  { %955 = vmatpush.msrb.mxu0 %v3585_v52  ;;  %975 = vmatpush.msrb.mxu1 %v3644_v49  ;;  %v5219_v52 = vld [vmem:[#allocation33_spill] sm:$0xff] }
 0x207   :  { %888 = vmatpush.msrb.mxu3 %v3680_v58 }
 0x208   :  { %956 = vmatpush.msrb.mxu0 %v3587_v54  ;;  %976 = vmatpush.msrb.mxu1 %v3653_v50  ;;  %v5220_v54 = vld [vmem:[#allocation28_spill] sm:$0xff] }
 0x209   :  { %889 = vmatpush.msrb.mxu3 %v3688_v60 }
 0x20a   :  { %957 = vmatpush.msrb.mxu0 %v3593_v61  ;;  %977 = vmatpush.msrb.mxu1 %v3655_v51  ;;  %v5221_v61 = vld [vmem:[#allocation31_spill] sm:$0xff] }
 0x20b   :  { %890 = vmatpush.msrb.mxu3 %v3698_v63 }
 0x20c   :  { %958 = vmatpush.msrb.mxu0 %v3597_v1  ;;  %978 = vmatpush.msrb.mxu1 %v3668_v55  ;;  %v5222_v1 = vld [vmem:[#allocation34_spill] sm:$0xff] }
 0x20d   :  { %891 = vmatpush.msrb.mxu3 %v3706_v3 }
 0x20e   :  { %959 = vmatpush.msrb.mxu0 %v3600_v5  ;;  %979 = vmatpush.msrb.mxu1 %v3672_v57  ;;  %v5223_v5 = vld [vmem:[#allocation29_spill] sm:$0xff] }
 0x20f   :  { %892 = vmatpush.msrb.mxu3 %v3712_v6 }
 0x210   :  { %960 = vmatpush.msrb.mxu0 %v3604_v10  ;;  %980 = vmatpush.msrb.mxu1 %v3686_v59  ;;  %v5224_v10 = vld [vmem:[#allocation32_spill] sm:$0xff] }
 0x211   :  { %893 = vmatpush.msrb.mxu3 %v3723_v9 }
 0x212   :  { %961 = vmatpush.msrb.mxu0 %v3610_v14  ;;  %981 = vmatpush.msrb.mxu1 %v3690_v62  ;;  %v3990_v14 = vpop.f32.mrf.mxu3 }
 0x213   :  { %894 = vmatpush.msrb.mxu3 %v3729_v12  ;;  %5225 = vst [vmem:[#allocation30_spill] sm:$0xff] %v3990_v14 }
 0x214   :  { %962 = vmatpush.msrb.mxu0 %v3613_v18  ;;  %982 = vmatpush.msrb.mxu1 %v3704_v2  ;;  %v5226_v18 = vld [vmem:[#allocation46_spill] sm:$0xff] }
 0x215   :  { %895 = vmatpush.msrb.mxu3 %v3740_v16  ;;  %v409_v29 = vadd.f32 %v5227_v48, %v5226_v18 }
 0x216   :  { %963 = vmatpush.msrb.mxu0 %v3616_v22  ;;  %983 = vmatpush.msrb.mxu1 %v3708_v4 }
 0x217   :  { %896 = vmatpush.msrb.mxu3 %v3746_v19 }
 0x218   :  { %964 = vmatpush.msrb.mxu0 %v3619_v26  ;;  %984 = vmatpush.msrb.mxu1 %v3721_v8 }
 0x219   :  { %897 = vmatpush.msrb.mxu3 %v3748_v20 }
 0x21a   :  { %965 = vmatpush.msrb.mxu0 %v3622_v30  ;;  %985 = vmatpush.msrb.mxu1 %v3725_v11 }
 0x21b   :  { %898 = vmatpush.msrb.mxu3 %v3760_v25 }
 0x21c   :  { %966 = vmatpush.msrb.mxu0 %v3625_v35  ;;  %986 = vmatpush.msrb.mxu1 %v3738_v15 }
 0x21d   :  { %899 = vmatpush.msrb.mxu3 %v3762_v27 }
 0x21e   :  { %967 = vmatpush.msrb.mxu0 %v3628_v40  ;;  %987 = vmatpush.msrb.mxu1 %v5218_v47 }
 0x21f   :  { %900 = vmatpush.msrb.mxu3 %v5219_v52 }
 0x220   :  { %968 = vmatpush.msrb.mxu0 %v5220_v54  ;;  %988 = vmatpush.msrb.mxu1 %v5221_v61 }
 0x221   :  { %901 = vmatpush.msrb.mxu3 %v5222_v1 }
 0x222   :  { %969 = vmatpush.msrb.mxu0 %v5223_v5  ;;  %989 = vmatpush.msrb.mxu1 %v5224_v10 }
 0x27f   :  { %v667_v21 = vpop.f32.mrf.mxu0 }
 0x280   :  { %v710_v46 = vadd.f32 %v667_v21, %v409_v29 }
 0x282   :  { %v2738_v24 = vmul.f32 -1.442695, %v710_v46 }
 0x284   :  { %2831 = vpow2.f32 %v2738_v24  ;;  %v687_v24 = vpop.f32.mrf.mxu1 }
 0x285   :  { %v647_v42 = vpop.f32.mrf.mxu3 }
 0x286   :  { %v690_v38 = vadd.f32 %v647_v42, %v368_v44 }
 0x288   :  { %v2737_v37 = vmul.f32 -1.442695, %v690_v38  ;;  %v730_v38 = vadd.f32 %v3931_v36, %v687_v24 }
 0x28a   :  { %v2832_v33 = vpop.eup %2831  ;;  %2833 = vpow2.f32 %v2737_v37 }
 0x28b   :  { %v714_v13 = vadd.f32 1.0, %v2832_v33 }
 0x28d   :  { %2835 = vrcp.f32 %v714_v13  ;;  %v726_v14 = vand.u32 2147483648, %v714_v13  ;;  %vm720_vm5 = vweird.f32 %v714_v13  ;;  %v724_v18 = vand.u32 2147483647, %v714_v13 }
 0x28f   :  { %vm725_vm7 = vcmp.eq.f32.partialorder %v724_v18, 8.507059e+37 }
 0x290   :  { %v2834_v7 = vpop.eup %2833 }
 0x291   :  { %v694_v32 = vadd.f32 1.0, %v2834_v7 }
 0x293   :  { %2837 = vrcp.f32 %v694_v32  ;;  %v2836_v17 = vpop.eup %2835  ;;  %v706_v29 = vand.u32 2147483648, %v694_v32  ;;  %v704_v46 = vand.u32 2147483647, %v694_v32  ;;  %vm700_vm1 = vweird.f32 %v694_v32 }
 0x294   :  { %v716_v0 = vmul.f32 %v2836_v17, %v714_v13  ;;  %vm721_vm4 = vweird.f32 %v2836_v17  ;;  %v4006_v13 = vld [vmem:[#allocation8 + $0x168] sm:$0xff] }
 0x295   :  { %v707_v42 = vor.u32 1.1754944e-38, %v706_v29  ;;  %vm705_vm3 = vcmp.eq.f32.partialorder %v704_v46, 8.507059e+37  ;;  %vm722_vm6 = vmor %vm720_vm5, %vm721_vm4 }
 0x296   :  { %v717_v41 = vsub.f32 1.0, %v716_v0  ;;  %v5230_v0 = vld [vmem:[#allocation37_spill] sm:$0xff] }
 0x298   :  { %v718_v31 = vmul.f32 %v2836_v17, %v717_v41 }
 0x299   :  { %v2838_v39 = vpop.eup %2837 }
 0x29a   :  { %v696_v43 = vmul.f32 %v2838_v39, %v694_v32  ;;  %vm701_vm0 = vweird.f32 %v2838_v39  ;;  %v719_v7 = vadd.f32 %v2836_v17, %v718_v31  ;;  %v727_v32 = vor.u32 1.1754944e-38, %v726_v14  ;;  %v4011_v14 = vld [vmem:[#allocation8 + $0x150] sm:$0xff] }
 0x29b   :  { %vm702_vm2 = vmor %vm700_vm1, %vm701_vm0 }
 0x29c   :  { %v697_v48 = vsub.f32 1.0, %v696_v43  ;;  %v450_v43 = vadd.f32 %v5230_v0, %v3898_v23 }
 0x29e   :  { %v698_v21 = vmul.f32 %v2838_v39, %v697_v48 }
 0x2a0   :  { %v699_v44 = vadd.f32 %v2838_v39, %v698_v21  ;;  %v723_v21 = vsel %vm722_vm6, %v2836_v17, %v719_v7 }
 0x2a1   :  { %v728_v29 = vsel %vm725_vm7, %v727_v32, %v723_v21 }
 0x2a2   :  { %v703_v37 = vsel %vm702_vm2, %v2838_v39, %v699_v44  ;;  %v734_v24 = vsub.f32 1.0, %v728_v29  ;;  %v736_v31 = vmul.f32 %v728_v29, %v3937_v28  ;;  %v4016_v28 = vld [vmem:[#allocation8 + $0x138] sm:$0xff] }
 0x2a3   :  { %v708_v33 = vsel %vm705_vm3, %v707_v42, %v703_v37 }
 0x2a4   :  { %v731_v48 = vmul.f32 %v730_v38, %v708_v33 }
 0x2a6   :  { %v732_v41 = vadd.f32 %v731_v48, %v450_v43 }
 0x2a8   :  { %2839 = vtanh.f32 %v732_v41 }
 0x2ae   :  { %v2840_v39 = vpop.eup %2839 }
 0x2af   :  { %v735_v46 = vmul.f32 %v2840_v39, %v734_v24 }
 0x2b1   :  { %v4000_v44 = vadd.f32 %v736_v31, %v735_v46 }
 0x2b3   :  { %754 = vmatmul.f32.vlgmr.msrb.gmra.mxu2 %v4000_v44  ;;  %774 = vmatmul.f32.vlgmr.msra.gmra.mxu3 %v4000_v44 }
 0x2b4   :  { %794 = vmatmul.f32.vlgmr.msra.gmra.mxu0 %v4000_v44  ;;  %994 = vmatpush.msrb.mxu2 %v3657_v53  ;;  %v4021_v53 = vld [vmem:[#allocation8 + $0x120] sm:$0xff] }
 0x2b5   :  { %1062 = vmatpush.msra.mxu3 %v4006_v13  ;;  %1082 = vmatpush.msra.mxu0 %v3636_v45  ;;  %v4026_v45 = vld [vmem:[#allocation8 + $0x108] sm:$0xff] }
 0x2b6   :  { %995 = vmatpush.msrb.mxu2 %v3670_v56 }
 0x2b7   :  { %1063 = vmatpush.msra.mxu3 %v4011_v14  ;;  %1083 = vmatpush.msra.mxu0 %v3644_v49  ;;  %v4031_v49 = vld [vmem:[#allocation8 + $0xf0] sm:$0xff] }
 0x2b8   :  { %996 = vmatpush.msrb.mxu2 %v3680_v58 }
 0x2b9   :  { %1064 = vmatpush.msra.mxu3 %v4016_v28  ;;  %1084 = vmatpush.msra.mxu0 %v3653_v50  ;;  %v4036_v50 = vld [vmem:[#allocation8 + $0xd8] sm:$0xff] }
 0x2ba   :  { %997 = vmatpush.msrb.mxu2 %v3688_v60 }
 0x2bb   :  { %1065 = vmatpush.msra.mxu3 %v4021_v53  ;;  %1085 = vmatpush.msra.mxu0 %v3655_v51  ;;  %v4041_v51 = vld [vmem:[#allocation8 + $0xc0] sm:$0xff] }
 0x2bc   :  { %998 = vmatpush.msrb.mxu2 %v3698_v63 }
 0x2bd   :  { %1066 = vmatpush.msra.mxu3 %v4026_v45  ;;  %1086 = vmatpush.msra.mxu0 %v3668_v55  ;;  %v4046_v55 = vld [vmem:[#allocation8 + $0xa8] sm:$0xff] }
 0x2be   :  { %999 = vmatpush.msrb.mxu2 %v3706_v3 }
 0x2bf   :  { %1067 = vmatpush.msra.mxu3 %v4031_v49  ;;  %1087 = vmatpush.msra.mxu0 %v3672_v57 }
 0x2c0   :  { %1000 = vmatpush.msrb.mxu2 %v3712_v6 }
 0x2c1   :  { %1068 = vmatpush.msra.mxu3 %v4036_v50  ;;  %1088 = vmatpush.msra.mxu0 %v3686_v59 }
 0x2c2   :  { %1001 = vmatpush.msrb.mxu2 %v3723_v9 }
 0x2c3   :  { %1069 = vmatpush.msra.mxu3 %v4041_v51  ;;  %1089 = vmatpush.msra.mxu0 %v3690_v62 }
 0x2c4   :  { %1002 = vmatpush.msrb.mxu2 %v3729_v12 }
 0x2c5   :  { %1070 = vmatpush.msra.mxu3 %v4046_v55  ;;  %1090 = vmatpush.msra.mxu0 %v3704_v2 }
 0x2c6   :  { %1003 = vmatpush.msrb.mxu2 %v3740_v16 }
 0x2c7   :  { %1071 = vmatpush.msra.mxu3 %v3616_v22  ;;  %1091 = vmatpush.msra.mxu0 %v3708_v4  ;;  %v5231_v22 = vld [vmem:[#allocation38_spill] sm:$0xff] }
 0x2c8   :  { %1004 = vmatpush.msrb.mxu2 %v3746_v19 }
 0x2c9   :  { %1072 = vmatpush.msra.mxu3 %v3619_v26  ;;  %1092 = vmatpush.msra.mxu0 %v3721_v8  ;;  %v371_v26 = vadd.f32 %v5231_v22, %v5228_v34 }
 0x2ca   :  { %1005 = vmatpush.msrb.mxu2 %v3748_v20 }
 0x2cb   :  { %1073 = vmatpush.msra.mxu3 %v3622_v30  ;;  %1093 = vmatpush.msra.mxu0 %v3725_v11  ;;  %v5232_v30 = vld [vmem:[#allocation46_spill] sm:$0xff] }
 0x2cc   :  { %1006 = vmatpush.msrb.mxu2 %v3760_v25 }
 0x2cd   :  { %1074 = vmatpush.msra.mxu3 %v3625_v35  ;;  %1094 = vmatpush.msra.mxu0 %v3738_v15  ;;  %v5233_v35 = vld [vmem:[#allocation39_spill] sm:$0xff] }
 0x2ce   :  { %1007 = vmatpush.msrb.mxu2 %v3762_v27 }
 0x2cf   :  { %1075 = vmatpush.msra.mxu3 %v3628_v40  ;;  %1095 = vmatpush.msra.mxu0 %v5218_v47  ;;  %v412_v40 = vadd.f32 %v5233_v35, %v5232_v30 }
 0x2d0   :  { %1008 = vmatpush.msrb.mxu2 %v5219_v52 }
 0x2d1   :  { %1076 = vmatpush.msra.mxu3 %v5220_v54  ;;  %1096 = vmatpush.msra.mxu0 %v5221_v61 }
 0x2d2   :  { %1009 = vmatpush.msrb.mxu2 %v5222_v1 }
 0x2d3   :  { %1077 = vmatpush.msra.mxu3 %v5223_v5  ;;  %1097 = vmatpush.msra.mxu0 %v5224_v10 }
 0x331   :  { %v795_v29 = vpop.f32.mrf.mxu0 }
 0x332   :  { %v838_v31 = vadd.f32 %v3931_v36, %v795_v29 }
 0x336   :  { %v755_v56 = vpop.f32.mrf.mxu2  ;;  %v775_v57 = vpop.f32.mrf.mxu3 }
 0x337   :  { %v798_v59 = vadd.f32 %v755_v56, %v371_v26  ;;  %v818_v62 = vadd.f32 %v775_v57, %v412_v40  ;;  %v5234_v40 = vld [vmem:[#allocation40_spill] sm:$0xff] }
 0x338   :  { %v453_v56 = vadd.f32 %v5234_v40, %v3898_v23 }
 0x339   :  { %v2739_v18 = vmul.f32 -1.442695, %v798_v59  ;;  %v2740_v54 = vmul.f32 -1.442695, %v818_v62 }
 0x33b   :  { %2841 = vpow2.f32 %v2739_v18 }
 0x33c   :  { %2843 = vpow2.f32 %v2740_v54 }
 0x341   :  { %v2842_v17 = vpop.eup %2841 }
 0x342   :  { %v2844_v42 = vpop.eup %2843  ;;  %v802_v38 = vadd.f32 1.0, %v2842_v17 }
 0x343   :  { %v822_v5 = vadd.f32 1.0, %v2844_v42 }
 0x344   :  { %2845 = vrcp.f32 %v802_v38  ;;  %v814_v48 = vand.u32 2147483648, %v802_v38  ;;  %v812_v32 = vand.u32 2147483647, %v802_v38  ;;  %vm808_vm9 = vweird.f32 %v802_v38 }
 0x345   :  { %2847 = vrcp.f32 %v822_v5  ;;  %v834_v57 = vand.u32 2147483648, %v822_v5  ;;  %vm828_vm13 = vweird.f32 %v822_v5  ;;  %v832_v62 = vand.u32 2147483647, %v822_v5 }
 0x346   :  { %v815_v46 = vor.u32 1.1754944e-38, %v814_v48  ;;  %vm813_vm11 = vcmp.eq.f32.partialorder %v812_v32, 8.507059e+37  ;;  %v4091_v48 = vld [vmem:[#allocation8 + $0x160] sm:$0xff]  ;;  %v4110_v32 = vld [vmem:[#allocation8 + $0x110] sm:$0xff] }
 0x347   :  { %v835_v17 = vor.u32 1.1754944e-38, %v834_v57  ;;  %vm833_vm15 = vcmp.eq.f32.partialorder %v832_v62, 8.507059e+37 }
 0x34a   :  { %v2846_v37 = vpop.eup %2845 }
 0x34b   :  { %v2848_v33 = vpop.eup %2847  ;;  %v804_v7 = vmul.f32 %v2846_v37, %v802_v38  ;;  %vm809_vm8 = vweird.f32 %v2846_v37 }
 0x34c   :  { %v824_v0 = vmul.f32 %v2848_v33, %v822_v5  ;;  %vm810_vm10 = vmor %vm808_vm9, %vm809_vm8  ;;  %vm829_vm12 = vweird.f32 %v2848_v33  ;;  %v4084_v5 = vld [vmem:[#allocation8 + $0x178] sm:$0xff] }
 0x34d   :  { %v805_v43 = vsub.f32 1.0, %v804_v7  ;;  %vm830_vm14 = vmor %vm828_vm13, %vm829_vm12 }
 0x34e   :  { %v825_v41 = vsub.f32 1.0, %v824_v0 }
 0x34f   :  { %v806_v21 = vmul.f32 %v2846_v37, %v805_v43 }
 0x350   :  { %v826_v24 = vmul.f32 %v2848_v33, %v825_v41  ;;  %v4100_v41 = vld [vmem:[#allocation8 + $0x140] sm:$0xff] }
 0x351   :  { %v807_v39 = vadd.f32 %v2846_v37, %v806_v21  ;;  %v4105_v21 = vld [vmem:[#allocation8 + $0x128] sm:$0xff] }
 0x352   :  { %v827_v35 = vadd.f32 %v2848_v33, %v826_v24 }
 0x353   :  { %v811_v22 = vsel %vm810_vm10, %v2846_v37, %v807_v39 }
 0x354   :  { %v816_v26 = vsel %vm813_vm11, %v815_v46, %v811_v22  ;;  %v831_v54 = vsel %vm830_vm14, %v2848_v33, %v827_v35  ;;  %v4088_v33 = vld [vmem:[#allocation8 + $0x170] sm:$0xff] }
 0x355   :  { %v839_v59 = vmul.f32 %v838_v31, %v816_v26  ;;  %v836_v42 = vsel %vm833_vm15, %v835_v17, %v831_v54  ;;  %v5237_v54 = vld [vmem:[#allocation44_spill] sm:$0xff] }
 0x356   :  { %v842_v38 = vsub.f32 1.0, %v836_v42  ;;  %v844_v0 = vmul.f32 %v836_v42, %v4000_v44  ;;  %v4095_v44 = vld [vmem:[#allocation8 + $0x158] sm:$0xff]  ;;  %v456_v17 = vadd.f32 %v5237_v54, %v3898_v23 }
 0x357   :  { %v840_v18 = vadd.f32 %v839_v59, %v453_v56 }
 0x359   :  { %2849 = vtanh.f32 %v840_v18 }
 0x35f   :  { %v2850_v37 = vpop.eup %2849 }
 0x360   :  { %v843_v7 = vmul.f32 %v2850_v37, %v842_v38 }
 0x362   :  { %v4079_v43 = vadd.f32 %v844_v0, %v843_v7 }
 0x364   :  { %862 = vmatmul.f32.vlgmr.msra.gmra.mxu1 %v4079_v43  ;;  %882 = vmatmul.f32.vlgmr.msra.gmra.mxu2 %v4079_v43 }
 0x365   :  { %902 = vmatmul.f32.vlgmr.msrb.gmra.mxu3 %v4079_v43  ;;  %1102 = vmatpush.msra.mxu1 %v4084_v5 }
 0x366   :  { %1170 = vmatpush.msra.mxu2 %v4006_v13  ;;  %1190 = vmatpush.msrb.mxu3 %v4088_v33 }
 0x367   :  { %1103 = vmatpush.msra.mxu1 %v4091_v48 }
 0x368   :  { %1171 = vmatpush.msra.mxu2 %v4011_v14  ;;  %1191 = vmatpush.msrb.mxu3 %v4095_v44 }
 0x369   :  { %1104 = vmatpush.msra.mxu1 %v3680_v58  ;;  %v4115_v58 = vld [vmem:[#allocation8 + $0xf8] sm:$0xff] }
 0x36a   :  { %1172 = vmatpush.msra.mxu2 %v4016_v28  ;;  %1192 = vmatpush.msrb.mxu3 %v4100_v41 }
 0x36b   :  { %1105 = vmatpush.msra.mxu1 %v3688_v60  ;;  %v4120_v60 = vld [vmem:[#allocation8 + $0xe0] sm:$0xff] }
 0x36c   :  { %1173 = vmatpush.msra.mxu2 %v4021_v53  ;;  %1193 = vmatpush.msrb.mxu3 %v4105_v21 }
 0x36d   :  { %1106 = vmatpush.msra.mxu1 %v3698_v63  ;;  %v4125_v63 = vld [vmem:[#allocation8 + $0xc8] sm:$0xff] }
 0x36e   :  { %1174 = vmatpush.msra.mxu2 %v4026_v45  ;;  %1194 = vmatpush.msrb.mxu3 %v4110_v32 }
 0x36f   :  { %1107 = vmatpush.msra.mxu1 %v3706_v3  ;;  %v4132_v3 = vld [vmem:[#allocation8 + $0x90] sm:$0xff] }
 0x370   :  { %1175 = vmatpush.msra.mxu2 %v4031_v49  ;;  %1195 = vmatpush.msrb.mxu3 %v4115_v58 }
 0x371   :  { %1108 = vmatpush.msra.mxu1 %v3712_v6  ;;  %v4137_v6 = vld [vmem:[#allocation8 + $0x78] sm:$0xff] }
 0x372   :  { %1176 = vmatpush.msra.mxu2 %v4036_v50  ;;  %1196 = vmatpush.msrb.mxu3 %v4120_v60 }
 0x373   :  { %1109 = vmatpush.msra.mxu1 %v3723_v9  ;;  %v4142_v9 = vld [vmem:[#allocation8 + $0x60] sm:$0xff] }
 0x374   :  { %1177 = vmatpush.msra.mxu2 %v4041_v51  ;;  %1197 = vmatpush.msrb.mxu3 %v4125_v63 }
 0x375   :  { %1110 = vmatpush.msra.mxu1 %v3729_v12  ;;  %v5235_v12 = vld [vmem:[#allocation42_spill] sm:$0xff] }
 0x376   :  { %1178 = vmatpush.msra.mxu2 %v4046_v55  ;;  %1198 = vmatpush.msrb.mxu3 %v3704_v2  ;;  %v4147_v2 = vld [vmem:[#allocation8 + $0x48] sm:$0xff] }
 0x377   :  { %1111 = vmatpush.msra.mxu1 %v3740_v16 }
 0x378   :  { %1179 = vmatpush.msra.mxu2 %v4132_v3  ;;  %1199 = vmatpush.msrb.mxu3 %v3708_v4  ;;  %v4152_v4 = vld [vmem:[#allocation8 + $0x30] sm:$0xff] }
 0x379   :  { %1112 = vmatpush.msra.mxu1 %v3746_v19 }
 0x37a   :  { %1180 = vmatpush.msra.mxu2 %v4137_v6  ;;  %1200 = vmatpush.msrb.mxu3 %v3721_v8  ;;  %v4157_v8 = vld [vmem:[#allocation8 + $0x18] sm:$0xff] }
 0x37b   :  { %1113 = vmatpush.msra.mxu1 %v3748_v20 }
 0x37c   :  { %1181 = vmatpush.msra.mxu2 %v4142_v9  ;;  %1201 = vmatpush.msrb.mxu3 %v3725_v11  ;;  %v4162_v11 = vld [vmem:[#allocation8] sm:$0xff] }
 0x37d   :  { %1114 = vmatpush.msra.mxu1 %v3760_v25  ;;  %v5236_v25 = vld [vmem:[#allocation43_spill] sm:$0xff] }
 0x37e   :  { %1182 = vmatpush.msra.mxu2 %v4147_v2  ;;  %1202 = vmatpush.msrb.mxu3 %v3738_v15  ;;  %v374_v15 = vadd.f32 %v5235_v12, %v5228_v34 }
 0x37f   :  { %1115 = vmatpush.msra.mxu1 %v3762_v27  ;;  %v415_v27 = vadd.f32 %v5236_v25, %v5232_v30 }
 0x380   :  { %1183 = vmatpush.msra.mxu2 %v4152_v4  ;;  %1203 = vmatpush.msrb.mxu3 %v5218_v47 }
 0x381   :  { %1116 = vmatpush.msra.mxu1 %v5219_v52 }
 0x382   :  { %1184 = vmatpush.msra.mxu2 %v4157_v8  ;;  %1204 = vmatpush.msrb.mxu3 %v5221_v61 }
 0x383   :  { %1117 = vmatpush.msra.mxu1 %v5222_v1 }
 0x384   :  { %1185 = vmatpush.msra.mxu2 %v4162_v11  ;;  %1205 = vmatpush.msrb.mxu3 %v5224_v10 }
 0x3e1   :  { %v863_v16 = vpop.f32.mrf.mxu1 }
 0x3e2   :  { %v906_v19 = vadd.f32 %v863_v16, %v374_v15 }
 0x3e4   :  { %v2741_v20 = vmul.f32 -1.442695, %v906_v19 }
 0x3e6   :  { %2851 = vpow2.f32 %v2741_v20 }
 0x3e7   :  { %v883_v47 = vpop.f32.mrf.mxu2 }
 0x3e8   :  { %v926_v52 = vadd.f32 %v883_v47, %v415_v27  ;;  %v903_v30 = vpop.f32.mrf.mxu3 }
 0x3e9   :  { %v946_v18 = vadd.f32 %v3931_v36, %v903_v30 }
 0x3ea   :  { %v2742_v61 = vmul.f32 -1.442695, %v926_v52 }
 0x3ec   :  { %v2852_v1 = vpop.eup %2851  ;;  %2853 = vpow2.f32 %v2742_v61 }
 0x3ed   :  { %v910_v29 = vadd.f32 1.0, %v2852_v1  ;;  %v4190_v1 = vld [vmem:[#allocation8 + $0x130] sm:$0xff] }
 0x3ef   :  { %2855 = vrcp.f32 %v910_v29  ;;  %v922_v31 = vand.u32 2147483648, %v910_v29  ;;  %v920_v26 = vand.u32 2147483647, %v910_v29  ;;  %vm916_vm1 = vweird.f32 %v910_v29 }
 0x3f1   :  { %v923_v57 = vor.u32 1.1754944e-38, %v922_v31  ;;  %vm921_vm3 = vcmp.eq.f32.partialorder %v920_v26, 8.507059e+37 }
 0x3f2   :  { %v2854_v24 = vpop.eup %2853 }
 0x3f3   :  { %v930_v39 = vadd.f32 1.0, %v2854_v24 }
 0x3f5   :  { %v2856_v10 = vpop.eup %2855  ;;  %2857 = vrcp.f32 %v930_v39  ;;  %v942_v7 = vand.u32 2147483648, %v930_v39  ;;  %v940_v0 = vand.u32 2147483647, %v930_v39  ;;  %vm936_vm5 = vweird.f32 %v930_v39 }
 0x3f6   :  { %v912_v46 = vmul.f32 %v2856_v10, %v910_v29  ;;  %vm917_vm0 = vweird.f32 %v2856_v10  ;;  %v5238_v29 = vld [vmem:[#allocation45_spill] sm:$0xff] }
 0x3f7   :  { %vm918_vm2 = vmor %vm916_vm1, %vm917_vm0  ;;  %v943_v19 = vor.u32 1.1754944e-38, %v942_v7  ;;  %vm941_vm7 = vcmp.eq.f32.partialorder %v940_v0, 8.507059e+37 }
 0x3f8   :  { %v913_v34 = vsub.f32 1.0, %v912_v46 }
 0x3fa   :  { %v914_v22 = vmul.f32 %v2856_v10, %v913_v34 }
 0x3fb   :  { %v2858_v35 = vpop.eup %2857 }
 0x3fc   :  { %v932_v40 = vmul.f32 %v2858_v35, %v930_v39  ;;  %v915_v56 = vadd.f32 %v2856_v10, %v914_v22  ;;  %vm937_vm4 = vweird.f32 %v2858_v35  ;;  %v5239_v39 = vld [vmem:[#allocation47_spill] sm:$0xff] }
 0x3fd   :  { %vm938_vm6 = vmor %vm936_vm5, %vm937_vm4 }
 0x3fe   :  { %v933_v59 = vsub.f32 1.0, %v932_v40  ;;  %v919_v62 = vsel %vm918_vm2, %v2856_v10, %v915_v56 }
 0x3ff   :  { %v924_v42 = vsel %vm921_vm3, %v923_v57, %v919_v62 }
 0x400   :  { %v934_v38 = vmul.f32 %v2858_v35, %v933_v59  ;;  %v947_v37 = vmul.f32 %v946_v18, %v924_v42 }
 0x402   :  { %v948_v12 = vadd.f32 %v947_v37, %v456_v17  ;;  %v935_v15 = vadd.f32 %v2858_v35, %v934_v38 }
 0x404   :  { %2859 = vtanh.f32 %v948_v12  ;;  %v939_v16 = vsel %vm938_vm6, %v2858_v35, %v935_v15 }
 0x405   :  { %v944_v20 = vsel %vm941_vm7, %v943_v19, %v939_v16 }
 0x406   :  { %v950_v25 = vsub.f32 1.0, %v944_v20  ;;  %v952_v52 = vmul.f32 %v944_v20, %v4079_v43  ;;  %v4185_v43 = vld [vmem:[#allocation8 + $0x148] sm:$0xff]  ;;  %v5240_v20 = vld [vmem:[#allocation48_spill] sm:$0xff] }
 0x40a   :  { %v2860_v27 = vpop.eup %2859 }
 0x40b   :  { %v951_v47 = vmul.f32 %v2860_v27, %v950_v25 }
 0x40d   :  { %v4174_v61 = vadd.f32 %v952_v52, %v951_v47 }
 0x40f   :  { %970 = vmatmul.f32.vlgmr.msrb.gmra.mxu0 %v4174_v61  ;;  %990 = vmatmul.f32.vlgmr.msrb.gmra.mxu1 %v4174_v61 }
 0x410   :  { %1010 = vmatmul.f32.vlgmr.msrb.gmra.mxu2 %v4174_v61  ;;  %1210 = vmatpush.msrb.mxu0 %v4084_v5 }
 0x411   :  { %1278 = vmatpush.msrb.mxu1 %v4006_v13  ;;  %1298 = vmatpush.msrb.mxu2 %v4088_v33  ;;  %v4195_v13 = vld [vmem:[#allocation8 + $0x118] sm:$0xff]  ;;  %v4219_v33 = vld [vmem:[#allocation8 + $0xa0] sm:$0xff] }
 0x412   :  { %1211 = vmatpush.msrb.mxu0 %v4091_v48 }
 0x413   :  { %1279 = vmatpush.msrb.mxu1 %v4011_v14  ;;  %1299 = vmatpush.msrb.mxu2 %v4095_v44  ;;  %v4200_v14 = vld [vmem:[#allocation8 + $0x100] sm:$0xff]  ;;  %v4223_v44 = vld [vmem:[#allocation8 + $0x88] sm:$0xff] }
 0x414   :  { %1212 = vmatpush.msrb.mxu0 %v4185_v43 }
 0x415   :  { %1280 = vmatpush.msrb.mxu1 %v4016_v28  ;;  %1300 = vmatpush.msrb.mxu2 %v4100_v41  ;;  %v4205_v28 = vld [vmem:[#allocation8 + $0xe8] sm:$0xff]  ;;  %v4227_v41 = vld [vmem:[#allocation8 + $0x70] sm:$0xff] }
 0x416   :  { %1213 = vmatpush.msrb.mxu0 %v4190_v1 }
 0x417   :  { %1281 = vmatpush.msrb.mxu1 %v4021_v53  ;;  %1301 = vmatpush.msrb.mxu2 %v4105_v21  ;;  %v4210_v53 = vld [vmem:[#allocation8 + $0xd0] sm:$0xff]  ;;  %v4231_v21 = vld [vmem:[#allocation8 + $0x58] sm:$0xff] }
 0x418   :  { %1214 = vmatpush.msrb.mxu0 %v4195_v13 }
 0x419   :  { %1282 = vmatpush.msrb.mxu1 %v4026_v45  ;;  %1302 = vmatpush.msrb.mxu2 %v4110_v32  ;;  %v4215_v45 = vld [vmem:[#allocation8 + $0xb8] sm:$0xff]  ;;  %v3022_v32 = vld [vmem:[#allocation8 + $0x50] sm:$0xff] }
 0x41a   :  { %1215 = vmatpush.msrb.mxu0 %v4200_v14 }
 0x41b   :  { %1283 = vmatpush.msrb.mxu1 %v4031_v49  ;;  %1303 = vmatpush.msrb.mxu2 %v4115_v58  ;;  %v3014_v49 = vld [vmem:[#allocation8 + $0xb0] sm:$0xff]  ;;  %v4235_v58 = vld [vmem:[#allocation8 + $0x40] sm:$0xff] }
 0x41c   :  { %1216 = vmatpush.msrb.mxu0 %v4205_v28 }
 0x41d   :  { %1284 = vmatpush.msrb.mxu1 %v4036_v50  ;;  %1304 = vmatpush.msrb.mxu2 %v4120_v60  ;;  %v3016_v50 = vld [vmem:[#allocation8 + $0x98] sm:$0xff] }
 0x41e   :  { %1217 = vmatpush.msrb.mxu0 %v4210_v53  ;;  %v3024_v60 = vld [vmem:[#allocation8 + $0x38] sm:$0xff] }
 0x41f   :  { %1285 = vmatpush.msrb.mxu1 %v4041_v51  ;;  %1305 = vmatpush.msrb.mxu2 %v4125_v63  ;;  %v3018_v51 = vld [vmem:[#allocation8 + $0x80] sm:$0xff]  ;;  %v4239_v63 = vld [vmem:[#allocation8 + $0x28] sm:$0xff] }
 0x420   :  { %1218 = vmatpush.msrb.mxu0 %v4215_v45 }
 0x421   :  { %1286 = vmatpush.msrb.mxu1 %v4046_v55  ;;  %1306 = vmatpush.msrb.mxu2 %v3014_v49  ;;  %v3020_v55 = vld [vmem:[#allocation8 + $0x68] sm:$0xff] }
 0x422   :  { %1219 = vmatpush.msrb.mxu0 %v4219_v33 }
 0x423   :  { %1287 = vmatpush.msrb.mxu1 %v4132_v3  ;;  %1307 = vmatpush.msrb.mxu2 %v3016_v50  ;;  %v3026_v3 = vld [vmem:[#allocation8 + $0x20] sm:$0xff] }
 0x424   :  { %1220 = vmatpush.msrb.mxu0 %v4223_v44 }
 0x425   :  { %1288 = vmatpush.msrb.mxu1 %v4137_v6  ;;  %1308 = vmatpush.msrb.mxu2 %v3018_v51  ;;  %v4243_v6 = vld [vmem:[#allocation8 + $0x10] sm:$0xff] }
 0x426   :  { %1221 = vmatpush.msrb.mxu0 %v4227_v41 }
 0x427   :  { %1289 = vmatpush.msrb.mxu1 %v4142_v9  ;;  %1309 = vmatpush.msrb.mxu2 %v3020_v55  ;;  %v3028_v9 = vld [vmem:[#allocation8 + $0x8] sm:$0xff] }
 0x428   :  { %1222 = vmatpush.msrb.mxu0 %v4231_v21 }
 0x429   :  { %1290 = vmatpush.msrb.mxu1 %v4147_v2  ;;  %1310 = vmatpush.msrb.mxu2 %v3022_v32 }
 0x42a   :  { %1223 = vmatpush.msrb.mxu0 %v4235_v58 }
 0x42b   :  { %1291 = vmatpush.msrb.mxu1 %v4152_v4  ;;  %1311 = vmatpush.msrb.mxu2 %v3024_v60 }
 0x42c   :  { %1224 = vmatpush.msrb.mxu0 %v4239_v63 }
 0x42d   :  { %1292 = vmatpush.msrb.mxu1 %v4157_v8  ;;  %1312 = vmatpush.msrb.mxu2 %v3026_v3 }
 0x42e   :  { %1225 = vmatpush.msrb.mxu0 %v4243_v6 }
 0x42f   :  { %1293 = vmatpush.msrb.mxu1 %v4162_v11  ;;  %1313 = vmatpush.msrb.mxu2 %v3028_v9  ;;  %v1447_v9 = vld [vmem:[#allocation11 + $0x28] sm:$0xff] }
 0x48c   :  { %v971_v2 = vpop.f32.mrf.mxu0  ;;  %v991_v4 = vpop.f32.mrf.mxu1 }
 0x48d   :  { %v1014_v24 = vadd.f32 %v971_v2, %v5238_v29  ;;  %v1034_v10 = vadd.f32 %v991_v4, %v5239_v39  ;;  %v1446_v4 = vld [vmem:[#allocation11 + $0x20] sm:$0xff]  ;;  %v1445_v39 = vld [vmem:[#allocation11 + $0x18] sm:$0xff] }
 0x48f   :  { %v2743_v46 = vmul.f32 -1.442695, %v1014_v24  ;;  %v2744_v34 = vmul.f32 -1.442695, %v1034_v10  ;;  %v1444_v10 = vld [vmem:[#allocation11 + $0x10] sm:$0xff] }
 0x491   :  { %2861 = vpow2.f32 %v2743_v46  ;;  %v1443_v46 = vld [vmem:[#allocation11 + $0x8] sm:$0xff] }
 0x492   :  { %2863 = vpow2.f32 %v2744_v34 }
 0x493   :  { %v1011_v17 = vpop.f32.mrf.mxu2 }
 0x494   :  { %v1054_v7 = vadd.f32 %v3931_v36, %v1011_v17 }
 0x497   :  { %v2862_v8 = vpop.eup %2861 }
 0x498   :  { %v2864_v31 = vpop.eup %2863  ;;  %v1018_v22 = vadd.f32 1.0, %v2862_v8  ;;  %v1442_v8 = vld [vmem:[#allocation11] sm:$0xff] }
 0x499   :  { %v1038_v26 = vadd.f32 1.0, %v2864_v31 }
 0x49a   :  { %2865 = vrcp.f32 %v1018_v22  ;;  %v1030_v59 = vand.u32 2147483648, %v1018_v22  ;;  %v1028_v18 = vand.u32 2147483647, %v1018_v22  ;;  %vm1024_vm9 = vweird.f32 %v1018_v22 }
 0x49b   :  { %2867 = vrcp.f32 %v1038_v26  ;;  %v1050_v16 = vand.u32 2147483648, %v1038_v26  ;;  %vm1044_vm13 = vweird.f32 %v1038_v26  ;;  %v1048_v19 = vand.u32 2147483647, %v1038_v26 }
 0x49c   :  { %v1031_v38 = vor.u32 1.1754944e-38, %v1030_v59  ;;  %vm1029_vm11 = vcmp.eq.f32.partialorder %v1028_v18, 8.507059e+37  ;;  %v4275_v18 = vld [vmem:[#allocation9] ss:$0 sm:$0xff] }
 0x49d   :  { %v1051_v47 = vor.u32 1.1754944e-38, %v1050_v16  ;;  %vm1049_vm15 = vcmp.eq.f32.partialorder %v1048_v19, 8.507059e+37 }
 0x4a0   :  { %v2866_v35 = vpop.eup %2865 }
 0x4a1   :  { %v2868_v11 = vpop.eup %2867  ;;  %v1020_v30 = vmul.f32 %v2866_v35, %v1018_v22  ;;  %vm1025_vm8 = vweird.f32 %v2866_v35 }
 0x4a2   :  { %v1040_v40 = vmul.f32 %v2868_v11, %v1038_v26  ;;  %vm1026_vm10 = vmor %vm1024_vm9, %vm1025_vm8  ;;  %vm1045_vm12 = vweird.f32 %v2868_v11 }
 0x4a3   :  { %v1021_v56 = vsub.f32 1.0, %v1020_v30  ;;  %vm1046_vm14 = vmor %vm1044_vm13, %vm1045_vm12 }
 0x4a4   :  { %v1041_v57 = vsub.f32 1.0, %v1040_v40 }
 0x4a5   :  { %v1022_v62 = vmul.f32 %v2866_v35, %v1021_v56 }
 0x4a6   :  { %v1042_v54 = vmul.f32 %v2868_v11, %v1041_v57 }
 0x4a7   :  { %v1023_v42 = vadd.f32 %v2866_v35, %v1022_v62 }
 0x4a8   :  { %v1043_v12 = vadd.f32 %v2868_v11, %v1042_v54 }
 0x4a9   :  { %v1027_v37 = vsel %vm1026_vm10, %v2866_v35, %v1023_v42 }
 0x4aa   :  { %v1032_v0 = vsel %vm1029_vm11, %v1031_v38, %v1027_v37  ;;  %v1047_v27 = vsel %vm1046_vm14, %v2868_v11, %v1043_v12  ;;  %v5243_v12 = vld [vmem:[#allocation51_spill] sm:$0xff] }
 0x4ab   :  { %v1055_v15 = vmul.f32 %v1054_v7, %v1032_v0  ;;  %v1052_v52 = vsel %vm1049_vm15, %v1051_v47, %v1047_v27 }
 0x4ac   :  { %v1058_v49 = vsub.f32 1.0, %v1052_v52  ;;  %v1060_v36 = vmul.f32 %v1052_v52, %v4174_v61 }
 0x4ad   :  { %v1056_v25 = vadd.f32 %v1055_v15, %v5240_v20 }
 0x4af   :  { %2869 = vtanh.f32 %v1056_v25 }
 0x4b5   :  { %v2870_v50 = vpop.eup %2869 }
 0x4b6   :  { %v1059_v51 = vmul.f32 %v2870_v50, %v1058_v49  ;;  %v1396_v50 = vpop.permute.xlu2 %1395 }
 0x4b8   :  { %v4252_v55 = vadd.f32 %v1060_v36, %v1059_v51  ;;  %v5244_v51 = vld [vmem:[#allocation27_spill] sm:$0xff]  ;;  %v5245_v36 = vmov 1.0  }
 0x4b9   :  { %vm1418_vm8 = vcmp.eq.s32.totalorder %v1396_v50, %v5244_v51  ;;  %v1505_v50 = vld [vmem:[#allocation12 + $0x30] sm:$0xff] }
 0x4ba   :  { %1078 = vmatmul.f32.vlgmr.msra.gmra.mxu3 %v4252_v55  ;;  %1098 = vmatmul.f32.vlgmr.msra.gmra.mxu0 %v4252_v55 }
 0x4bb   :  { %1118 = vmatmul.f32.vlgmr.msra.gmra.mxu1 %v4252_v55  ;;  %1318 = vmatpush.msra.mxu3 %v4084_v5  ;;  %v1457_v5 = vld [vmem:[#allocation11 + $0x78] sm:$0xff] }
 0x4bc   :  { %1458 = vmatpush.msra.mxu0 %v1457_v5  ;;  %v1399_v5 = vpop.permute.xlu0 %1398 }
 0x4bd   :  { %1319 = vmatpush.msra.mxu3 %v4091_v48  ;;  %v1456_v48 = vld [vmem:[#allocation11 + $0x70] sm:$0xff]  ;;  %vm1419_vm9 = vcmp.eq.s32.totalorder %v1399_v5, %v5244_v51  ;;  %v1502_v5 = vld [vmem:[#allocation12 + $0x18] sm:$0xff] }
 0x4be   :  { %1459 = vmatpush.msra.mxu0 %v1456_v48  ;;  %v1402_v48 = vpop.permute.xlu1 %1401 }
 0x4bf   :  { %1320 = vmatpush.msra.mxu3 %v4185_v43  ;;  %v5241_v43 = vld [vmem:[#allocation50_spill] sm:$0xff]  ;;  %vm1420_vm10 = vcmp.eq.s32.totalorder %v1402_v48, %v5244_v51 }
 0x4c0   :  { %v1503_v48 = vld [vmem:[#allocation12 + $0x20] sm:$0xff] }
 0x4c1   :  { %1321 = vmatpush.msra.mxu3 %v4190_v1 }
 0x4c3   :  { %1322 = vmatpush.msra.mxu3 %v4195_v13  ;;  %v1455_v13 = vld [vmem:[#allocation11 + $0x68] sm:$0xff] }
 0x4c4   :  { %1460 = vmatpush.msra.mxu0 %v1455_v13 }
 0x4c5   :  { %1323 = vmatpush.msra.mxu3 %v4200_v14 }
 0x4c7   :  { %1324 = vmatpush.msra.mxu3 %v4205_v28  ;;  %v1454_v28 = vld [vmem:[#allocation11 + $0x60] sm:$0xff] }
 0x4c8   :  { %1461 = vmatpush.msra.mxu0 %v1454_v28  ;;  %v1545_v28 = vld [vmem:[#allocation12 + $0x170] sm:$0xff] }
 0x4c9   :  { %1325 = vmatpush.msra.mxu3 %v4210_v53  ;;  %v1453_v53 = vld [vmem:[#allocation11 + $0x58] sm:$0xff] }
 0x4ca   :  { %1462 = vmatpush.msra.mxu0 %v1453_v53  ;;  %v1546_v53 = vld [vmem:[#allocation12 + $0x178] sm:$0xff] }
 0x4cb   :  { %1326 = vmatpush.msra.mxu3 %v4215_v45  ;;  %v1452_v45 = vld [vmem:[#allocation11 + $0x50] sm:$0xff] }
 0x4cc   :  { %1463 = vmatpush.msra.mxu0 %v1452_v45  ;;  %v1541_v45 = vld [vmem:[#allocation12 + $0x150] sm:$0xff] }
 0x4cd   :  { %1327 = vmatpush.msra.mxu3 %v4219_v33 }
 0x4cf   :  { %1328 = vmatpush.msra.mxu3 %v4223_v44  ;;  %v5242_v44 = vld [vmem:[#allocation49_spill] sm:$0xff] }
 0x4d1   :  { %1329 = vmatpush.msra.mxu3 %v4227_v41 }
 0x4d3   :  { %1330 = vmatpush.msra.mxu3 %v4231_v21  ;;  %v1451_v21 = vld [vmem:[#allocation11 + $0x48] sm:$0xff] }
 0x4d4   :  { %1464 = vmatpush.msra.mxu0 %v1451_v21  ;;  %v1539_v21 = vld [vmem:[#allocation12 + $0x140] sm:$0xff] }
 0x4d5   :  { %1331 = vmatpush.msra.mxu3 %v4235_v58  ;;  %v1450_v58 = vld [vmem:[#allocation11 + $0x40] sm:$0xff] }
 0x4d6   :  { %1465 = vmatpush.msra.mxu0 %v1450_v58  ;;  %v1535_v58 = vld [vmem:[#allocation12 + $0x120] sm:$0xff] }
 0x4d7   :  { %1332 = vmatpush.msra.mxu3 %v4239_v63  ;;  %v1449_v63 = vld [vmem:[#allocation11 + $0x38] sm:$0xff] }
 0x4d8   :  { %1466 = vmatpush.msra.mxu0 %v1449_v63  ;;  %v1537_v63 = vld [vmem:[#allocation12 + $0x130] sm:$0xff] }
 0x4d9   :  { %1333 = vmatpush.msra.mxu3 %v4243_v6  ;;  %v1448_v6 = vld [vmem:[#allocation11 + $0x30] sm:$0xff] }
 0x4da   :  { %1467 = vmatpush.msra.mxu0 %v1448_v6  ;;  %v1533_v6 = vld [vmem:[#allocation12 + $0x110] sm:$0xff] }
 0x4dc   :  { %1468 = vmatpush.msra.mxu0 %v1447_v9  ;;  %v1534_v9 = vld [vmem:[#allocation12 + $0x118] sm:$0xff] }
 0x4de   :  { %1469 = vmatpush.msra.mxu0 %v1446_v4  ;;  %v1530_v4 = vld [vmem:[#allocation12 + $0xf8] sm:$0xff] }
 0x4e0   :  { %1470 = vmatpush.msra.mxu0 %v1445_v39  ;;  %v1531_v39 = vld [vmem:[#allocation12 + $0x100] sm:$0xff] }
 0x4e2   :  { %1471 = vmatpush.msra.mxu0 %v1444_v10  ;;  %v5246_v10 = vld [vmem:[#allocation52_spill] sm:$0xff] }
 0x4e4   :  { %1472 = vmatpush.msra.mxu0 %v1443_v46 }
 0x4e6   :  { %1473 = vmatpush.msra.mxu0 %v1442_v8 }
 0x537   :  { %v1099_v61 = vpop.f32.mrf.mxu0 }
 0x538   :  { %v1142_v1 = vadd.f32 %v1099_v61, %v5241_v43  ;;  %v1119_v57 = vpop.f32.mrf.mxu1  ;;  %v1408_v61 = vpop.permute.xlu0 %1407 }
 0x539   :  { %v1162_v54 = vadd.f32 %v4275_v18, %v1119_v57  ;;  %vm1422_vm12 = vcmp.eq.s32.totalorder %v1408_v61, %v5244_v51  ;;  %v1411_v43 = vpop.permute.xlu1 %1410  ;;  %v1520_v57 = vld [vmem:[#allocation12 + $0xa8] sm:$0xff] }
 0x53a   :  { %v2746_v14 = vmul.f32 -1.442695, %v1142_v1  ;;  %vm1423_vm13 = vcmp.eq.s32.totalorder %v1411_v43, %v5244_v51  ;;  %v1499_v43 = vld [vmem:[#allocation12] sm:$0xff] }
 0x53c   :  { %2871 = vpow2.f32 %v2746_v14  ;;  %v1544_v14 = vld [vmem:[#allocation12 + $0x168] sm:$0xff] }
 0x53d   :  { %v1079_v33 = vpop.f32.mrf.mxu3  ;;  %1555 = vmatpush.msra.mxu1 %v1544_v14 }
 0x53e   :  { %v1122_v41 = vadd.f32 %v1079_v33, %v5242_v44  ;;  %v1542_v33 = vld [vmem:[#allocation12 + $0x158] sm:$0xff]  ;;  %v1543_v44 = vld [vmem:[#allocation12 + $0x160] sm:$0xff] }
 0x53f   :  { %1556 = vmatpush.msra.mxu1 %v1541_v45 }
 0x540   :  { %v2745_v32 = vmul.f32 -1.442695, %v1122_v41  ;;  %v1417_v13 = vpop.permute.xlu0 %1416  ;;  %v1538_v41 = vld [vmem:[#allocation12 + $0x138] sm:$0xff] }
 0x541   :  { %vm1425_vm15 = vcmp.eq.s32.totalorder %v1417_v13, %v5244_v51  ;;  %1557 = vmatpush.msra.mxu1 %v1538_v41  ;;  %v1501_v13 = vld [vmem:[#allocation12 + $0x10] sm:$0xff] }
 0x542   :  { %v2872_v60 = vpop.eup %2871  ;;  %2873 = vpow2.f32 %v2745_v32  ;;  %v1540_v32 = vld [vmem:[#allocation12 + $0x148] sm:$0xff] }
 0x543   :  { %v1146_v3 = vadd.f32 1.0, %v2872_v60  ;;  %v1536_v60 = vld [vmem:[#allocation12 + $0x128] sm:$0xff]  ;;  %1558 = vmatpush.msra.mxu1 %v1535_v58 }
 0x545   :  { %2875 = vrcp.f32 %v1146_v3  ;;  %v1158_v37 = vand.u32 2147483648, %v1146_v3  ;;  %vm1152_vm5 = vweird.f32 %v1146_v3  ;;  %v1156_v0 = vand.u32 2147483647, %v1146_v3 }
 0x547   :  { %v1159_v19 = vor.u32 1.1754944e-38, %v1158_v37  ;;  %vm1157_vm7 = vcmp.eq.f32.partialorder %v1156_v0, 8.507059e+37  ;;  %v1514_v37 = vld [vmem:[#allocation12 + $0x78] sm:$0xff]  ;;  %v1516_v0 = vld [vmem:[#allocation12 + $0x88] sm:$0xff] }
 0x548   :  { %v2874_v2 = vpop.eup %2873 }
 0x549   :  { %v1126_v29 = vadd.f32 1.0, %v2874_v2  ;;  %v1529_v2 = vld [vmem:[#allocation12 + $0xf0] sm:$0xff] }
 0x54b   :  { %2877 = vrcp.f32 %v1126_v29  ;;  %v2876_v24 = vpop.eup %2875  ;;  %v1138_v11 = vand.u32 2147483648, %v1126_v29  ;;  %v1136_v40 = vand.u32 2147483647, %v1126_v29  ;;  %vm1132_vm1 = vweird.f32 %v1126_v29 }
 0x54c   :  { %v1148_v34 = vmul.f32 %v2876_v24, %v1146_v3  ;;  %vm1153_vm4 = vweird.f32 %v2876_v24  ;;  %v1532_v3 = vld [vmem:[#allocation12 + $0x108] sm:$0xff] }
 0x54d   :  { %v1139_v62 = vor.u32 1.1754944e-38, %v1138_v11  ;;  %vm1137_vm3 = vcmp.eq.f32.partialorder %v1136_v40, 8.507059e+37  ;;  %vm1154_vm6 = vmor %vm1152_vm5, %vm1153_vm4  ;;  %1559 = vmatpush.msra.mxu1 %v1532_v3  ;;  %v1528_v11 = vld [vmem:[#allocation12 + $0xe8] sm:$0xff] }
 0x54e   :  { %v1149_v26 = vsub.f32 1.0, %v1148_v34  ;;  %v5247_v34 = vld [vmem:[#allocation53_spill] sm:$0xff]  ;;  %v1524_v40 = vld [vmem:[#allocation12 + $0xc8] sm:$0xff] }
 0x54f   :  { %1560 = vmatpush.msra.mxu1 %v1529_v2 }
 0x550   :  { %v1150_v56 = vmul.f32 %v2876_v24, %v1149_v26  ;;  %v1526_v26 = vld [vmem:[#allocation12 + $0xd8] sm:$0xff] }
 0x551   :  { %v2878_v31 = vpop.eup %2877  ;;  %1561 = vmatpush.msra.mxu1 %v1526_v26 }
 0x552   :  { %v1128_v22 = vmul.f32 %v2878_v31, %v1126_v29  ;;  %vm1133_vm0 = vweird.f32 %v2878_v31  ;;  %v1151_v38 = vadd.f32 %v2876_v24, %v1150_v56  ;;  %v1525_v56 = vld [vmem:[#allocation12 + $0xd0] sm:$0xff] }
 0x553   :  { %vm1134_vm2 = vmor %vm1132_vm1, %vm1133_vm0 }
 0x554   :  { %v1129_v35 = vsub.f32 1.0, %v1128_v22  ;;  %v1155_v16 = vsel %vm1154_vm6, %v2876_v24, %v1151_v38 }
 0x555   :  { %v1160_v20 = vsel %vm1157_vm7, %v1159_v19, %v1155_v16  ;;  %v1511_v16 = vld [vmem:[#allocation12 + $0x60] sm:$0xff]  ;;  %v1512_v19 = vld [vmem:[#allocation12 + $0x68] sm:$0xff] }
 0x556   :  { %v1130_v30 = vmul.f32 %v2878_v31, %v1129_v35  ;;  %v1166_v25 = vsub.f32 1.0, %v1160_v20  ;;  %v1168_v52 = vmul.f32 %v1160_v20, %v4252_v55  ;;  %v1405_v55 = vpop.permute.xlu2 %1404  ;;  %v1527_v35 = vld [vmem:[#allocation12 + $0xe0] sm:$0xff]  ;;  %v1513_v20 = vld [vmem:[#allocation12 + $0x70] sm:$0xff] }
 0x557   :  { %vm1421_vm11 = vcmp.eq.s32.totalorder %v1405_v55, %v5244_v51  ;;  %v1504_v55 = vld [vmem:[#allocation12 + $0x28] sm:$0xff] }
 0x558   :  { %v1131_v59 = vadd.f32 %v2878_v31, %v1130_v30  ;;  %v1523_v30 = vld [vmem:[#allocation12 + $0xc0] sm:$0xff] }
 0x559   :  { %1562 = vmatpush.msra.mxu1 %v1523_v30 }
 0x55a   :  { %v1135_v17 = vsel %vm1134_vm2, %v2878_v31, %v1131_v59  ;;  %v1521_v59 = vld [vmem:[#allocation12 + $0xb0] sm:$0xff] }
 0x55b   :  { %v1140_v42 = vsel %vm1137_vm3, %v1139_v62, %v1135_v17  ;;  %v1522_v62 = vld [vmem:[#allocation12 + $0xb8] sm:$0xff]  ;;  %1563 = vmatpush.msra.mxu1 %v1520_v57 }
 0x55c   :  { %v1163_v7 = vmul.f32 %v1162_v54, %v1140_v42  ;;  %v1517_v54 = vld [vmem:[#allocation12 + $0x90] sm:$0xff]  ;;  %v1518_v17 = vld [vmem:[#allocation12 + $0x98] sm:$0xff]  ;;  %v1519_v42 = vld [vmem:[#allocation12 + $0xa0] sm:$0xff] }
 0x55d   :  { %1564 = vmatpush.msra.mxu1 %v1517_v54  ;;  %v4316_v54 = vld [vmem:[#allocation14 + $0x170] sm:$0xff] }
 0x55e   :  { %v1164_v15 = vadd.f32 %v1163_v7, %v5243_v12  ;;  %v1414_v1 = vpop.permute.xlu2 %1413  ;;  %v1515_v7 = vld [vmem:[#allocation12 + $0x80] sm:$0xff] }
 0x55f   :  { %vm1424_vm14 = vcmp.eq.s32.totalorder %v1414_v1, %v5244_v51  ;;  %1565 = vmatpush.msra.mxu1 %v1514_v37  ;;  %v1506_v51 = vld [vmem:[#allocation12 + $0x38] sm:$0xff]  ;;  %v1500_v1 = vld [vmem:[#allocation12 + $0x8] sm:$0xff]  ;;  %v4330_v37 = vld [vmem:[#allocation14 + $0x120] sm:$0xff] }
 0x560   :  { %2879 = vtanh.f32 %v1164_v15 }
 0x561   :  { %1566 = vmatpush.msra.mxu1 %v1511_v16  ;;  %v4340_v16 = vld [vmem:[#allocation14 + $0xf0] sm:$0xff] }
 0x566   :  { %v2880_v27 = vpop.eup %2879 }
 0x567   :  { %v1167_v47 = vmul.f32 %v2880_v27, %v1166_v25  ;;  %v1508_v27 = vld [vmem:[#allocation12 + $0x48] sm:$0xff] }
 0x568   :  { %1567 = vmatpush.msra.mxu1 %v1508_v27  ;;  %v4353_v27 = vld [vmem:[#allocation14 + $0x148] sm:$0xff] }
 0x569   :  { %v4280_v49 = vadd.f32 %v1168_v52, %v1167_v47  ;;  %v1509_v47 = vld [vmem:[#allocation12 + $0x50] sm:$0xff]  ;;  %v1510_v52 = vld [vmem:[#allocation12 + $0x58] sm:$0xff] }
 0x56a   :  { %1568 = vmatpush.msra.mxu1 %v1505_v50  ;;  %v4361_v50 = vld [vmem:[#allocation14 + $0x118] sm:$0xff] }
 0x56b   :  { %1186 = vmatmul.f32.vlgmr.msra.gmra.mxu2 %v4280_v49  ;;  %1206 = vmatmul.f32.vlgmr.msrb.gmra.mxu3 %v4280_v49 }
 0x56c   :  { %1226 = vmatmul.f32.vlgmr.msrb.gmra.mxu0 %v4280_v49  ;;  %1596 = vmatpush.msra.mxu2 %v1545_v28 }
 0x56d   :  { %1637 = vmatpush.msrb.mxu3 %v1546_v53  ;;  %1569 = vmatpush.msra.mxu1 %v1502_v5  ;;  %v4371_v5 = vld [vmem:[#allocation14 + $0xd8] sm:$0xff] }
 0x56e   :  { %1597 = vmatpush.msra.mxu2 %v1542_v33 }
 0x56f   :  { %1638 = vmatpush.msrb.mxu3 %v1543_v44  ;;  %1570 = vmatpush.msra.mxu1 %v1499_v43  ;;  %v4381_v43 = vld [vmem:[#allocation14 + $0xc8] sm:$0xff] }
 0x570   :  { %1598 = vmatpush.msra.mxu2 %v1539_v21 }
 0x571   :  { %1639 = vmatpush.msrb.mxu3 %v1540_v32 }
 0x572   :  { %1599 = vmatpush.msra.mxu2 %v1536_v60 }
 0x573   :  { %1640 = vmatpush.msrb.mxu3 %v1537_v63 }
 0x574   :  { %2759 = vmatmul.msk.f32.vlgmr.msra.gmra.mxu0 %vm1418_vm8, %v5245_v36  ;;  %1600 = vmatpush.msra.mxu2 %v1533_v6 }
 0x575   :  { %1641 = vmatpush.msrb.mxu3 %v1534_v9 }
 0x576   :  { %1601 = vmatpush.msra.mxu2 %v1530_v4 }
 0x577   :  { %1642 = vmatpush.msrb.mxu3 %v1531_v39  ;;  %v5248_v39 = vld [vmem:[#allocation54_spill] sm:$0xff] }
 0x578   :  { %1602 = vmatpush.msra.mxu2 %v1527_v35 }
 0x579   :  { %1643 = vmatpush.msrb.mxu3 %v1528_v11 }
 0x57a   :  { %1603 = vmatpush.msra.mxu2 %v1524_v40 }
 0x57b   :  { %1644 = vmatpush.msrb.mxu3 %v1525_v56 }
 0x57c   :  { %2760 = vmatmul.msk.f32.gmra.mxu0 %vm1419_vm9, %v5245_v36  ;;  %1604 = vmatpush.msra.mxu2 %v1521_v59  ;;  %v4311_v59 = vld [vmem:[#allocation14 + $0x168] sm:$0xff] }
 0x57d   :  { %1645 = vmatpush.msrb.mxu3 %v1522_v62  ;;  %v4313_v62 = vld [vmem:[#allocation14 + $0x150] sm:$0xff]  ;;  %1727 = vmatpush.msrb.mxu0 %v4311_v59 }
 0x57e   :  { %1605 = vmatpush.msra.mxu2 %v1518_v17  ;;  %5249 = vst [vmem:[#allocation33_spill] sm:$0xff] %v4313_v62  ;;  %v4318_v17 = vld [vmem:[#allocation14 + $0x158] sm:$0xff] }
 0x57f   :  { %1646 = vmatpush.msrb.mxu3 %v1519_v42  ;;  %5250 = vst [vmem:[#allocation28_spill] sm:$0xff] %v4318_v17  ;;  %v4321_v42 = vld [vmem:[#allocation14 + $0x138] sm:$0xff]  ;;  %1728 = vmatpush.msrb.mxu0 %v4313_v62 }
 0x580   :  { %1606 = vmatpush.msra.mxu2 %v1515_v7  ;;  %5251 = vst [vmem:[#allocation31_spill] sm:$0xff] %v4321_v42  ;;  %v4334_v7 = vld [vmem:[#allocation14 + $0x108] sm:$0xff] }
 0x581   :  { %1647 = vmatpush.msrb.mxu3 %v1516_v0  ;;  %1729 = vmatpush.msrb.mxu0 %v4321_v42  ;;  %5252 = vst [vmem:[#allocation34_spill] sm:$0xff] %v4334_v7 }
 0x582   :  { %1607 = vmatpush.msra.mxu2 %v1512_v19  ;;  %v4342_v19 = vld [vmem:[#allocation14 + $0x128] sm:$0xff] }
 0x583   :  { %1648 = vmatpush.msrb.mxu3 %v1513_v20  ;;  %1730 = vmatpush.msrb.mxu0 %v4330_v37  ;;  %v4344_v20 = vld [vmem:[#allocation14 + $0x178] sm:$0xff] }
 0x584   :  { %2761 = vmatmul.msk.f32.gmra.mxu0 %vm1420_vm10, %v5245_v36  ;;  %1608 = vmatpush.msra.mxu2 %v1509_v47  ;;  %v4356_v47 = vld [vmem:[#allocation14 + $0x130] sm:$0xff] }
 0x585   :  { %1649 = vmatpush.msrb.mxu3 %v1510_v52  ;;  %1731 = vmatpush.msrb.mxu0 %v4334_v7  ;;  %v4359_v52 = vld [vmem:[#allocation14 + $0x110] sm:$0xff] }
 0x586   :  { %1609 = vmatpush.msra.mxu2 %v1506_v51  ;;  %5253 = vst [vmem:[#allocation29_spill] sm:$0xff] %v4359_v52  ;;  %v4365_v51 = vld [vmem:[#allocation14 + $0xf8] sm:$0xff] }
 0x587   :  { %1732 = vmatpush.msrb.mxu0 %v4340_v16 }
 0x588   :  { %1610 = vmatpush.msra.mxu2 %v1503_v48  ;;  %v4373_v48 = vld [vmem:[#allocation14 + $0xe0] sm:$0xff] }
 0x589   :  { %1733 = vmatpush.msrb.mxu0 %v4371_v5 }
 0x58a   :  { %1611 = vmatpush.msra.mxu2 %v1500_v1  ;;  %v4384_v1 = vld [vmem:[#allocation14 + $0xd0] sm:$0xff] }
 0x58c   :  { %2762 = vmatmul.msk.f32.gmra.mxu0 %vm1421_vm11, %v5245_v36 }
 0x594   :  { %2763 = vmatmul.msk.f32.gmra.mxu0 %vm1422_vm12, %v5245_v36 }
 0x59c   :  { %2764 = vmatmul.msk.f32.gmra.mxu0 %vm1423_vm13, %v5245_v36 }
 0x5a4   :  { %2765 = vmatmul.msk.f32.gmra.mxu0 %vm1424_vm14, %v5245_v36 }
 0x5ac   :  { %2766 = vmatmul.msk.f32.gmra.mxu0 %vm1425_vm15, %v5245_v36  ;;  %v1507_v36 = vld [vmem:[#allocation12 + $0x40] sm:$0xff] }
 0x5ad   :  { %1650 = vmatpush.msrb.mxu3 %v1507_v36  ;;  %v4367_v36 = vld [vmem:[#allocation14 + $0x100] sm:$0xff] }
 0x5ae   :  { %5254 = vst [vmem:[#allocation32_spill] sm:$0xff] %v4367_v36 }
 0x5af   :  { %1651 = vmatpush.msrb.mxu3 %v1504_v55  ;;  %v4375_v55 = vld [vmem:[#allocation14 + $0xe8] sm:$0xff] }
 0x5b1   :  { %1652 = vmatpush.msrb.mxu3 %v1501_v13  ;;  %v4389_v13 = vld [vmem:[#allocation14 + $0xa8] sm:$0xff] }
 0x5e9   :  { %v1227_v32 = vpop.f32.mrf.mxu0 }
 0x5ea   :  { %v1270_v3 = vadd.f32 %v4275_v18, %v1227_v32 }
 0x5ee   :  { %v1187_v29 = vpop.f32.mrf.mxu2  ;;  %v1207_v24 = vpop.f32.mrf.mxu3 }
 0x5ef   :  { %v1230_v46 = vadd.f32 %v1187_v29, %v5246_v10  ;;  %v1250_v8 = vadd.f32 %v1207_v24, %v5247_v34 }
 0x5f1   :  { %v2747_v31 = vmul.f32 -1.442695, %v1230_v46  ;;  %v2748_v22 = vmul.f32 -1.442695, %v1250_v8 }
 0x5f3   :  { %2881 = vpow2.f32 %v2747_v31  ;;  %v1475_v31 = vpop.f32.mrf.mxu0 }
 0x5f4   :  { %2883 = vpow2.f32 %v2748_v22 }
 0x5f9   :  { %v2882_v38 = vpop.eup %2881 }
 0x5fa   :  { %v2884_v12 = vpop.eup %2883  ;;  %v1234_v15 = vadd.f32 1.0, %v2882_v38  ;;  %v4325_v38 = vld [vmem:[#allocation14 + $0x140] sm:$0xff] }
 0x5fb   :  { %v1254_v25 = vadd.f32 1.0, %v2884_v12  ;;  %v1478_v40 = vpop.f32.mrf.mxu0 }
 0x5fc   :  { %2885 = vrcp.f32 %v1234_v15  ;;  %v1246_v33 = vand.u32 2147483648, %v1234_v15  ;;  %v1244_v21 = vand.u32 2147483647, %v1234_v15  ;;  %vm1240_vm1 = vweird.f32 %v1234_v15 }
 0x5fd   :  { %2887 = vrcp.f32 %v1254_v25  ;;  %v1266_v4 = vand.u32 2147483648, %v1254_v25  ;;  %vm1260_vm5 = vweird.f32 %v1254_v25  ;;  %v1264_v24 = vand.u32 2147483647, %v1254_v25 }
 0x5fe   :  { %v1247_v63 = vor.u32 1.1754944e-38, %v1246_v33  ;;  %vm1245_vm3 = vcmp.eq.f32.partialorder %v1244_v21, 8.507059e+37  ;;  %v4405_v21 = vld [vmem:[#allocation14 + $0xa0] sm:$0xff] }
 0x5ff   :  { %v1267_v34 = vor.u32 1.1754944e-38, %v1266_v4  ;;  %vm1265_vm7 = vcmp.eq.f32.partialorder %v1264_v24, 8.507059e+37 }
 0x602   :  { %v2886_v61 = vpop.eup %2885 }
 0x603   :  { %v2888_v14 = vpop.eup %2887  ;;  %v1236_v28 = vmul.f32 %v2886_v61, %v1234_v15  ;;  %vm1241_vm0 = vweird.f32 %v2886_v61  ;;  %v1481_v56 = vpop.f32.mrf.mxu0 }
 0x604   :  { %v1256_v53 = vmul.f32 %v2888_v14, %v1254_v25  ;;  %vm1242_vm2 = vmor %vm1240_vm1, %vm1241_vm0  ;;  %vm1261_vm4 = vweird.f32 %v2888_v14  ;;  %v4350_v25 = vld [vmem:[#allocation14 + $0x160] sm:$0xff] }
 0x605   :  { %v1237_v45 = vsub.f32 1.0, %v1236_v28  ;;  %vm1262_vm6 = vmor %vm1260_vm5, %vm1261_vm4  ;;  %v4394_v28 = vld [vmem:[#allocation14 + $0xb8] sm:$0xff] }
 0x606   :  { %v1257_v44 = vsub.f32 1.0, %v1256_v53 }
 0x607   :  { %v1238_v41 = vmul.f32 %v2886_v61, %v1237_v45  ;;  %v5255_v45 = vld [vmem:[#allocation55_spill] sm:$0xff] }
 0x608   :  { %v1258_v58 = vmul.f32 %v2888_v14, %v1257_v44  ;;  %v4400_v44 = vld [vmem:[#allocation14 + $0x90] sm:$0xff] }
 0x609   :  { %v1239_v60 = vadd.f32 %v2886_v61, %v1238_v41  ;;  %v4402_v41 = vld [vmem:[#allocation14 + $0x98] sm:$0xff] }
 0x60a   :  { %v1259_v2 = vadd.f32 %v2888_v14, %v1258_v58  ;;  %v4410_v58 = vld [vmem:[#allocation14 + $0x78] sm:$0xff] }
 0x60b   :  { %v1243_v6 = vsel %vm1242_vm2, %v2886_v61, %v1239_v60  ;;  %v1484_v57 = vpop.f32.mrf.mxu0  ;;  %v4379_v61 = vld [vmem:[#allocation14 + $0xc0] sm:$0xff] }
 0x60c   :  { %v1248_v9 = vsel %vm1245_vm3, %v1247_v63, %v1243_v6  ;;  %v1263_v46 = vsel %vm1262_vm6, %v2888_v14, %v1259_v2  ;;  %1734 = vmatpush.msrb.mxu0 %v4379_v61  ;;  %v4391_v14 = vld [vmem:[#allocation14 + $0xb0] sm:$0xff]  ;;  %v4412_v60 = vld [vmem:[#allocation14 + $0x60] sm:$0xff]  ;;  %v4421_v6 = vld [vmem:[#allocation14 + $0x48] sm:$0xff] }
 0x60d   :  { %v1271_v29 = vmul.f32 %v1270_v3, %v1248_v9  ;;  %v1268_v8 = vsel %vm1265_vm7, %v1267_v34, %v1263_v46  ;;  %v4417_v63 = vld [vmem:[#allocation14 + $0x80] sm:$0xff]  ;;  %v4419_v3 = vld [vmem:[#allocation14 + $0x68] sm:$0xff]  ;;  %v4426_v2 = vld [vmem:[#allocation14 + $0x70] sm:$0xff] }
 0x60e   :  { %v1274_v22 = vsub.f32 1.0, %v1268_v8  ;;  %v1276_v11 = vmul.f32 %v1268_v8, %v4280_v49  ;;  %1735 = vmatpush.msrb.mxu0 %v4389_v13  ;;  %v4424_v9 = vld [vmem:[#allocation14 + $0x88] sm:$0xff]  ;;  %v4437_v46 = vld [vmem:[#allocation14 + $0x50] sm:$0xff]  ;;  %v4439_v34 = vld [vmem:[#allocation14 + $0x58] sm:$0xff] }
 0x60f   :  { %v1272_v10 = vadd.f32 %v1271_v29, %v5248_v39  ;;  %v5256_v29 = vld [vmem:[#allocation56_spill] sm:$0xff] }
 0x610   :  { %1736 = vmatpush.msrb.mxu0 %v4400_v44 }
 0x611   :  { %2889 = vtanh.f32 %v1272_v10  ;;  %v4434_v10 = vld [vmem:[#allocation14 + $0x30] sm:$0xff] }
 0x612   :  { %1737 = vmatpush.msrb.mxu0 %v4410_v58  ;;  %5257 = vst [vmem:[#allocation36_spill] sm:$0xff] %v4434_v10 }
 0x613   :  { %v1487_v49 = vpop.f32.mrf.mxu0 }
 0x614   :  { %1738 = vmatpush.msrb.mxu0 %v4412_v60 }
 0x616   :  { %1739 = vmatpush.msrb.mxu0 %v4421_v6 }
 0x617   :  { %v2890_v26 = vpop.eup %2889 }
 0x618   :  { %v1275_v35 = vmul.f32 %v2890_v26, %v1274_v22  ;;  %v4446_v22 = vld [vmem:[#allocation14 + $0x18] sm:$0xff]  ;;  %1740 = vmatpush.msrb.mxu0 %v4434_v10 }
 0x619   :  { %5259 = vst [vmem:[#allocation35_spill] sm:$0xff] %v4446_v22  ;;  %v4449_v26 = vld [vmem:[#allocation14 + $0x38] sm:$0xff] }
 0x61a   :  { %v4306_v30 = vadd.f32 %v1276_v11, %v1275_v35  ;;  %5260 = vst [vmem:[#allocation37_spill] sm:$0xff] %v4449_v26  ;;  %v4451_v35 = vld [vmem:[#allocation14 + $0x40] sm:$0xff]  ;;  %1741 = vmatpush.msrb.mxu0 %v4446_v22 }
 0x61b   :  { %v1490_v0 = vpop.f32.mrf.mxu0  ;;  %v4456_v11 = vld [vmem:[#allocation14 + $0x20] sm:$0xff] }
 0x61c   :  { %1294 = vmatmul.f32.vlgmr.msrb.gmra.mxu1 %v4306_v30  ;;  %1314 = vmatmul.f32.vlgmr.msrb.gmra.mxu2 %v4306_v30  ;;  %5261 = vst [vmem:[#allocation38_spill] sm:$0xff] %v4456_v11 }
 0x61d   :  { %1334 = vmatmul.f32.vlgmr.msra.gmra.mxu3 %v4306_v30  ;;  %1747 = vmatpush.msrb.mxu1 %v4316_v54 }
 0x61e   :  { %1839 = vmatpush.msra.mxu3 %v4311_v59  ;;  %1767 = vmatpush.msrb.mxu2 %v4344_v20 }
 0x61f   :  { %1748 = vmatpush.msrb.mxu1 %v4318_v17 }
 0x620   :  { %1840 = vmatpush.msra.mxu3 %v4313_v62  ;;  %1768 = vmatpush.msrb.mxu2 %v4350_v25 }
 0x621   :  { %1749 = vmatpush.msrb.mxu1 %v4325_v38 }
 0x622   :  { %1841 = vmatpush.msra.mxu3 %v4321_v42  ;;  %1769 = vmatpush.msrb.mxu2 %v4353_v27 }
 0x623   :  { %v1493_v12 = vpop.f32.mrf.mxu0  ;;  %1750 = vmatpush.msrb.mxu1 %v4342_v19 }
 0x624   :  { %1571 = vmatmul.f32.vlgmr.msra.gmra.mxu1 %v1475_v31  ;;  %1612 = vmatmul.f32.vlgmr.msra.gmra.mxu2 %v1475_v31 }
 0x625   :  { %1653 = vmatmul.f32.vlgmr.msrb.gmra.mxu3 %v1475_v31  ;;  %1770 = vmatpush.msrb.mxu2 %v4356_v47 }
 0x626   :  { %1842 = vmatpush.msra.mxu3 %v4330_v37  ;;  %1751 = vmatpush.msrb.mxu1 %v4359_v52 }
 0x627   :  { %1771 = vmatpush.msrb.mxu2 %v4361_v50 }
 0x628   :  { %1843 = vmatpush.msra.mxu3 %v4334_v7  ;;  %1752 = vmatpush.msrb.mxu1 %v4365_v51 }
 0x629   :  { %1772 = vmatpush.msrb.mxu2 %v4367_v36 }
 0x62a   :  { %1844 = vmatpush.msra.mxu3 %v4340_v16  ;;  %1753 = vmatpush.msrb.mxu1 %v4373_v48 }
 0x62b   :  { %v1496_v15 = vpop.f32.mrf.mxu0  ;;  %1773 = vmatpush.msrb.mxu2 %v4375_v55 }
 0x62c   :  { %1574 = vmatmul.f32.gmra.mxu1 %v1478_v40  ;;  %1615 = vmatmul.f32.gmra.mxu2 %v1478_v40 }
 0x62d   :  { %1656 = vmatmul.f32.gmra.mxu3 %v1478_v40  ;;  %1754 = vmatpush.msrb.mxu1 %v4381_v43 }
 0x62e   :  { %1845 = vmatpush.msra.mxu3 %v4371_v5  ;;  %1774 = vmatpush.msrb.mxu2 %v4384_v1 }
 0x62f   :  { %1755 = vmatpush.msrb.mxu1 %v4391_v14 }
 0x630   :  { %1846 = vmatpush.msra.mxu3 %v4379_v61  ;;  %1775 = vmatpush.msrb.mxu2 %v4394_v28 }
 0x631   :  { %1756 = vmatpush.msrb.mxu1 %v4402_v41 }
 0x632   :  { %1847 = vmatpush.msra.mxu3 %v4389_v13  ;;  %1776 = vmatpush.msrb.mxu2 %v4405_v21 }
 0x633   :  { %1757 = vmatpush.msrb.mxu1 %v4417_v63 }
 0x634   :  { %1577 = vmatmul.f32.gmra.mxu1 %v1481_v56  ;;  %1618 = vmatmul.f32.gmra.mxu2 %v1481_v56 }
 0x635   :  { %1659 = vmatmul.f32.gmra.mxu3 %v1481_v56  ;;  %1777 = vmatpush.msrb.mxu2 %v4424_v9  ;;  %v4459_v56 = vld [vmem:[#allocation14] sm:$0xff] }
 0x636   :  { %1848 = vmatpush.msra.mxu3 %v4400_v44  ;;  %1758 = vmatpush.msrb.mxu1 %v4419_v3  ;;  %5262 = vst [vmem:[#allocation46_spill] sm:$0xff] %v4459_v56 }
 0x637   :  { %1778 = vmatpush.msrb.mxu2 %v4426_v2  ;;  %1742 = vmatpush.msrb.mxu0 %v4459_v56 }
 0x638   :  { %1849 = vmatpush.msra.mxu3 %v4410_v58  ;;  %1759 = vmatpush.msrb.mxu1 %v4437_v46 }
 0x639   :  { %1779 = vmatpush.msrb.mxu2 %v4439_v34  ;;  %1859 = vmatpush.msra.mxu0 %v4316_v54 }
 0x63a   :  { %1850 = vmatpush.msra.mxu3 %v4412_v60  ;;  %1760 = vmatpush.msrb.mxu1 %v4449_v26 }
 0x63b   :  { %1780 = vmatpush.msrb.mxu2 %v4451_v35  ;;  %1860 = vmatpush.msra.mxu0 %v4318_v17 }
 0x63c   :  { %1580 = vmatmul.f32.gmra.mxu1 %v1484_v57  ;;  %1621 = vmatmul.f32.gmra.mxu2 %v1484_v57 }
 0x63d   :  { %1662 = vmatmul.f32.gmra.mxu3 %v1484_v57  ;;  %v4461_v57 = vld [vmem:[#allocation14 + $0x28] sm:$0xff]  ;;  %1761 = vmatpush.msrb.mxu1 %v4456_v11 }
 0x63e   :  { %1851 = vmatpush.msra.mxu3 %v4421_v6  ;;  %5263 = vst [vmem:[#allocation39_spill] sm:$0xff] %v4461_v57  ;;  %1781 = vmatpush.msrb.mxu2 %v4461_v57 }
 0x63f   :  { %1861 = vmatpush.msra.mxu0 %v4325_v38 }
 0x640   :  { %1852 = vmatpush.msra.mxu3 %v4434_v10 }
 0x641   :  { %1862 = vmatpush.msra.mxu0 %v4342_v19 }
 0x642   :  { %1853 = vmatpush.msra.mxu3 %v4446_v22 }
 0x643   :  { %1863 = vmatpush.msra.mxu0 %v4359_v52 }
 0x644   :  { %1583 = vmatmul.f32.gmra.mxu1 %v1487_v49  ;;  %1624 = vmatmul.f32.gmra.mxu2 %v1487_v49 }
 0x645   :  { %1665 = vmatmul.f32.gmra.mxu3 %v1487_v49  ;;  %1864 = vmatpush.msra.mxu0 %v4365_v51 }
 0x646   :  { %1854 = vmatpush.msra.mxu3 %v4459_v56 }
 0x647   :  { %1865 = vmatpush.msra.mxu0 %v4373_v48 }
 0x648   :  { %1968 = vmatpush.msrb.mxu3 %v4316_v54 }
 0x649   :  { %1866 = vmatpush.msra.mxu0 %v4381_v43 }
 0x64a   :  { %1969 = vmatpush.msrb.mxu3 %v4318_v17 }
 0x64b   :  { %1867 = vmatpush.msra.mxu0 %v4391_v14 }
 0x64c   :  { %1586 = vmatmul.f32.gmra.mxu1 %v1490_v0  ;;  %1627 = vmatmul.f32.gmra.mxu2 %v1490_v0 }
 0x64d   :  { %1668 = vmatmul.f32.gmra.mxu3 %v1490_v0  ;;  %v1547_v0 = vld [vmem:[%s5114_s11] sm:$0x7]  ;;  %1868 = vmatpush.msra.mxu0 %v4402_v41 }
 0x64e   :  { %1970 = vmatpush.msrb.mxu3 %v4325_v38 }
 0x64f   :  { %1869 = vmatpush.msra.mxu0 %v4417_v63 }
 0x650   :  { %1971 = vmatpush.msrb.mxu3 %v4342_v19 }
 0x651   :  { %1870 = vmatpush.msra.mxu0 %v4419_v3 }
 0x652   :  { %1972 = vmatpush.msrb.mxu3 %v4359_v52 }
 0x653   :  { %1871 = vmatpush.msra.mxu0 %v4437_v46 }
 0x654   :  { %1589 = vmatmul.f32.gmra.mxu1 %v1493_v12  ;;  %1630 = vmatmul.f32.gmra.mxu2 %v1493_v12 }
 0x655   :  { %1671 = vmatmul.f32.gmra.mxu3 %v1493_v12  ;;  %v4471_v12 = vld [vmem:[#allocation14 + $0x8] sm:$0xff]  ;;  %1872 = vmatpush.msra.mxu0 %v4449_v26 }
 0x656   :  { %5264 = vst [vmem:[#allocation40_spill] sm:$0xff] %v4471_v12  ;;  %1762 = vmatpush.msrb.mxu1 %v4471_v12  ;;  %1973 = vmatpush.msrb.mxu3 %v4365_v51 }
 0x657   :  { %1873 = vmatpush.msra.mxu0 %v4456_v11 }
 0x658   :  { %1879 = vmatpush.msra.mxu1 %v4344_v20  ;;  %1974 = vmatpush.msrb.mxu3 %v4373_v48 }
 0x659   :  { %1874 = vmatpush.msra.mxu0 %v4471_v12 }
 0x65a   :  { %1880 = vmatpush.msra.mxu1 %v4350_v25  ;;  %1975 = vmatpush.msrb.mxu3 %v4381_v43 }
 0x65c   :  { %1592 = vmatmul.f32.gmra.mxu1 %v1496_v15  ;;  %1633 = vmatmul.f32.gmra.mxu2 %v1496_v15 }
 0x65d   :  { %1674 = vmatmul.f32.gmra.mxu3 %v1496_v15  ;;  %v4474_v15 = vld [vmem:[#allocation14 + $0x10] sm:$0xff]  ;;  %1881 = vmatpush.msra.mxu1 %v4353_v27 }
 0x65e   :  { %5265 = vst [vmem:[#allocation42_spill] sm:$0xff] %v4474_v15  ;;  %1782 = vmatpush.msrb.mxu2 %v4474_v15  ;;  %1976 = vmatpush.msrb.mxu3 %v4391_v14 }
 0x65f   :  { %1882 = vmatpush.msra.mxu1 %v4356_v47 }
 0x660   :  { %1948 = vmatpush.msra.mxu2 %v4311_v59  ;;  %1977 = vmatpush.msrb.mxu3 %v4402_v41 }
 0x661   :  { %1883 = vmatpush.msra.mxu1 %v4361_v50 }
 0x662   :  { %1949 = vmatpush.msra.mxu2 %v4313_v62  ;;  %1978 = vmatpush.msrb.mxu3 %v4417_v63 }
 0x663   :  { %1884 = vmatpush.msra.mxu1 %v4367_v36 }
 0x664   :  { %1950 = vmatpush.msra.mxu2 %v4321_v42  ;;  %1979 = vmatpush.msrb.mxu3 %v4419_v3 }
 0x665   :  { %1885 = vmatpush.msra.mxu1 %v4375_v55 }
 0x666   :  { %1951 = vmatpush.msra.mxu2 %v4330_v37  ;;  %1980 = vmatpush.msrb.mxu3 %v4437_v46 }
 0x667   :  { %1886 = vmatpush.msra.mxu1 %v4384_v1 }
 0x668   :  { %1952 = vmatpush.msra.mxu2 %v4334_v7  ;;  %1981 = vmatpush.msrb.mxu3 %v4449_v26 }
 0x669   :  { %1887 = vmatpush.msra.mxu1 %v4394_v28 }
 0x66a   :  { %1953 = vmatpush.msra.mxu2 %v4340_v16  ;;  %1982 = vmatpush.msrb.mxu3 %v4456_v11 }
 0x66b   :  { %1888 = vmatpush.msra.mxu1 %v4405_v21 }
 0x66c   :  { %1954 = vmatpush.msra.mxu2 %v4371_v5  ;;  %1983 = vmatpush.msrb.mxu3 %v4471_v12 }
 0x66d   :  { %1889 = vmatpush.msra.mxu1 %v4424_v9 }
 0x66e   :  { %1955 = vmatpush.msra.mxu2 %v4379_v61 }
 0x66f   :  { %1890 = vmatpush.msra.mxu1 %v4426_v2 }
 0x670   :  { %1956 = vmatpush.msra.mxu2 %v4389_v13 }
 0x671   :  { %1891 = vmatpush.msra.mxu1 %v4439_v34 }
 0x672   :  { %1957 = vmatpush.msra.mxu2 %v4400_v44 }
 0x673   :  { %1892 = vmatpush.msra.mxu1 %v4451_v35 }
 0x674   :  { %1958 = vmatpush.msra.mxu2 %v4410_v58 }
 0x675   :  { %1893 = vmatpush.msra.mxu1 %v4461_v57 }
 0x676   :  { %1959 = vmatpush.msra.mxu2 %v4412_v60 }
 0x677   :  { %1894 = vmatpush.msra.mxu1 %v4474_v15 }
 0x678   :  { %1960 = vmatpush.msra.mxu2 %v4421_v6 }
 0x67a   :  { %1961 = vmatpush.msra.mxu2 %v4434_v10 }
 0x67c   :  { %1962 = vmatpush.msra.mxu2 %v4446_v22 }
 0x67e   :  { %1963 = vmatpush.msra.mxu2 %v4459_v56 }
 0x699   :  { %v1295_v53 = vpop.f32.mrf.mxu1 }
 0x69a   :  { %v1338_v33 = vadd.f32 %v1295_v53, %v5255_v45  ;;  %v4482_v45 = vperm.slane %v1547_v0, 0 }
 0x69c   :  { %v2749_v32 = vmul.f32 -1.442695, %v1338_v33  ;;  %5267 = vst [vmem:[#allocation44_spill] sm:$0xff] %v4482_v45 }
 0x69e   :  { %2891 = vpow2.f32 %v2749_v32 }
 0x69f   :  { %v1315_v4 = vpop.f32.mrf.mxu2 }
 0x6a0   :  { %v1358_v24 = vadd.f32 %v1315_v4, %v5256_v29  ;;  %v4432_v39 = vpop.f32.mrf.mxu3 }
 0x6a1   :  { %v4442_v8 = vpop.f32.mrf.mxu1  ;;  %v1378_v7 = vadd.f32 %v4275_v18, %v4432_v39 }
 0x6a2   :  { %5258 = vst [vmem:[#allocation41_spill] sm:$0xff] %v4442_v8  ;;  %v2750_v31 = vmul.f32 -1.442695, %v1358_v24 }
 0x6a4   :  { %v2892_v40 = vpop.eup %2891  ;;  %2893 = vpow2.f32 %v2750_v31 }
 0x6a5   :  { %v4464_v49 = vadd.f32 1.0, %v2892_v40 }
 0x6a7   :  { %2895 = vrcp.f32 %v4464_v49  ;;  %v4478_v53 = vpop.f32.mrf.mxu2  ;;  %v1354_v62 = vand.u32 2147483648, %v4464_v49  ;;  %vm1348_vm9 = vweird.f32 %v4464_v49 }
 0x6a8   :  { %5266 = vst [vmem:[#allocation43_spill] sm:$0xff] %v4478_v53  ;;  %v4484_v33 = vpop.f32.mrf.mxu3 }
 0x6a9   :  { %5268 = vst [vmem:[#allocation45_spill] sm:$0xff] %v4484_v33  ;;  %v1575_v32 = vpop.f32.mrf.mxu1 }
 0x6aa   :  { %v2894_v4 = vpop.eup %2893  ;;  %v4491_v29 = vadd.f32 %v1575_v32, %v4482_v45  ;;  %v4505_v32 = vperm.slane %v1547_v0, 1 }
 0x6ab   :  { %v4495_v24 = vadd.f32 1.0, %v2894_v4  ;;  %v4509_v4 = vperm.slane %v1547_v0, 2 }
 0x6ac   :  { %5269 = vst [vmem:[#allocation47_spill] sm:$0xff] %v4491_v29 }
 0x6ad   :  { %v2896_v31 = vpop.eup %2895  ;;  %2897 = vrcp.f32 %v4495_v24  ;;  %5270 = vst [vmem:[#allocation48_spill] sm:$0xff] %v4505_v32  ;;  %vm1368_vm13 = vweird.f32 %v4495_v24 }
 0x6ae   :  { %v1344_v40 = vmul.f32 %v2896_v31, %v4464_v49  ;;  %5271 = vst [vmem:[#allocation50_spill] sm:$0xff] %v4509_v4  ;;  %vm1349_vm8 = vweird.f32 %v2896_v31 }
 0x6af   :  { %v1616_v29 = vpop.f32.mrf.mxu2  ;;  %vm1350_vm10 = vmor %vm1348_vm9, %vm1349_vm8 }
 0x6b0   :  { %v1345_v33 = vsub.f32 1.0, %v1344_v40  ;;  %v4514_v53 = vadd.f32 %v1616_v29, %v4505_v32  ;;  %v1657_v8 = vpop.f32.mrf.mxu3  ;;  %v1352_v29 = vand.u32 2147483647, %v4464_v49 }
 0x6b1   :  { %v4520_v17 = vadd.f32 %v1657_v8, %v4509_v4  ;;  %v1578_v0 = vpop.f32.mrf.mxu1 }
 0x6b2   :  { %5272 = vst [vmem:[#allocation49_spill] sm:$0xff] %v4514_v53  ;;  %v1346_v42 = vmul.f32 %v2896_v31, %v1345_v33  ;;  %v4526_v40 = vadd.f32 %v1578_v0, %v4482_v45  ;;  %v1355_v33 = vor.u32 1.1754944e-38, %v1354_v62  ;;  %vm1353_vm11 = vcmp.eq.f32.partialorder %v1352_v29, 8.507059e+37 }
 0x6b3   :  { %5273 = vst [vmem:[#allocation51_spill] sm:$0xff] %v4520_v17  ;;  %v2898_v53 = vpop.eup %2897  ;;  %v1374_v62 = vand.u32 2147483648, %v4495_v24 }
 0x6b4   :  { %5274 = vst [vmem:[#allocation27_spill] sm:$0xff] %v4526_v40  ;;  %v1364_v8 = vmul.f32 %v2898_v53, %v4495_v24  ;;  %v1347_v17 = vadd.f32 %v2896_v31, %v1346_v42  ;;  %v5275_v42 = vld [vmem:[#allocation30_spill] sm:$0xff]  ;;  %vm1369_vm12 = vweird.f32 %v2898_v53 }
 0x6b5   :  { %v468_v49 = vadd.f32 %v5275_v42, %v3898_v23  ;;  %vm1370_vm14 = vmor %vm1368_vm13, %vm1369_vm12 }
 0x6b6   :  { %v1365_v0 = vsub.f32 1.0, %v1364_v8  ;;  %v1351_v40 = vsel %vm1350_vm10, %v2896_v31, %v1347_v17 }
 0x6b7   :  { %v1356_v52 = vsel %vm1353_vm11, %v1355_v33, %v1351_v40  ;;  %v1619_v36 = vpop.f32.mrf.mxu2  ;;  %v1372_v40 = vand.u32 2147483647, %v4495_v24  ;;  %v1375_v33 = vor.u32 1.1754944e-38, %v1374_v62 }
 0x6b8   :  { %v1366_v17 = vmul.f32 %v2898_v53, %v1365_v0  ;;  %v1379_v31 = vmul.f32 %v1378_v7, %v1356_v52  ;;  %v4548_v29 = vadd.f32 %v1619_v36, %v4505_v32  ;;  %v1660_v18 = vpop.f32.mrf.mxu3 }
 0x6b9   :  { %v4553_v23 = vadd.f32 %v1660_v18, %v4509_v4  ;;  %v1581_v39 = vpop.f32.mrf.mxu1  ;;  %vm1373_vm15 = vcmp.eq.f32.partialorder %v1372_v40, 8.507059e+37 }
 0x6ba   :  { %5276 = vst [vmem:[#allocation52_spill] sm:$0xff] %v4548_v29  ;;  %v1380_v7 = vadd.f32 %v1379_v31, %v468_v49  ;;  %v4560_v52 = vadd.f32 %v1581_v39, %v4482_v45  ;;  %v1367_v36 = vadd.f32 %v2898_v53, %v1366_v17 }
 0x6bb   :  { %5277 = vst [vmem:[#allocation53_spill] sm:$0xff] %v4553_v23 }
 0x6bc   :  { %5278 = vst [vmem:[#allocation54_spill] sm:$0xff] %v4560_v52  ;;  %2899 = vtanh.f32 %v1380_v7  ;;  %v1371_v8 = vsel %vm1370_vm14, %v2898_v53, %v1367_v36 }
 0x6bd   :  { %v1376_v24 = vsel %vm1373_vm15, %v1375_v33, %v1371_v8 }
 0x6be   :  { %v1382_v17 = vsub.f32 1.0, %v1376_v24  ;;  %v1384_v40 = vmul.f32 %v1376_v24, %v4306_v30 }
 0x6bf   :  { %v1622_v0 = vpop.f32.mrf.mxu2 }
 0x6c0   :  { %v4575_v53 = vadd.f32 %v1622_v0, %v4505_v32  ;;  %v1663_v42 = vpop.f32.mrf.mxu3 }
 0x6c1   :  { %v4580_v49 = vadd.f32 %v1663_v42, %v4509_v4  ;;  %v1584_v62 = vpop.f32.mrf.mxu1  ;;  %v5285_v42 = vld [vmem:[#allocation33_spill] sm:$0xff] }
 0x6c2   :  { %5279 = vst [vmem:[#allocation55_spill] sm:$0xff] %v4575_v53  ;;  %v2900_v31 = vpop.eup %2899  ;;  %v4585_v18 = vadd.f32 %v1584_v62, %v4482_v45  ;;  %v5286_v62 = vld [vmem:[#allocation28_spill] sm:$0xff] }
 0x6c3   :  { %5280 = vst [vmem:[#allocation56_spill] sm:$0xff] %v4580_v49  ;;  %v1383_v39 = vmul.f32 %v2900_v31, %v1382_v17  ;;  %v5287_v31 = vld [vmem:[#allocation31_spill] sm:$0xff] }
 0x6c4   :  { %5281 = vst [vmem:[#allocation30_spill] sm:$0xff] %v4585_v18 }
 0x6c5   :  { %v4594_v7 = vadd.f32 %v1384_v40, %v1383_v39 }
 0x6c7   :  { %v1625_v36 = vpop.f32.mrf.mxu2  ;;  %1743 = vmatmul.f32.vlgmr.msrb.gmra.mxu0 %v4594_v7  ;;  %1763 = vmatmul.f32.vlgmr.msrb.gmra.mxu1 %v4594_v7 }
 0x6c8   :  { %v4603_v30 = vadd.f32 %v1625_v36, %v4505_v32  ;;  %v1666_v8 = vpop.f32.mrf.mxu3  ;;  %1783 = vmatmul.f32.vlgmr.msrb.gmra.mxu2 %v4594_v7  ;;  %1988 = vmatpush.msrb.mxu0 %v4344_v20 }
 0x6c9   :  { %v4608_v33 = vadd.f32 %v1666_v8, %v4509_v4  ;;  %v1587_v24 = vpop.f32.mrf.mxu1  ;;  %2057 = vmatpush.msrb.mxu1 %v4311_v59  ;;  %2077 = vmatpush.msrb.mxu2 %v4316_v54 }
 0x6ca   :  { %5282 = vst [vmem:[#allocation57_spill] sm:$0xff] %v4603_v30  ;;  %v4613_v0 = vadd.f32 %v1587_v24, %v4482_v45  ;;  %1989 = vmatpush.msrb.mxu0 %v4350_v25 }
 0x6cb   :  { %5283 = vst [vmem:[#allocation58_spill] sm:$0xff] %v4608_v33  ;;  %2058 = vmatpush.msrb.mxu1 %v5285_v42  ;;  %2078 = vmatpush.msrb.mxu2 %v5286_v62 }
 0x6cc   :  { %5284 = vst [vmem:[#allocation59_spill] sm:$0xff] %v4613_v0  ;;  %1990 = vmatpush.msrb.mxu0 %v4353_v27  ;;  %v5291_v0 = vld [vmem:[#allocation32_spill] sm:$0xff] }
 0x6cd   :  { %2059 = vmatpush.msrb.mxu1 %v5287_v31  ;;  %2079 = vmatpush.msrb.mxu2 %v4325_v38 }
 0x6ce   :  { %1991 = vmatpush.msrb.mxu0 %v4356_v47 }
 0x6cf   :  { %v1628_v17 = vpop.f32.mrf.mxu2  ;;  %2060 = vmatpush.msrb.mxu1 %v4330_v37  ;;  %2080 = vmatpush.msrb.mxu2 %v4342_v19 }
 0x6d0   :  { %v4627_v39 = vadd.f32 %v1628_v17, %v4505_v32  ;;  %v1669_v40 = vpop.f32.mrf.mxu3  ;;  %1992 = vmatpush.msrb.mxu0 %v4361_v50  ;;  %v5292_v17 = vld [vmem:[#allocation34_spill] sm:$0xff] }
 0x6d1   :  { %v4631_v36 = vadd.f32 %v1669_v40, %v4509_v4  ;;  %v1590_v8 = vpop.f32.mrf.mxu1  ;;  %2061 = vmatpush.msrb.mxu1 %v5292_v17 }
 0x6d2   :  { %5288 = vst [vmem:[#allocation33_spill] sm:$0xff] %v4627_v39  ;;  %v4636_v24 = vadd.f32 %v1590_v8, %v4482_v45  ;;  %1993 = vmatpush.msrb.mxu0 %v5291_v0  ;;  %v5293_v39 = vld [vmem:[#allocation29_spill] sm:$0xff] }
 0x6d3   :  { %5289 = vst [vmem:[#allocation28_spill] sm:$0xff] %v4631_v36  ;;  %2081 = vmatpush.msrb.mxu2 %v5293_v39  ;;  %2062 = vmatpush.msrb.mxu1 %v4340_v16 }
 0x6d4   :  { %5290 = vst [vmem:[#allocation31_spill] sm:$0xff] %v4636_v24  ;;  %1994 = vmatpush.msrb.mxu0 %v4375_v55 }
 0x6d5   :  { %2082 = vmatpush.msrb.mxu2 %v4365_v51  ;;  %2063 = vmatpush.msrb.mxu1 %v4371_v5 }
 0x6d6   :  { %1995 = vmatpush.msrb.mxu0 %v4384_v1 }
 0x6d7   :  { %v1631_v40 = vpop.f32.mrf.mxu2  ;;  %2083 = vmatpush.msrb.mxu2 %v4373_v48  ;;  %2064 = vmatpush.msrb.mxu1 %v4379_v61 }
 0x6d8   :  { %v4648_v8 = vadd.f32 %v1631_v40, %v4505_v32  ;;  %v1672_v24 = vpop.f32.mrf.mxu3  ;;  %1996 = vmatpush.msrb.mxu0 %v4394_v28  ;;  %v5297_v40 = vld [vmem:[#allocation41_spill] sm:$0xff] }
 0x6d9   :  { %v4652_v36 = vadd.f32 %v1672_v24, %v4509_v4  ;;  %2084 = vmatpush.msrb.mxu2 %v4381_v43  ;;  %2065 = vmatpush.msrb.mxu1 %v4389_v13  ;;  %v4680_v24 = vpop.f32.mrf.mxu1 }
 0x6da   :  { %5294 = vst [vmem:[#allocation32_spill] sm:$0xff] %v4648_v8  ;;  %1997 = vmatpush.msrb.mxu0 %v4405_v21  ;;  %v5298_v8 = vld [vmem:[#allocation43_spill] sm:$0xff] }
 0x6db   :  { %5295 = vst [vmem:[#allocation34_spill] sm:$0xff] %v4652_v36  ;;  %2085 = vmatpush.msrb.mxu2 %v4391_v14  ;;  %2066 = vmatpush.msrb.mxu1 %v4400_v44  ;;  %v1573_v36 = vadd.f32 %v5297_v40, %v4482_v45  ;;  %v1614_v33 = vadd.f32 %v5298_v8, %v4505_v32 }
 0x6dc   :  { %1998 = vmatpush.msrb.mxu0 %v4424_v9  ;;  %5296 = vst [vmem:[#allocation29_spill] sm:$0xff] %v4680_v24 }
 0x6dd   :  { %2086 = vmatpush.msrb.mxu2 %v4402_v41  ;;  %2067 = vmatpush.msrb.mxu1 %v4410_v58 }
 0x6de   :  { %1999 = vmatpush.msrb.mxu0 %v4426_v2 }
 0x6df   :  { %2087 = vmatpush.msrb.mxu2 %v4417_v63  ;;  %2068 = vmatpush.msrb.mxu1 %v4412_v60  ;;  %v4686_v24 = vpop.f32.mrf.mxu2 }
 0x6e0   :  { %2000 = vmatpush.msrb.mxu0 %v4439_v34  ;;  %5299 = vst [vmem:[#allocation41_spill] sm:$0xff] %v4686_v24 }
 0x6e1   :  { %2088 = vmatpush.msrb.mxu2 %v4419_v3  ;;  %2069 = vmatpush.msrb.mxu1 %v4421_v6 }
 0x6e2   :  { %2001 = vmatpush.msrb.mxu0 %v4451_v35 }
 0x6e3   :  { %2089 = vmatpush.msrb.mxu2 %v4437_v46  ;;  %2070 = vmatpush.msrb.mxu1 %v4434_v10 }
 0x6e4   :  { %2002 = vmatpush.msrb.mxu0 %v4461_v57 }
 0x6e5   :  { %2090 = vmatpush.msrb.mxu2 %v4449_v26  ;;  %2071 = vmatpush.msrb.mxu1 %v4446_v22 }
 0x6e6   :  { %2003 = vmatpush.msrb.mxu0 %v4474_v15 }
 0x6e7   :  { %2091 = vmatpush.msrb.mxu2 %v4456_v11  ;;  %2072 = vmatpush.msrb.mxu1 %v4459_v56 }
 0x6e9   :  { %2092 = vmatpush.msrb.mxu2 %v4471_v12 }
 0x744   :  { %v1744_v30 = vpop.f32.mrf.mxu0  ;;  %v1764_v18 = vpop.f32.mrf.mxu1 }
 0x745   :  { %v1787_v49 = vadd.f32 %v1744_v30, %v1573_v36  ;;  %v1807_v53 = vadd.f32 %v1764_v18, %v1614_v33 }
 0x747   :  { %v2767_v52 = vmul.f32 -1.442695, %v1787_v49  ;;  %v2768_v23 = vmul.f32 -1.442695, %v1807_v53 }
 0x749   :  { %2901 = vpow2.f32 %v2767_v52 }
 0x74a   :  { %2903 = vpow2.f32 %v2768_v23  ;;  %v4691_v23 = vld [vmem:[%s5115_s12] ss:$0 sm:$0xff] }
 0x74f   :  { %v2902_v29 = vpop.eup %2901 }
 0x750   :  { %v2904_v56 = vpop.eup %2903  ;;  %v1791_v15 = vadd.f32 1.0, %v2902_v29  ;;  %v1784_v29 = vpop.f32.mrf.mxu2 }
 0x751   :  { %v1811_v12 = vadd.f32 1.0, %v2904_v56 }
 0x752   :  { %2905 = vrcp.f32 %v1791_v15  ;;  %v1803_v30 = vand.u32 2147483648, %v1791_v15  ;;  %v1801_v53 = vand.u32 2147483647, %v1791_v15  ;;  %vm1797_vm1 = vweird.f32 %v1791_v15 }
 0x753   :  { %2907 = vrcp.f32 %v1811_v12  ;;  %v1823_v57 = vand.u32 2147483648, %v1811_v12  ;;  %vm1817_vm5 = vweird.f32 %v1811_v12  ;;  %v1821_v10 = vand.u32 2147483647, %v1811_v12 }
 0x754   :  { %v1804_v49 = vor.u32 1.1754944e-38, %v1803_v30  ;;  %vm1802_vm3 = vcmp.eq.f32.partialorder %v1801_v53, 8.507059e+37 }
 0x755   :  { %vm1822_vm7 = vcmp.eq.f32.partialorder %v1821_v10, 8.507059e+37  ;;  %v5302_v10 = vld [vmem:[#allocation36_spill] sm:$0xff] }
 0x758   :  { %v2906_v40 = vpop.eup %2905 }
 0x759   :  { %v2908_v45 = vpop.eup %2907  ;;  %v1793_v11 = vmul.f32 %v2906_v40, %v1791_v15  ;;  %vm1798_vm0 = vweird.f32 %v2906_v40  ;;  %v1824_v15 = vor.u32 1.1754944e-38, %v1823_v57  ;;  %v5304_v57 = vld [vmem:[#allocation39_spill] sm:$0xff] }
 0x75a   :  { %v1813_v8 = vmul.f32 %v2908_v45, %v1811_v12  ;;  %vm1799_vm2 = vmor %vm1797_vm1, %vm1798_vm0  ;;  %vm1818_vm4 = vweird.f32 %v2908_v45  ;;  %v5305_v12 = vld [vmem:[#allocation35_spill] sm:$0xff] }
 0x75b   :  { %v1794_v32 = vsub.f32 1.0, %v1793_v11  ;;  %v1830_v11 = vadd.f32 %v4691_v23, %v1784_v29  ;;  %vm1819_vm6 = vmor %vm1817_vm5, %vm1818_vm4 }
 0x75c   :  { %v1814_v22 = vsub.f32 1.0, %v1813_v8  ;;  %v5300_v8 = vld [vmem:[#allocation45_spill] sm:$0xff] }
 0x75d   :  { %v1795_v18 = vmul.f32 %v2906_v40, %v1794_v32  ;;  %v1655_v24 = vadd.f32 %v5300_v8, %v4509_v4 }
 0x75e   :  { %v1815_v56 = vmul.f32 %v2908_v45, %v1814_v22 }
 0x75f   :  { %v1796_v52 = vadd.f32 %v2906_v40, %v1795_v18 }
 0x760   :  { %v1816_v36 = vadd.f32 %v2908_v45, %v1815_v56 }
 0x761   :  { %v1800_v33 = vsel %vm1799_vm2, %v2906_v40, %v1796_v52 }
 0x762   :  { %v1805_v32 = vsel %vm1802_vm3, %v1804_v49, %v1800_v33  ;;  %v1820_v18 = vsel %vm1819_vm6, %v2908_v45, %v1816_v36  ;;  %v5306_v45 = vld [vmem:[#allocation38_spill] sm:$0xff]  ;;  %v5309_v49 = vld [vmem:[#allocation40_spill] sm:$0xff]  ;;  %v4750_v33 = vpop.f32.mrf.mxu3  ;;  %v5311_v36 = vld [vmem:[#allocation49_spill] sm:$0xff] }
 0x763   :  { %v1831_v26 = vmul.f32 %v1830_v11, %v1805_v32  ;;  %v1825_v40 = vsel %vm1822_vm7, %v1824_v15, %v1820_v18  ;;  %5310 = vst [vmem:[#allocation45_spill] sm:$0xff] %v4750_v33  ;;  %v5312_v18 = vld [vmem:[#allocation47_spill] sm:$0xff] }
 0x764   :  { %v1834_v30 = vsub.f32 1.0, %v1825_v40  ;;  %v1836_v56 = vmul.f32 %v1825_v40, %v4594_v7  ;;  %v5307_v7 = vld [vmem:[#allocation42_spill] sm:$0xff] }
 0x765   :  { %v1832_v22 = vadd.f32 %v1831_v26, %v1655_v24  ;;  %v5303_v26 = vld [vmem:[#allocation37_spill] sm:$0xff]  ;;  %v5308_v24 = vld [vmem:[#allocation46_spill] sm:$0xff] }
 0x767   :  { %2909 = vtanh.f32 %v1832_v22 }
 0x76d   :  { %v2910_v53 = vpop.eup %2909 }
 0x76e   :  { %v1835_v29 = vmul.f32 %v2910_v53, %v1834_v30 }
 0x770   :  { %v4697_v52 = vadd.f32 %v1836_v56, %v1835_v29 }
 0x772   :  { %5301 = vst [vmem:[#allocation43_spill] sm:$0xff] %v4697_v52  ;;  %1855 = vmatmul.f32.vlgmr.msra.gmra.mxu3 %v4697_v52  ;;  %1875 = vmatmul.f32.vlgmr.msra.gmra.mxu0 %v4697_v52 }
 0x773   :  { %1895 = vmatmul.f32.vlgmr.msra.gmra.mxu1 %v4697_v52  ;;  %2097 = vmatpush.msra.mxu3 %v4344_v20 }
 0x774   :  { %2166 = vmatpush.msra.mxu0 %v4311_v59  ;;  %2186 = vmatpush.msra.mxu1 %v4316_v54 }
 0x775   :  { %2098 = vmatpush.msra.mxu3 %v4350_v25 }
 0x776   :  { %2167 = vmatpush.msra.mxu0 %v5285_v42  ;;  %2187 = vmatpush.msra.mxu1 %v5286_v62 }
 0x777   :  { %2099 = vmatpush.msra.mxu3 %v4353_v27 }
 0x778   :  { %2168 = vmatpush.msra.mxu0 %v5287_v31  ;;  %2188 = vmatpush.msra.mxu1 %v4325_v38 }
 0x779   :  { %2100 = vmatpush.msra.mxu3 %v4356_v47 }
 0x77a   :  { %2169 = vmatpush.msra.mxu0 %v4330_v37  ;;  %2189 = vmatpush.msra.mxu1 %v4342_v19 }
 0x77b   :  { %2101 = vmatpush.msra.mxu3 %v4361_v50 }
 0x77c   :  { %2170 = vmatpush.msra.mxu0 %v5292_v17  ;;  %2190 = vmatpush.msra.mxu1 %v5293_v39 }
 0x77d   :  { %2102 = vmatpush.msra.mxu3 %v5291_v0 }
 0x77e   :  { %2171 = vmatpush.msra.mxu0 %v4340_v16  ;;  %2191 = vmatpush.msra.mxu1 %v4365_v51 }
 0x77f   :  { %2103 = vmatpush.msra.mxu3 %v4375_v55 }
 0x780   :  { %2172 = vmatpush.msra.mxu0 %v4371_v5  ;;  %2192 = vmatpush.msra.mxu1 %v4373_v48 }
 0x781   :  { %2104 = vmatpush.msra.mxu3 %v4384_v1 }
 0x782   :  { %2173 = vmatpush.msra.mxu0 %v4379_v61  ;;  %2193 = vmatpush.msra.mxu1 %v4381_v43 }
 0x783   :  { %2105 = vmatpush.msra.mxu3 %v4394_v28 }
 0x784   :  { %2174 = vmatpush.msra.mxu0 %v4389_v13  ;;  %2194 = vmatpush.msra.mxu1 %v4391_v14 }
 0x785   :  { %2106 = vmatpush.msra.mxu3 %v4405_v21 }
 0x786   :  { %2175 = vmatpush.msra.mxu0 %v4400_v44  ;;  %2195 = vmatpush.msra.mxu1 %v4402_v41 }
 0x787   :  { %2107 = vmatpush.msra.mxu3 %v4424_v9 }
 0x788   :  { %2176 = vmatpush.msra.mxu0 %v4410_v58  ;;  %2196 = vmatpush.msra.mxu1 %v4417_v63 }
 0x789   :  { %2108 = vmatpush.msra.mxu3 %v4426_v2 }
 0x78a   :  { %2177 = vmatpush.msra.mxu0 %v4412_v60  ;;  %2197 = vmatpush.msra.mxu1 %v4419_v3 }
 0x78b   :  { %2109 = vmatpush.msra.mxu3 %v4439_v34 }
 0x78c   :  { %2178 = vmatpush.msra.mxu0 %v4421_v6  ;;  %2198 = vmatpush.msra.mxu1 %v4437_v46 }
 0x78d   :  { %2110 = vmatpush.msra.mxu3 %v4451_v35 }
 0x78e   :  { %2179 = vmatpush.msra.mxu0 %v5302_v10  ;;  %2199 = vmatpush.msra.mxu1 %v5303_v26 }
 0x78f   :  { %2111 = vmatpush.msra.mxu3 %v5304_v57 }
 0x790   :  { %2180 = vmatpush.msra.mxu0 %v5305_v12  ;;  %2200 = vmatpush.msra.mxu1 %v5306_v45 }
 0x791   :  { %2112 = vmatpush.msra.mxu3 %v5307_v7 }
 0x792   :  { %2181 = vmatpush.msra.mxu0 %v5308_v24  ;;  %2201 = vmatpush.msra.mxu1 %v5309_v49 }
 0x7ef   :  { %v1876_v11 = vpop.f32.mrf.mxu0 }
 0x7f0   :  { %v1919_v32 = vadd.f32 %v1876_v11, %v5311_v36 }
 0x7f2   :  { %v2770_v8 = vmul.f32 -1.442695, %v1919_v32 }
 0x7f4   :  { %2911 = vpow2.f32 %v2770_v8 }
 0x7f5   :  { %v1856_v22 = vpop.f32.mrf.mxu3 }
 0x7f6   :  { %v1899_v15 = vadd.f32 %v1856_v22, %v5312_v18  ;;  %v1896_v22 = vpop.f32.mrf.mxu1 }
 0x7f8   :  { %v2769_v40 = vmul.f32 -1.442695, %v1899_v15 }
 0x7fa   :  { %v2912_v30 = vpop.eup %2911  ;;  %2913 = vpow2.f32 %v2769_v40  ;;  %v1939_v40 = vadd.f32 %v4691_v23, %v1896_v22 }
 0x7fb   :  { %v1923_v53 = vadd.f32 1.0, %v2912_v30 }
 0x7fd   :  { %2915 = vrcp.f32 %v1923_v53  ;;  %v1935_v57 = vand.u32 2147483648, %v1923_v53  ;;  %vm1929_vm13 = vweird.f32 %v1923_v53 }
 0x7ff   :  { %v1936_v10 = vor.u32 1.1754944e-38, %v1935_v57 }
 0x800   :  { %v2914_v29 = vpop.eup %2913 }
 0x801   :  { %v1903_v56 = vadd.f32 1.0, %v2914_v29 }
 0x803   :  { %2917 = vrcp.f32 %v1903_v56  ;;  %v2916_v4 = vpop.eup %2915  ;;  %v1915_v11 = vand.u32 2147483648, %v1903_v56  ;;  %v1913_v32 = vand.u32 2147483647, %v1903_v56  ;;  %vm1909_vm9 = vweird.f32 %v1903_v56 }
 0x804   :  { %v1925_v49 = vmul.f32 %v2916_v4, %v1923_v53  ;;  %vm1930_vm12 = vweird.f32 %v2916_v4 }
 0x805   :  { %v1916_v15 = vor.u32 1.1754944e-38, %v1915_v11  ;;  %vm1914_vm11 = vcmp.eq.f32.partialorder %v1913_v32, 8.507059e+37  ;;  %vm1931_vm14 = vmor %vm1929_vm13, %vm1930_vm12 }
 0x806   :  { %v1926_v7 = vsub.f32 1.0, %v1925_v49 }
 0x808   :  { %v1927_v8 = vmul.f32 %v2916_v4, %v1926_v7 }
 0x809   :  { %v2918_v24 = vpop.eup %2917 }
 0x80a   :  { %v1905_v33 = vmul.f32 %v2918_v24, %v1903_v56  ;;  %vm1910_vm8 = vweird.f32 %v2918_v24  ;;  %v1928_v29 = vadd.f32 %v2916_v4, %v1927_v8 }
 0x80b   :  { %vm1911_vm10 = vmor %vm1909_vm9, %vm1910_vm8 }
 0x80c   :  { %v1906_v45 = vsub.f32 1.0, %v1905_v33  ;;  %v1933_v33 = vand.u32 2147483647, %v1923_v53  ;;  %v1932_v7 = vsel %vm1931_vm14, %v2916_v4, %v1928_v29  ;;  %v4823_v29 = vld [vmem:[#allocation14 + $0x168] sm:$0xff] }
 0x80e   :  { %v1907_v36 = vmul.f32 %v2918_v24, %v1906_v45  ;;  %v5313_v45 = vld [vmem:[#allocation51_spill] sm:$0xff]  ;;  %vm1934_vm15 = vcmp.eq.f32.partialorder %v1933_v33, 8.507059e+37  ;;  %v4829_v33 = vld [vmem:[#allocation14 + $0x160] sm:$0xff] }
 0x80f   :  { %v1937_v56 = vsel %vm1934_vm15, %v1936_v10, %v1932_v7  ;;  %v4835_v7 = vld [vmem:[#allocation14 + $0x158] sm:$0xff] }
 0x810   :  { %v1908_v18 = vadd.f32 %v2918_v24, %v1907_v36  ;;  %v1943_v11 = vsub.f32 1.0, %v1937_v56 }
 0x812   :  { %v1912_v30 = vsel %vm1911_vm10, %v2918_v24, %v1908_v18  ;;  %v1945_v24 = vmul.f32 %v1937_v56, %v4697_v52  ;;  %v4838_v56 = vld [vmem:[#allocation14 + $0x148] sm:$0xff] }
 0x813   :  { %v1917_v12 = vsel %vm1914_vm11, %v1916_v15, %v1912_v30  ;;  %v4820_v30 = vld [vmem:[#allocation14 + $0x178] sm:$0xff] }
 0x814   :  { %v1940_v49 = vmul.f32 %v1939_v40, %v1917_v12 }
 0x816   :  { %v1941_v26 = vadd.f32 %v1940_v49, %v5313_v45  ;;  %v4826_v49 = vld [vmem:[#allocation14 + $0x170] sm:$0xff] }
 0x817   :  { %v4832_v45 = vld [vmem:[#allocation14 + $0x150] sm:$0xff] }
 0x818   :  { %2919 = vtanh.f32 %v1941_v26 }
 0x81e   :  { %v2920_v36 = vpop.eup %2919 }
 0x81f   :  { %v1944_v22 = vmul.f32 %v2920_v36, %v1943_v11  ;;  %v4841_v11 = vld [vmem:[#allocation14 + $0x138] sm:$0xff]  ;;  %v4844_v36 = vld [vmem:[#allocation14 + $0x140] sm:$0xff] }
 0x821   :  { %v4757_v32 = vadd.f32 %v1945_v24, %v1944_v22  ;;  %v4847_v22 = vld [vmem:[#allocation14 + $0x130] sm:$0xff]  ;;  %v4850_v24 = vld [vmem:[#allocation14 + $0x120] sm:$0xff] }
 0x823   :  { %5314 = vst [vmem:[#allocation49_spill] sm:$0xff] %v4757_v32  ;;  %1964 = vmatmul.f32.vlgmr.msra.gmra.mxu2 %v4757_v32  ;;  %1984 = vmatmul.f32.vlgmr.msrb.gmra.mxu3 %v4757_v32 }
 0x824   :  { %2004 = vmatmul.f32.vlgmr.msrb.gmra.mxu0 %v4757_v32  ;;  %2206 = vmatpush.msra.mxu2 %v4344_v20  ;;  %v5321_v20 = vld [vmem:[#allocation46_spill] sm:$0xff] }
 0x825   :  { %2275 = vmatpush.msrb.mxu3 %v4311_v59  ;;  %2295 = vmatpush.msrb.mxu0 %v4316_v54  ;;  %v5315_v59 = vld [vmem:[#allocation36_spill] sm:$0xff]  ;;  %v5316_v54 = vld [vmem:[#allocation37_spill] sm:$0xff] }
 0x826   :  { %2207 = vmatpush.msra.mxu2 %v4350_v25  ;;  %v5322_v25 = vld [vmem:[#allocation40_spill] sm:$0xff] }
 0x827   :  { %2276 = vmatpush.msrb.mxu3 %v5285_v42  ;;  %2296 = vmatpush.msrb.mxu0 %v5286_v62 }
 0x828   :  { %2208 = vmatpush.msra.mxu2 %v4353_v27 }
 0x829   :  { %2277 = vmatpush.msrb.mxu3 %v5287_v31  ;;  %2297 = vmatpush.msrb.mxu0 %v4325_v38  ;;  %v5317_v38 = vld [vmem:[#allocation39_spill] sm:$0xff] }
 0x82a   :  { %2209 = vmatpush.msra.mxu2 %v4356_v47 }
 0x82b   :  { %2278 = vmatpush.msrb.mxu3 %v4330_v37  ;;  %2298 = vmatpush.msrb.mxu0 %v4342_v19  ;;  %v5318_v37 = vld [vmem:[#allocation35_spill] sm:$0xff]  ;;  %v5320_v19 = vld [vmem:[#allocation42_spill] sm:$0xff] }
 0x82c   :  { %2210 = vmatpush.msra.mxu2 %v4361_v50  ;;  %v5323_v50 = vld [vmem:[#allocation27_spill] sm:$0xff] }
 0x82d   :  { %2279 = vmatpush.msrb.mxu3 %v5292_v17  ;;  %2299 = vmatpush.msrb.mxu0 %v5293_v39  ;;  %v5325_v17 = vld [vmem:[#allocation53_spill] sm:$0xff] }
 0x82e   :  { %2211 = vmatpush.msra.mxu2 %v5291_v0 }
 0x82f   :  { %2280 = vmatpush.msrb.mxu3 %v4340_v16  ;;  %2300 = vmatpush.msrb.mxu0 %v4365_v51  ;;  %v5319_v16 = vld [vmem:[#allocation38_spill] sm:$0xff] }
 0x830   :  { %2212 = vmatpush.msra.mxu2 %v4375_v55 }
 0x831   :  { %2281 = vmatpush.msrb.mxu3 %v4371_v5  ;;  %2301 = vmatpush.msrb.mxu0 %v4373_v48  ;;  %v5324_v5 = vld [vmem:[#allocation52_spill] sm:$0xff] }
 0x832   :  { %2213 = vmatpush.msra.mxu2 %v4384_v1 }
 0x833   :  { %2282 = vmatpush.msrb.mxu3 %v4379_v61  ;;  %2302 = vmatpush.msrb.mxu0 %v4381_v43 }
 0x834   :  { %2214 = vmatpush.msra.mxu2 %v4394_v28 }
 0x835   :  { %2283 = vmatpush.msrb.mxu3 %v4389_v13  ;;  %2303 = vmatpush.msrb.mxu0 %v4391_v14 }
 0x836   :  { %2215 = vmatpush.msra.mxu2 %v4405_v21 }
 0x837   :  { %2284 = vmatpush.msrb.mxu3 %v4400_v44  ;;  %2304 = vmatpush.msrb.mxu0 %v4402_v41 }
 0x838   :  { %2216 = vmatpush.msra.mxu2 %v4424_v9 }
 0x839   :  { %2285 = vmatpush.msrb.mxu3 %v4410_v58  ;;  %2305 = vmatpush.msrb.mxu0 %v4417_v63 }
 0x83a   :  { %2217 = vmatpush.msra.mxu2 %v4426_v2 }
 0x83b   :  { %2286 = vmatpush.msrb.mxu3 %v4412_v60  ;;  %2306 = vmatpush.msrb.mxu0 %v4419_v3 }
 0x83c   :  { %2218 = vmatpush.msra.mxu2 %v4439_v34 }
 0x83d   :  { %2287 = vmatpush.msrb.mxu3 %v4421_v6  ;;  %2307 = vmatpush.msrb.mxu0 %v4437_v46 }
 0x83e   :  { %2219 = vmatpush.msra.mxu2 %v4451_v35 }
 0x83f   :  { %2288 = vmatpush.msrb.mxu3 %v5315_v59  ;;  %2308 = vmatpush.msrb.mxu0 %v5316_v54  ;;  %v4853_v59 = vld [vmem:[#allocation14 + $0x128] sm:$0xff]  ;;  %v4856_v54 = vld [vmem:[#allocation14 + $0x118] sm:$0xff] }
 0x840   :  { %2220 = vmatpush.msra.mxu2 %v5317_v38  ;;  %v4859_v38 = vld [vmem:[#allocation14 + $0x108] sm:$0xff] }
 0x841   :  { %2289 = vmatpush.msrb.mxu3 %v5318_v37  ;;  %2309 = vmatpush.msrb.mxu0 %v5319_v16  ;;  %v4862_v37 = vld [vmem:[#allocation14 + $0x110] sm:$0xff]  ;;  %v4865_v16 = vld [vmem:[#allocation14 + $0x100] sm:$0xff] }
 0x842   :  { %2221 = vmatpush.msra.mxu2 %v5320_v19  ;;  %v4868_v19 = vld [vmem:[#allocation14 + $0xf0] sm:$0xff] }
 0x843   :  { %2290 = vmatpush.msrb.mxu3 %v5321_v20  ;;  %2310 = vmatpush.msrb.mxu0 %v5322_v25  ;;  %v4871_v20 = vld [vmem:[#allocation14 + $0xf8] sm:$0xff]  ;;  %v4874_v25 = vld [vmem:[#allocation14 + $0xe8] sm:$0xff] }
 0x8a1   :  { %v2005_v9 = vpop.f32.mrf.mxu0 }
 0x8a2   :  { %v2048_v35 = vadd.f32 %v4691_v23, %v2005_v9  ;;  %v4940_v9 = vld [vmem:[#allocation14 + $0x30] sm:$0xff] }
 0x8a3   :  { %5326 = vst [vmem:[#allocation47_spill] sm:$0xff] %v4940_v9 }
 0x8a6   :  { %v1965_v27 = vpop.f32.mrf.mxu2  ;;  %v1985_v47 = vpop.f32.mrf.mxu3 }
 0x8a7   :  { %v2008_v51 = vadd.f32 %v1965_v27, %v5323_v50  ;;  %v2028_v48 = vadd.f32 %v1985_v47, %v5324_v5  ;;  %v4877_v27 = vld [vmem:[#allocation14 + $0xd8] sm:$0xff]  ;;  %v4880_v47 = vld [vmem:[#allocation14 + $0xe0] sm:$0xff]  ;;  %v4883_v50 = vld [vmem:[#allocation14 + $0xd0] sm:$0xff] }
 0x8a8   :  { %v4889_v5 = vld [vmem:[#allocation14 + $0xc8] sm:$0xff] }
 0x8a9   :  { %v2771_v55 = vmul.f32 -1.442695, %v2008_v51  ;;  %v2772_v61 = vmul.f32 -1.442695, %v2028_v48  ;;  %v4886_v51 = vld [vmem:[#allocation14 + $0xc0] sm:$0xff]  ;;  %v4892_v48 = vld [vmem:[#allocation14 + $0xb8] sm:$0xff] }
 0x8ab   :  { %2921 = vpow2.f32 %v2771_v55  ;;  %v4895_v55 = vld [vmem:[#allocation14 + $0xa8] sm:$0xff] }
 0x8ac   :  { %2923 = vpow2.f32 %v2772_v61  ;;  %v4898_v61 = vld [vmem:[#allocation14 + $0xb0] sm:$0xff] }
 0x8b1   :  { %v2922_v43 = vpop.eup %2921 }
 0x8b2   :  { %v2924_v1 = vpop.eup %2923  ;;  %v2012_v13 = vadd.f32 1.0, %v2922_v43  ;;  %v4901_v43 = vld [vmem:[#allocation14 + $0xa0] sm:$0xff] }
 0x8b3   :  { %v2032_v14 = vadd.f32 1.0, %v2924_v1  ;;  %v4904_v1 = vld [vmem:[#allocation14 + $0x90] sm:$0xff] }
 0x8b4   :  { %2925 = vrcp.f32 %v2012_v13  ;;  %v2024_v60 = vand.u32 2147483648, %v2012_v13  ;;  %v2022_v6 = vand.u32 2147483647, %v2012_v13  ;;  %vm2018_vm1 = vweird.f32 %v2012_v13 }
 0x8b5   :  { %2927 = vrcp.f32 %v2032_v14  ;;  %v2044_v31 = vand.u32 2147483648, %v2032_v14  ;;  %vm2038_vm5 = vweird.f32 %v2032_v14  ;;  %v2042_v39 = vand.u32 2147483647, %v2032_v14 }
 0x8b6   :  { %v2025_v34 = vor.u32 1.1754944e-38, %v2024_v60  ;;  %vm2023_vm3 = vcmp.eq.f32.partialorder %v2022_v6, 8.507059e+37  ;;  %v4928_v60 = vld [vmem:[#allocation14 + $0x58] sm:$0xff]  ;;  %v4937_v6 = vld [vmem:[#allocation14 + $0x40] sm:$0xff] }
 0x8b7   :  { %v2045_v57 = vor.u32 1.1754944e-38, %v2044_v31  ;;  %vm2043_vm7 = vcmp.eq.f32.partialorder %v2042_v39, 8.507059e+37  ;;  %v5334_v31 = vld [vmem:[#allocation54_spill] sm:$0xff] }
 0x8ba   :  { %v2926_v28 = vpop.eup %2925 }
 0x8bb   :  { %v2928_v44 = vpop.eup %2927  ;;  %v2014_v41 = vmul.f32 %v2926_v28, %v2012_v13  ;;  %vm2019_vm0 = vweird.f32 %v2926_v28  ;;  %v4907_v13 = vld [vmem:[#allocation14 + $0x98] sm:$0xff] }
 0x8bc   :  { %v2034_v21 = vmul.f32 %v2928_v44, %v2032_v14  ;;  %vm2020_vm2 = vmor %vm2018_vm1, %vm2019_vm0  ;;  %vm2039_vm4 = vweird.f32 %v2928_v44  ;;  %v4910_v14 = vld [vmem:[#allocation14 + $0x88] sm:$0xff] }
 0x8bd   :  { %v2015_v58 = vsub.f32 1.0, %v2014_v41  ;;  %vm2040_vm6 = vmor %vm2038_vm5, %vm2039_vm4  ;;  %v4919_v41 = vld [vmem:[#allocation14 + $0x70] sm:$0xff] }
 0x8be   :  { %v2035_v63 = vsub.f32 1.0, %v2034_v21  ;;  %v4922_v21 = vld [vmem:[#allocation14 + $0x60] sm:$0xff] }
 0x8bf   :  { %v2016_v3 = vmul.f32 %v2926_v28, %v2015_v58  ;;  %v4925_v58 = vld [vmem:[#allocation14 + $0x68] sm:$0xff] }
 0x8c0   :  { %v2036_v2 = vmul.f32 %v2928_v44, %v2035_v63  ;;  %v4931_v63 = vld [vmem:[#allocation14 + $0x48] sm:$0xff] }
 0x8c1   :  { %v2017_v46 = vadd.f32 %v2926_v28, %v2016_v3  ;;  %v4934_v3 = vld [vmem:[#allocation14 + $0x50] sm:$0xff] }
 0x8c2   :  { %v2037_v42 = vadd.f32 %v2928_v44, %v2036_v2  ;;  %v4943_v2 = vld [vmem:[#allocation14 + $0x38] sm:$0xff] }
 0x8c3   :  { %v2021_v4 = vsel %vm2020_vm2, %v2926_v28, %v2017_v46  ;;  %v4913_v28 = vld [vmem:[#allocation14 + $0x78] sm:$0xff]  ;;  %5327 = vst [vmem:[#allocation51_spill] sm:$0xff] %v4943_v2  ;;  %v4946_v46 = vld [vmem:[#allocation14 + $0x28] sm:$0xff] }
 0x8c4   :  { %v2026_v0 = vsel %vm2023_vm3, %v2025_v34, %v2021_v4  ;;  %v2041_v26 = vsel %vm2040_vm6, %v2928_v44, %v2037_v42  ;;  %v4916_v44 = vld [vmem:[#allocation14 + $0x80] sm:$0xff]  ;;  %5328 = vst [vmem:[#allocation36_spill] sm:$0xff] %v4946_v46  ;;  %v4949_v34 = vld [vmem:[#allocation14 + $0x18] sm:$0xff]  ;;  %v4955_v4 = vld [vmem:[#allocation14 + $0x10] sm:$0xff] }
 0x8c5   :  { %v2049_v62 = vmul.f32 %v2048_v35, %v2026_v0  ;;  %v2046_v12 = vsel %vm2043_vm7, %v2045_v57, %v2041_v26  ;;  %5329 = vst [vmem:[#allocation37_spill] sm:$0xff] %v4949_v34  ;;  %v4952_v35 = vld [vmem:[#allocation14 + $0x20] sm:$0xff]  ;;  %v4961_v42 = vld [vmem:[#allocation14 + $0x8] sm:$0xff] }
 0x8c6   :  { %v2052_v53 = vsub.f32 1.0, %v2046_v12  ;;  %v2054_v15 = vmul.f32 %v2046_v12, %v4757_v32  ;;  %5330 = vst [vmem:[#allocation39_spill] sm:$0xff] %v4952_v35  ;;  %v4958_v0 = vld [vmem:[#allocation14] sm:$0xff]  ;;  %v5335_v26 = vld [vmem:[#allocation55_spill] sm:$0xff] }
 0x8c7   :  { %v2050_v10 = vadd.f32 %v2049_v62, %v5325_v17  ;;  %5331 = vst [vmem:[#allocation35_spill] sm:$0xff] %v4955_v4 }
 0x8c8   :  { %5332 = vst [vmem:[#allocation38_spill] sm:$0xff] %v4958_v0 }
 0x8c9   :  { %2929 = vtanh.f32 %v2050_v10  ;;  %5333 = vst [vmem:[#allocation42_spill] sm:$0xff] %v4961_v42 }
 0x8cf   :  { %v2930_v8 = vpop.eup %2929 }
 0x8d0   :  { %v2053_v18 = vmul.f32 %v2930_v8, %v2052_v53 }
 0x8d2   :  { %v4815_v40 = vadd.f32 %v2054_v15, %v2053_v18 }
 0x8d4   :  { %2073 = vmatmul.f32.vlgmr.msrb.gmra.mxu1 %v4815_v40  ;;  %2093 = vmatmul.f32.vlgmr.msrb.gmra.mxu2 %v4815_v40 }
 0x8d5   :  { %2113 = vmatmul.f32.vlgmr.msra.gmra.mxu3 %v4815_v40  ;;  %2315 = vmatpush.msrb.mxu1 %v4820_v30 }
 0x8d6   :  { %2384 = vmatpush.msrb.mxu2 %v4823_v29  ;;  %2404 = vmatpush.msra.mxu3 %v4826_v49 }
 0x8d7   :  { %2316 = vmatpush.msrb.mxu1 %v4829_v33 }
 0x8d8   :  { %2385 = vmatpush.msrb.mxu2 %v4832_v45  ;;  %2405 = vmatpush.msra.mxu3 %v4835_v7 }
 0x8d9   :  { %2317 = vmatpush.msrb.mxu1 %v4838_v56 }
 0x8da   :  { %2386 = vmatpush.msrb.mxu2 %v4841_v11  ;;  %2406 = vmatpush.msra.mxu3 %v4844_v36 }
 0x8db   :  { %2318 = vmatpush.msrb.mxu1 %v4847_v22 }
 0x8dc   :  { %2387 = vmatpush.msrb.mxu2 %v4850_v24  ;;  %2407 = vmatpush.msra.mxu3 %v4853_v59 }
 0x8dd   :  { %2319 = vmatpush.msrb.mxu1 %v4856_v54 }
 0x8de   :  { %2388 = vmatpush.msrb.mxu2 %v4859_v38  ;;  %2408 = vmatpush.msra.mxu3 %v4862_v37 }
 0x8df   :  { %2320 = vmatpush.msrb.mxu1 %v4865_v16 }
 0x8e0   :  { %2389 = vmatpush.msrb.mxu2 %v4868_v19  ;;  %2409 = vmatpush.msra.mxu3 %v4871_v20 }
 0x8e1   :  { %2321 = vmatpush.msrb.mxu1 %v4874_v25 }
 0x8e2   :  { %2390 = vmatpush.msrb.mxu2 %v4877_v27  ;;  %2410 = vmatpush.msra.mxu3 %v4880_v47 }
 0x8e3   :  { %2322 = vmatpush.msrb.mxu1 %v4883_v50 }
 0x8e4   :  { %2391 = vmatpush.msrb.mxu2 %v4886_v51  ;;  %2411 = vmatpush.msra.mxu3 %v4889_v5 }
 0x8e5   :  { %2323 = vmatpush.msrb.mxu1 %v4892_v48 }
 0x8e6   :  { %2392 = vmatpush.msrb.mxu2 %v4895_v55  ;;  %2412 = vmatpush.msra.mxu3 %v4898_v61 }
 0x8e7   :  { %2324 = vmatpush.msrb.mxu1 %v4901_v43 }
 0x8e8   :  { %2393 = vmatpush.msrb.mxu2 %v4904_v1  ;;  %2413 = vmatpush.msra.mxu3 %v4907_v13 }
 0x8e9   :  { %2325 = vmatpush.msrb.mxu1 %v4910_v14 }
 0x8ea   :  { %2394 = vmatpush.msrb.mxu2 %v4913_v28  ;;  %2414 = vmatpush.msra.mxu3 %v4916_v44 }
 0x8eb   :  { %2326 = vmatpush.msrb.mxu1 %v4919_v41 }
 0x8ec   :  { %2395 = vmatpush.msrb.mxu2 %v4922_v21  ;;  %2415 = vmatpush.msra.mxu3 %v4925_v58 }
 0x8ed   :  { %2327 = vmatpush.msrb.mxu1 %v4928_v60 }
 0x8ee   :  { %2396 = vmatpush.msrb.mxu2 %v4931_v63  ;;  %2416 = vmatpush.msra.mxu3 %v4934_v3 }
 0x8ef   :  { %2328 = vmatpush.msrb.mxu1 %v4937_v6 }
 0x8f0   :  { %2397 = vmatpush.msrb.mxu2 %v4940_v9  ;;  %2417 = vmatpush.msra.mxu3 %v4943_v2  ;;  %v5336_v2 = vld [vmem:[#allocation56_spill] sm:$0xff] }
 0x8f1   :  { %2329 = vmatpush.msrb.mxu1 %v4946_v46 }
 0x8f2   :  { %2398 = vmatpush.msrb.mxu2 %v4949_v34  ;;  %2418 = vmatpush.msra.mxu3 %v4952_v35 }
 0x8f3   :  { %2330 = vmatpush.msrb.mxu1 %v4955_v4 }
 0x8f4   :  { %2399 = vmatpush.msrb.mxu2 %v4958_v0  ;;  %2419 = vmatpush.msra.mxu3 %v4961_v42 }
 0x951   :  { %v2074_v62 = vpop.f32.mrf.mxu1 }
 0x952   :  { %v2117_v39 = vadd.f32 %v2074_v62, %v5334_v31 }
 0x954   :  { %v2773_v17 = vmul.f32 -1.442695, %v2117_v39 }
 0x956   :  { %2931 = vpow2.f32 %v2773_v17 }
 0x957   :  { %v2094_v10 = vpop.f32.mrf.mxu2 }
 0x958   :  { %v2137_v57 = vadd.f32 %v2094_v10, %v5335_v26  ;;  %v2114_v39 = vpop.f32.mrf.mxu3 }
 0x95a   :  { %v2774_v12 = vmul.f32 -1.442695, %v2137_v57 }
 0x95c   :  { %v2932_v53 = vpop.eup %2931  ;;  %2933 = vpow2.f32 %v2774_v12  ;;  %v2157_v12 = vadd.f32 %v4691_v23, %v2114_v39 }
 0x95d   :  { %v2121_v8 = vadd.f32 1.0, %v2932_v53 }
 0x95f   :  { %2935 = vrcp.f32 %v2121_v8  ;;  %v2133_v42 = vand.u32 2147483648, %v2121_v8  ;;  %v2131_v62 = vand.u32 2147483647, %v2121_v8  ;;  %vm2127_vm9 = vweird.f32 %v2121_v8 }
 0x961   :  { %v2134_v10 = vor.u32 1.1754944e-38, %v2133_v42  ;;  %vm2132_vm11 = vcmp.eq.f32.partialorder %v2131_v62, 8.507059e+37 }
 0x962   :  { %v2934_v18 = vpop.eup %2933 }
 0x963   :  { %v2141_v15 = vadd.f32 1.0, %v2934_v18 }
 0x965   :  { %v2936_v32 = vpop.eup %2935  ;;  %2937 = vrcp.f32 %v2141_v15  ;;  %vm2147_vm13 = vweird.f32 %v2141_v15 }
 0x966   :  { %v2123_v52 = vmul.f32 %v2936_v32, %v2121_v8  ;;  %vm2128_vm8 = vweird.f32 %v2936_v32 }
 0x967   :  { %vm2129_vm10 = vmor %vm2127_vm9, %vm2128_vm8 }
 0x968   :  { %v2124_v0 = vsub.f32 1.0, %v2123_v52  ;;  %v2153_v52 = vand.u32 2147483648, %v2141_v15 }
 0x96a   :  { %v2125_v4 = vmul.f32 %v2936_v32, %v2124_v0  ;;  %v2151_v0 = vand.u32 2147483647, %v2141_v15 }
 0x96b   :  { %v2938_v31 = vpop.eup %2937 }
 0x96c   :  { %v2143_v17 = vmul.f32 %v2938_v31, %v2141_v15  ;;  %v2126_v35 = vadd.f32 %v2936_v32, %v2125_v4  ;;  %vm2148_vm12 = vweird.f32 %v2938_v31  ;;  %v2154_v4 = vor.u32 1.1754944e-38, %v2153_v52 }
 0x96d   :  { %vm2149_vm14 = vmor %vm2147_vm13, %vm2148_vm12  ;;  %vm2152_vm15 = vcmp.eq.f32.partialorder %v2151_v0, 8.507059e+37 }
 0x96e   :  { %v2144_v26 = vsub.f32 1.0, %v2143_v17  ;;  %v2130_v57 = vsel %vm2129_vm10, %v2936_v32, %v2126_v35 }
 0x96f   :  { %v2135_v53 = vsel %vm2132_vm11, %v2134_v10, %v2130_v57 }
 0x970   :  { %v2145_v18 = vmul.f32 %v2938_v31, %v2144_v26  ;;  %v2158_v34 = vmul.f32 %v2157_v12, %v2135_v53 }
 0x972   :  { %v2146_v46 = vadd.f32 %v2938_v31, %v2145_v18  ;;  %v2159_v9 = vadd.f32 %v2158_v34, %v5336_v2 }
 0x974   :  { %v2150_v8 = vsel %vm2149_vm14, %v2938_v31, %v2146_v46  ;;  %2939 = vtanh.f32 %v2159_v9 }
 0x975   :  { %v2155_v42 = vsel %vm2152_vm15, %v2154_v4, %v2150_v8  ;;  %v5347_v4 = vld [vmem:[#allocation58_spill] sm:$0xff] }
 0x976   :  { %v2161_v32 = vsub.f32 1.0, %v2155_v42  ;;  %v2163_v39 = vmul.f32 %v2155_v42, %v4815_v40 }
 0x97a   :  { %v2940_v35 = vpop.eup %2939 }
 0x97b   :  { %v2162_v62 = vmul.f32 %v2940_v35, %v2161_v32 }
 0x97d   :  { %v4969_v17 = vadd.f32 %v2163_v39, %v2162_v62 }
 0x97f   :  { %2182 = vmatmul.f32.vlgmr.msra.gmra.mxu0 %v4969_v17  ;;  %2202 = vmatmul.f32.vlgmr.msra.gmra.mxu1 %v4969_v17 }
 0x980   :  { %2222 = vmatmul.f32.vlgmr.msra.gmra.mxu2 %v4969_v17  ;;  %2424 = vmatpush.msra.mxu0 %v4820_v30 }
 0x981   :  { %2493 = vmatpush.msra.mxu1 %v4823_v29  ;;  %2513 = vmatpush.msra.mxu2 %v4826_v49  ;;  %v5337_v29 = vld [vmem:[#allocation47_spill] sm:$0xff] }
 0x982   :  { %2425 = vmatpush.msra.mxu0 %v4829_v33  ;;  %v5338_v49 = vld [vmem:[#allocation51_spill] sm:$0xff] }
 0x983   :  { %2494 = vmatpush.msra.mxu1 %v4832_v45  ;;  %2514 = vmatpush.msra.mxu2 %v4835_v7  ;;  %v5339_v45 = vld [vmem:[#allocation36_spill] sm:$0xff]  ;;  %v5340_v7 = vld [vmem:[#allocation37_spill] sm:$0xff] }
 0x984   :  { %2426 = vmatpush.msra.mxu0 %v4838_v56 }
 0x985   :  { %2495 = vmatpush.msra.mxu1 %v4841_v11  ;;  %2515 = vmatpush.msra.mxu2 %v4844_v36  ;;  %v5341_v11 = vld [vmem:[#allocation39_spill] sm:$0xff] }
 0x986   :  { %2427 = vmatpush.msra.mxu0 %v4847_v22  ;;  %v5342_v36 = vld [vmem:[#allocation35_spill] sm:$0xff] }
 0x987   :  { %2496 = vmatpush.msra.mxu1 %v4850_v24  ;;  %2516 = vmatpush.msra.mxu2 %v4853_v59  ;;  %v5343_v24 = vld [vmem:[#allocation38_spill] sm:$0xff] }
 0x988   :  { %2428 = vmatpush.msra.mxu0 %v4856_v54  ;;  %v5344_v59 = vld [vmem:[#allocation42_spill] sm:$0xff] }
 0x989   :  { %2497 = vmatpush.msra.mxu1 %v4859_v38  ;;  %2517 = vmatpush.msra.mxu2 %v4862_v37 }
 0x98a   :  { %2429 = vmatpush.msra.mxu0 %v4865_v16 }
 0x98b   :  { %2498 = vmatpush.msra.mxu1 %v4868_v19  ;;  %2518 = vmatpush.msra.mxu2 %v4871_v20  ;;  %v5345_v19 = vld [vmem:[#allocation30_spill] sm:$0xff] }
 0x98c   :  { %2430 = vmatpush.msra.mxu0 %v4874_v25 }
 0x98d   :  { %2499 = vmatpush.msra.mxu1 %v4877_v27  ;;  %2519 = vmatpush.msra.mxu2 %v4880_v47  ;;  %v5346_v27 = vld [vmem:[#allocation57_spill] sm:$0xff] }
 0x98e   :  { %2431 = vmatpush.msra.mxu0 %v4883_v50 }
 0x98f   :  { %2500 = vmatpush.msra.mxu1 %v4886_v51  ;;  %2520 = vmatpush.msra.mxu2 %v4889_v5 }
 0x990   :  { %2432 = vmatpush.msra.mxu0 %v4892_v48 }
 0x991   :  { %2501 = vmatpush.msra.mxu1 %v4895_v55  ;;  %2521 = vmatpush.msra.mxu2 %v4898_v61 }
 0x992   :  { %2433 = vmatpush.msra.mxu0 %v4901_v43 }
 0x993   :  { %2502 = vmatpush.msra.mxu1 %v4904_v1  ;;  %2522 = vmatpush.msra.mxu2 %v4907_v13 }
 0x994   :  { %2434 = vmatpush.msra.mxu0 %v4910_v14 }
 0x995   :  { %2503 = vmatpush.msra.mxu1 %v4913_v28  ;;  %2523 = vmatpush.msra.mxu2 %v4916_v44 }
 0x996   :  { %2435 = vmatpush.msra.mxu0 %v4919_v41 }
 0x997   :  { %2504 = vmatpush.msra.mxu1 %v4922_v21  ;;  %2524 = vmatpush.msra.mxu2 %v4925_v58 }
 0x998   :  { %2436 = vmatpush.msra.mxu0 %v4928_v60 }
 0x999   :  { %2505 = vmatpush.msra.mxu1 %v4931_v63  ;;  %2525 = vmatpush.msra.mxu2 %v4934_v3 }
 0x99a   :  { %2437 = vmatpush.msra.mxu0 %v4937_v6 }
 0x99b   :  { %2506 = vmatpush.msra.mxu1 %v5337_v29  ;;  %2526 = vmatpush.msra.mxu2 %v5338_v49 }
 0x99c   :  { %2438 = vmatpush.msra.mxu0 %v5339_v45 }
 0x99d   :  { %2507 = vmatpush.msra.mxu1 %v5340_v7  ;;  %2527 = vmatpush.msra.mxu2 %v5341_v11  ;;  %v2619_v7 = vld [vmem:[#allocation15 + $0x40] sm:$0xff] }
 0x99e   :  { %2439 = vmatpush.msra.mxu0 %v5342_v36 }
 0x99f   :  { %2508 = vmatpush.msra.mxu1 %v5343_v24  ;;  %2528 = vmatpush.msra.mxu2 %v5344_v59  ;;  %v2617_v59 = vld [vmem:[#allocation15 + $0x30] sm:$0xff] }
 0x9fc   :  { %v2183_v38 = vpop.f32.mrf.mxu0  ;;  %v2203_v37 = vpop.f32.mrf.mxu1 }
 0x9fd   :  { %v2226_v20 = vadd.f32 %v2183_v38, %v5345_v19  ;;  %v2246_v47 = vadd.f32 %v2203_v37, %v5346_v27  ;;  %v2616_v38 = vld [vmem:[#allocation15 + $0x28] sm:$0xff]  ;;  %v2615_v19 = vld [vmem:[#allocation15 + $0x20] sm:$0xff] }
 0x9ff   :  { %v2775_v51 = vmul.f32 -1.442695, %v2226_v20  ;;  %v2776_v5 = vmul.f32 -1.442695, %v2246_v47  ;;  %v2614_v47 = vld [vmem:[#allocation15 + $0x18] sm:$0xff] }
 0xa01   :  { %2941 = vpow2.f32 %v2775_v51  ;;  %v2613_v51 = vld [vmem:[#allocation15 + $0x10] sm:$0xff] }
 0xa02   :  { %2943 = vpow2.f32 %v2776_v5  ;;  %v2612_v5 = vld [vmem:[#allocation15 + $0x8] sm:$0xff] }
 0xa03   :  { %v2223_v15 = vpop.f32.mrf.mxu2 }
 0xa04   :  { %v2266_v57 = vadd.f32 %v4691_v23, %v2223_v15 }
 0xa07   :  { %v2942_v55 = vpop.eup %2941 }
 0xa08   :  { %v2944_v61 = vpop.eup %2943  ;;  %v2230_v1 = vadd.f32 1.0, %v2942_v55 }
 0xa09   :  { %v2250_v13 = vadd.f32 1.0, %v2944_v61  ;;  %v2611_v61 = vld [vmem:[#allocation15] sm:$0xff] }
 0xa0a   :  { %2945 = vrcp.f32 %v2230_v1  ;;  %v2242_v9 = vand.u32 2147483648, %v2230_v1  ;;  %v2240_v46 = vand.u32 2147483647, %v2230_v1  ;;  %vm2236_vm1 = vweird.f32 %v2230_v1 }
 0xa0b   :  { %2947 = vrcp.f32 %v2250_v13  ;;  %v2262_v18 = vand.u32 2147483648, %v2250_v13  ;;  %vm2256_vm5 = vweird.f32 %v2250_v13  ;;  %v2260_v0 = vand.u32 2147483647, %v2250_v13 }
 0xa0c   :  { %v2243_v10 = vor.u32 1.1754944e-38, %v2242_v9  ;;  %vm2241_vm3 = vcmp.eq.f32.partialorder %v2240_v46, 8.507059e+37 }
 0xa0d   :  { %v2263_v32 = vor.u32 1.1754944e-38, %v2262_v18  ;;  %vm2261_vm7 = vcmp.eq.f32.partialorder %v2260_v0, 8.507059e+37  ;;  %v5350_v18 = vld [vmem:[#allocation28_spill] sm:$0xff] }
 0xa10   :  { %v2946_v28 = vpop.eup %2945 }
 0xa11   :  { %v2948_v44 = vpop.eup %2947  ;;  %v2232_v21 = vmul.f32 %v2946_v28, %v2230_v1  ;;  %vm2237_vm0 = vweird.f32 %v2946_v28 }
 0xa12   :  { %v2252_v58 = vmul.f32 %v2948_v44, %v2250_v13  ;;  %vm2238_vm2 = vmor %vm2236_vm1, %vm2237_vm0  ;;  %vm2257_vm4 = vweird.f32 %v2948_v44 }
 0xa13   :  { %v2233_v63 = vsub.f32 1.0, %v2232_v21  ;;  %vm2258_vm6 = vmor %vm2256_vm5, %vm2257_vm4 }
 0xa14   :  { %v2253_v3 = vsub.f32 1.0, %v2252_v58 }
 0xa15   :  { %v2234_v2 = vmul.f32 %v2946_v28, %v2233_v63 }
 0xa16   :  { %v2254_v34 = vmul.f32 %v2948_v44, %v2253_v3 }
 0xa17   :  { %v2235_v31 = vadd.f32 %v2946_v28, %v2234_v2 }
 0xa18   :  { %v2255_v12 = vadd.f32 %v2948_v44, %v2254_v34  ;;  %v5053_v34 = vld [vmem:[%s5115_s12] ss:$0 sm:$0xff] }
 0xa19   :  { %v2239_v26 = vsel %vm2238_vm2, %v2946_v28, %v2235_v31 }
 0xa1a   :  { %v2244_v53 = vsel %vm2241_vm3, %v2243_v10, %v2239_v26  ;;  %v2259_v42 = vsel %vm2258_vm6, %v2948_v44, %v2255_v12 }
 0xa1b   :  { %v2267_v52 = vmul.f32 %v2266_v57, %v2244_v53  ;;  %v2264_v35 = vsel %vm2261_vm7, %v2263_v32, %v2259_v42 }
 0xa1c   :  { %v2270_v62 = vsub.f32 1.0, %v2264_v35  ;;  %v2272_v23 = vmul.f32 %v2264_v35, %v4969_v17 }
 0xa1d   :  { %v2268_v8 = vadd.f32 %v2267_v52, %v5347_v4 }
 0xa1f   :  { %2949 = vtanh.f32 %v2268_v8 }
 0xa25   :  { %v2950_v39 = vpop.eup %2949 }
 0xa26   :  { %v2271_v29 = vmul.f32 %v2950_v39, %v2270_v62 }
 0xa28   :  { %v5027_v49 = vadd.f32 %v2272_v23, %v2271_v29  ;;  %v5351_v29 = vld [vmem:[#allocation43_spill] sm:$0xff]  ;;  %v5352_v23 = vld [vmem:[#allocation49_spill] sm:$0xff] }
 0xa2a   :  { %2291 = vmatmul.f32.vlgmr.msrb.gmra.mxu3 %v5027_v49  ;;  %2311 = vmatmul.f32.vlgmr.msrb.gmra.mxu0 %v5027_v49 }
 0xa2b   :  { %2331 = vmatmul.f32.vlgmr.msrb.gmra.mxu1 %v5027_v49  ;;  %2533 = vmatpush.msrb.mxu3 %v4820_v30  ;;  %v2626_v30 = vld [vmem:[#allocation15 + $0x78] sm:$0xff] }
 0xa2c   :  { %2631 = vmatpush.msrb.mxu0 %v2626_v30 }
 0xa2d   :  { %2534 = vmatpush.msrb.mxu3 %v4829_v33  ;;  %v2625_v33 = vld [vmem:[#allocation15 + $0x70] sm:$0xff] }
 0xa2e   :  { %2632 = vmatpush.msrb.mxu0 %v2625_v33 }
 0xa2f   :  { %2535 = vmatpush.msrb.mxu3 %v4838_v56 }
 0xa31   :  { %2536 = vmatpush.msrb.mxu3 %v4847_v22  ;;  %v5348_v22 = vld [vmem:[#allocation33_spill] sm:$0xff] }
 0xa33   :  { %2537 = vmatpush.msrb.mxu3 %v4856_v54 }
 0xa35   :  { %2538 = vmatpush.msrb.mxu3 %v4865_v16  ;;  %v2624_v16 = vld [vmem:[#allocation15 + $0x68] sm:$0xff] }
 0xa36   :  { %2633 = vmatpush.msrb.mxu0 %v2624_v16 }
 0xa37   :  { %2539 = vmatpush.msrb.mxu3 %v4874_v25 }
 0xa39   :  { %2540 = vmatpush.msrb.mxu3 %v4883_v50  ;;  %v2623_v50 = vld [vmem:[#allocation15 + $0x60] sm:$0xff] }
 0xa3a   :  { %2634 = vmatpush.msrb.mxu0 %v2623_v50 }
 0xa3b   :  { %2541 = vmatpush.msrb.mxu3 %v4892_v48  ;;  %v2622_v48 = vld [vmem:[#allocation15 + $0x58] sm:$0xff] }
 0xa3c   :  { %2635 = vmatpush.msrb.mxu0 %v2622_v48 }
 0xa3d   :  { %2542 = vmatpush.msrb.mxu3 %v4901_v43  ;;  %v2621_v43 = vld [vmem:[#allocation15 + $0x50] sm:$0xff] }
 0xa3e   :  { %2636 = vmatpush.msrb.mxu0 %v2621_v43 }
 0xa3f   :  { %2543 = vmatpush.msrb.mxu3 %v4910_v14 }
 0xa41   :  { %2544 = vmatpush.msrb.mxu3 %v4919_v41  ;;  %v5349_v41 = vld [vmem:[#allocation59_spill] sm:$0xff] }
 0xa43   :  { %2545 = vmatpush.msrb.mxu3 %v4928_v60 }
 0xa45   :  { %2546 = vmatpush.msrb.mxu3 %v4937_v6  ;;  %v2620_v6 = vld [vmem:[#allocation15 + $0x48] sm:$0xff] }
 0xa46   :  { %2637 = vmatpush.msrb.mxu0 %v2620_v6 }
 0xa47   :  { %2547 = vmatpush.msrb.mxu3 %v5339_v45 }
 0xa48   :  { %2638 = vmatpush.msrb.mxu0 %v2619_v7 }
 0xa49   :  { %2548 = vmatpush.msrb.mxu3 %v5342_v36  ;;  %v2618_v36 = vld [vmem:[#allocation15 + $0x38] sm:$0xff] }
 0xa4a   :  { %2639 = vmatpush.msrb.mxu0 %v2618_v36 }
 0xa4c   :  { %2640 = vmatpush.msrb.mxu0 %v2617_v59 }
 0xa4e   :  { %2641 = vmatpush.msrb.mxu0 %v2616_v38 }
 0xa50   :  { %2642 = vmatpush.msrb.mxu0 %v2615_v19 }
 0xa52   :  { %2643 = vmatpush.msrb.mxu0 %v2614_v47 }
 0xa54   :  { %2644 = vmatpush.msrb.mxu0 %v2613_v51 }
 0xa56   :  { %2645 = vmatpush.msrb.mxu0 %v2612_v5 }
 0xa58   :  { %2646 = vmatpush.msrb.mxu0 %v2611_v61 }
 0xaa7   :  { %v2312_v56 = vpop.f32.mrf.mxu0 }
 0xaa8   :  { %v2355_v54 = vadd.f32 %v2312_v56, %v5348_v22  ;;  %v2332_v9 = vpop.f32.mrf.mxu1  ;;  %v5072_v22 = vld [vmem:[%s5117_s14] ss:$0 sm:$0xff]  ;;  %s3347_s14 = smov [#allocation18]  }
 0xaa9   :  { %v2375_v15 = vadd.f32 %v5053_v34, %v2332_v9  ;;  %v5355_v9 = vld [vmem:[#allocation34_spill] sm:$0xff]  ;;  %s2698_s18 = sshll.u32 %s3347_s14, 4  ;;  %s2699_s18 = int_to_ptr.vmem [resolvable:$true] %s2698_s18 }
 0xaaa   :  { %v2778_v25 = vmul.f32 -1.442695, %v2355_v54  ;;  %v5353_v54 = vld [vmem:[#allocation31_spill] sm:$0xff] }
 0xaac   :  { %2951 = vpow2.f32 %v2778_v25  ;;  %v5354_v25 = vld [vmem:[#allocation32_spill] sm:$0xff] }
 0xaad   :  { %v2292_v14 = vpop.f32.mrf.mxu3 }
 0xaae   :  { %v2335_v60 = vadd.f32 %v2292_v14, %v5349_v41 }
 0xab0   :  { %v2777_v45 = vmul.f32 -1.442695, %v2335_v60 }
 0xab2   :  { %v2952_v11 = vpop.eup %2951  ;;  %2953 = vpow2.f32 %v2777_v45 }
 0xab3   :  { %v2359_v24 = vadd.f32 1.0, %v2952_v11 }
 0xab5   :  { %2955 = vrcp.f32 %v2359_v24  ;;  %v2371_v57 = vand.u32 2147483648, %v2359_v24  ;;  %vm2365_vm13 = vweird.f32 %v2359_v24  ;;  %v2369_v53 = vand.u32 2147483647, %v2359_v24 }
 0xab7   :  { %v2372_v4 = vor.u32 1.1754944e-38, %v2371_v57  ;;  %vm2370_vm15 = vcmp.eq.f32.partialorder %v2369_v53, 8.507059e+37 }
 0xab8   :  { %v2954_v37 = vpop.eup %2953 }
 0xab9   :  { %v2339_v20 = vadd.f32 1.0, %v2954_v37 }
 0xabb   :  { %2957 = vrcp.f32 %v2339_v20  ;;  %v2956_v27 = vpop.eup %2955  ;;  %v2351_v21 = vand.u32 2147483648, %v2339_v20  ;;  %v2349_v63 = vand.u32 2147483647, %v2339_v20  ;;  %vm2345_vm9 = vweird.f32 %v2339_v20 }
 0xabc   :  { %v2361_v55 = vmul.f32 %v2956_v27, %v2359_v24  ;;  %vm2366_vm12 = vweird.f32 %v2956_v27 }
 0xabd   :  { %v2352_v46 = vor.u32 1.1754944e-38, %v2351_v21  ;;  %vm2350_vm11 = vcmp.eq.f32.partialorder %v2349_v63, 8.507059e+37  ;;  %vm2367_vm14 = vmor %vm2365_vm13, %vm2366_vm12 }
 0xabe   :  { %v2362_v28 = vsub.f32 1.0, %v2361_v55 }
 0xac0   :  { %v2363_v3 = vmul.f32 %v2956_v27, %v2362_v28 }
 0xac1   :  { %v2958_v1 = vpop.eup %2957 }
 0xac2   :  { %v2341_v13 = vmul.f32 %v2958_v1, %v2339_v20  ;;  %vm2346_vm8 = vweird.f32 %v2958_v1  ;;  %v2364_v10 = vadd.f32 %v2956_v27, %v2363_v3 }
 0xac3   :  { %vm2347_vm10 = vmor %vm2345_vm9, %vm2346_vm8 }
 0xac4   :  { %v2342_v44 = vsub.f32 1.0, %v2341_v13  ;;  %v2368_v0 = vsel %vm2367_vm14, %v2956_v27, %v2364_v10 }
 0xac5   :  { %v2373_v8 = vsel %vm2370_vm15, %v2372_v4, %v2368_v0 }
 0xac6   :  { %v2343_v58 = vmul.f32 %v2958_v1, %v2342_v44  ;;  %v2379_v42 = vsub.f32 1.0, %v2373_v8  ;;  %v2381_v62 = vmul.f32 %v2373_v8, %v5027_v49  ;;  %v5356_v8 = vld [vmem:[#allocation44_spill] sm:$0xff] }
 0xac8   :  { %v2344_v2 = vadd.f32 %v2958_v1, %v2343_v58 }
 0xaca   :  { %v2348_v31 = vsel %vm2347_vm10, %v2958_v1, %v2344_v2 }
 0xacb   :  { %v2353_v26 = vsel %vm2350_vm11, %v2352_v46, %v2348_v31 }
 0xacc   :  { %v2376_v12 = vmul.f32 %v2375_v15, %v2353_v26 }
 0xace   :  { %v2377_v52 = vadd.f32 %v2376_v12, %v5350_v18 }
 0xad0   :  { %2959 = vtanh.f32 %v2377_v52 }
 0xad6   :  { %v2960_v32 = vpop.eup %2959 }
 0xad7   :  { %v2380_v35 = vmul.f32 %v2960_v32, %v2379_v42  ;;  %v5357_v42 = vld [vmem:[#allocation29_spill] sm:$0xff] }
 0xad8   :  { %v1594_v32 = vadd.f32 %v5357_v42, %v5356_v8 }
 0xad9   :  { %v5058_v39 = vadd.f32 %v2381_v62, %v2380_v35 }
 0xadb   :  { %2400 = vmatmul.f32.vlgmr.msrb.gmra.mxu2 %v5058_v39  ;;  %2420 = vmatmul.f32.vlgmr.msra.gmra.mxu3 %v5058_v39 }
 0xadc   :  { %2440 = vmatmul.f32.vlgmr.msra.gmra.mxu0 %v5058_v39 }
 0xae4   :  { %2647 = vmatmul.f32.vlgmr.msrb.gmra.mxu0 %v5351_v29 }
 0xaec   :  { %2650 = vmatmul.f32.gmra.mxu0 %v5352_v23 }
 0xaf4   :  { %2653 = vmatmul.f32.gmra.mxu0 %v4815_v40 }
 0xafc   :  { %2656 = vmatmul.f32.gmra.mxu0 %v4969_v17 }
 0xb04   :  { %2659 = vmatmul.f32.gmra.mxu0 %v5027_v49 }
 0xb0c   :  { %2662 = vmatmul.f32.gmra.mxu0 %v5058_v39 }
 0xb59   :  { %v2441_v30 = vpop.f32.mrf.mxu0 }
 0xb5a   :  { %v2484_v13 = vadd.f32 %v5053_v34, %v2441_v30 }
 0xb5e   :  { %v2401_v33 = vpop.f32.mrf.mxu2  ;;  %v2421_v56 = vpop.f32.mrf.mxu3 }
 0xb5f   :  { %v2444_v16 = vadd.f32 %v2401_v33, %v5353_v54  ;;  %v2464_v50 = vadd.f32 %v2421_v56, %v5354_v25  ;;  %v5359_v33 = vld [vmem:[#allocation41_spill] sm:$0xff] }
 0xb61   :  { %v2779_v48 = vmul.f32 -1.442695, %v2444_v16  ;;  %v2780_v40 = vmul.f32 -1.442695, %v2464_v50  ;;  %v2648_v43 = vpop.f32.mrf.mxu0 }
 0xb62   :  { %v2649_v17 = vadd.f32 %v5072_v22, %v2648_v43 }
 0xb63   :  { %2961 = vpow2.f32 %v2779_v48 }
 0xb64   :  { %2963 = vpow2.f32 %v2780_v40  ;;  %2672 = vst [vmem:[#allocation17] sm:$0xff] %v2649_v17 }
 0xb69   :  { %v2962_v49 = vpop.eup %2961  ;;  %v2651_v14 = vpop.f32.mrf.mxu0 }
 0xb6a   :  { %v2964_v41 = vpop.eup %2963  ;;  %v2448_v60 = vadd.f32 1.0, %v2962_v49  ;;  %v2652_v6 = vadd.f32 %v5072_v22, %v2651_v14 }
 0xb6b   :  { %v2468_v45 = vadd.f32 1.0, %v2964_v41 }
 0xb6c   :  { %2965 = vrcp.f32 %v2448_v60  ;;  %2673 = vst [vmem:[#allocation17 + $0x8] sm:$0xff] %v2652_v6  ;;  %v2460_v19 = vand.u32 2147483648, %v2448_v60  ;;  %v2458_v47 = vand.u32 2147483647, %v2448_v60  ;;  %vm2454_vm1 = vweird.f32 %v2448_v60 }
 0xb6d   :  { %2967 = vrcp.f32 %v2468_v45  ;;  %v2480_v63 = vand.u32 2147483648, %v2468_v45  ;;  %vm2474_vm5 = vweird.f32 %v2468_v45  ;;  %v2478_v3 = vand.u32 2147483647, %v2468_v45 }
 0xb6e   :  { %v2461_v61 = vor.u32 1.1754944e-38, %v2460_v19  ;;  %vm2459_vm3 = vcmp.eq.f32.partialorder %v2458_v47, 8.507059e+37  ;;  %v5360_v19 = vld [vmem:[#allocation50_spill] sm:$0xff] }
 0xb6f   :  { %v2481_v15 = vor.u32 1.1754944e-38, %v2480_v63  ;;  %vm2479_vm7 = vcmp.eq.f32.partialorder %v2478_v3, 8.507059e+37 }
 0xb71   :  { %v2654_v7 = vpop.f32.mrf.mxu0 }
 0xb72   :  { %v2966_v11 = vpop.eup %2965  ;;  %v2655_v36 = vadd.f32 %v5072_v22, %v2654_v7 }
 0xb73   :  { %v2968_v24 = vpop.eup %2967  ;;  %v2450_v59 = vmul.f32 %v2966_v11, %v2448_v60  ;;  %vm2455_vm0 = vweird.f32 %v2966_v11 }
 0xb74   :  { %v2470_v38 = vmul.f32 %v2968_v24, %v2468_v45  ;;  %2674 = vst [vmem:[#allocation17 + $0x10] sm:$0xff] %v2655_v36  ;;  %vm2456_vm2 = vmor %vm2454_vm1, %vm2455_vm0  ;;  %vm2475_vm4 = vweird.f32 %v2968_v24 }
 0xb75   :  { %v2451_v37 = vsub.f32 1.0, %v2450_v59  ;;  %vm2476_vm6 = vmor %vm2474_vm5, %vm2475_vm4 }
 0xb76   :  { %v2471_v20 = vsub.f32 1.0, %v2470_v38 }
 0xb77   :  { %v2452_v27 = vmul.f32 %v2966_v11, %v2451_v37 }
 0xb78   :  { %v2472_v51 = vmul.f32 %v2968_v24, %v2471_v20  ;;  %v5361_v20 = vld [vmem:[#allocation45_spill] sm:$0xff] }
 0xb79   :  { %v2453_v5 = vadd.f32 %v2966_v11, %v2452_v27  ;;  %v2657_v55 = vpop.f32.mrf.mxu0  ;;  %v1676_v27 = vadd.f32 %v5361_v20, %v5360_v19 }
 0xb7a   :  { %v2658_v1 = vadd.f32 %v5072_v22, %v2657_v55  ;;  %v2473_v21 = vadd.f32 %v2968_v24, %v2472_v51 }
 0xb7b   :  { %v2457_v28 = vsel %vm2456_vm2, %v2966_v11, %v2453_v5 }
 0xb7c   :  { %v2462_v44 = vsel %vm2459_vm3, %v2461_v61, %v2457_v28  ;;  %2675 = vst [vmem:[#allocation17 + $0x18] sm:$0xff] %v2658_v1  ;;  %v2477_v46 = vsel %vm2476_vm6, %v2968_v24, %v2473_v21 }
 0xb7d   :  { %v2485_v58 = vmul.f32 %v2484_v13, %v2462_v44  ;;  %v2482_v26 = vsel %vm2479_vm7, %v2481_v15, %v2477_v46 }
 0xb7e   :  { %v2488_v57 = vsub.f32 1.0, %v2482_v26  ;;  %v2490_v18 = vmul.f32 %v2482_v26, %v5058_v39  ;;  %v5358_v39 = vld [vmem:[#allocation48_spill] sm:$0xff] }
 0xb7f   :  { %v2486_v2 = vadd.f32 %v2485_v58, %v5355_v9  ;;  %v1635_v56 = vadd.f32 %v5359_v33, %v5358_v39 }
 0xb81   :  { %v2660_v31 = vpop.f32.mrf.mxu0  ;;  %2969 = vtanh.f32 %v2486_v2 }
 0xb82   :  { %v2661_v10 = vadd.f32 %v5072_v22, %v2660_v31 }
 0xb84   :  { %2676 = vst [vmem:[#allocation17 + $0x20] sm:$0xff] %v2661_v10 }
 0xb87   :  { %v2970_v12 = vpop.eup %2969 }
 0xb88   :  { %v2489_v53 = vmul.f32 %v2970_v12, %v2488_v57 }
 0xb89   :  { %v2663_v52 = vpop.f32.mrf.mxu0 }
 0xb8a   :  { %v2664_v0 = vadd.f32 %v5072_v22, %v2663_v52  ;;  %v2491_v4 = vadd.f32 %v2490_v18, %v2489_v53 }
 0xb8c   :  { %2677 = vst [vmem:[#allocation17 + $0x28] sm:$0xff] %v2664_v0  ;;  %2509 = vmatmul.f32.vlgmr.msra.gmra.mxu1 %v2491_v4  ;;  %2529 = vmatmul.f32.vlgmr.msra.gmra.mxu2 %v2491_v4 }
 0xb8d   :  { %2549 = vmatmul.f32.vlgmr.msrb.gmra.mxu3 %v2491_v4  ;;  %2665 = vmatmul.f32.gmra.mxu0 %v2491_v4 }
 0xc09   :  { %v2510_v35 = vpop.f32.mrf.mxu1 }
 0xc0a   :  { %v2553_v62 = vadd.f32 %v2510_v35, %v1594_v32  ;;  %v2666_v29 = vpop.f32.mrf.mxu0 }
 0xc0b   :  { %v2667_v23 = vadd.f32 %v5072_v22, %v2666_v29 }
 0xc0c   :  { %v2781_v30 = vmul.f32 -1.442695, %v2553_v62 }
 0xc0d   :  { %2678 = vst [vmem:[#allocation17 + $0x30] sm:$0xff] %v2667_v23 }
 0xc0e   :  { %2971 = vpow2.f32 %v2781_v30 }
 0xc0f   :  { %v2530_v54 = vpop.f32.mrf.mxu2 }
 0xc10   :  { %v2573_v16 = vadd.f32 %v2530_v54, %v1635_v56  ;;  %v2550_v7 = vpop.f32.mrf.mxu3 }
 0xc11   :  { %v2593_v37 = vadd.f32 %v5053_v34, %v2550_v7 }
 0xc12   :  { %v2782_v25 = vmul.f32 -1.442695, %v2573_v16 }
 0xc14   :  { %v2972_v50 = vpop.eup %2971  ;;  %2973 = vpow2.f32 %v2782_v25 }
 0xc15   :  { %v2557_v48 = vadd.f32 1.0, %v2972_v50 }
 0xc17   :  { %2975 = vrcp.f32 %v2557_v48  ;;  %v2569_v41 = vand.u32 2147483648, %v2557_v48  ;;  %v2567_v6 = vand.u32 2147483647, %v2557_v48  ;;  %vm2563_vm9 = vweird.f32 %v2557_v48 }
 0xc19   :  { %v2570_v24 = vor.u32 1.1754944e-38, %v2569_v41  ;;  %vm2568_vm11 = vcmp.eq.f32.partialorder %v2567_v6, 8.507059e+37 }
 0xc1a   :  { %v2974_v40 = vpop.eup %2973 }
 0xc1b   :  { %v2577_v43 = vadd.f32 1.0, %v2974_v40 }
 0xc1d   :  { %v2976_v17 = vpop.eup %2975  ;;  %2977 = vrcp.f32 %v2577_v43  ;;  %v2589_v55 = vand.u32 2147483648, %v2577_v43  ;;  %v2587_v61 = vand.u32 2147483647, %v2577_v43  ;;  %vm2583_vm13 = vweird.f32 %v2577_v43 }
 0xc1e   :  { %v2559_v49 = vmul.f32 %v2976_v17, %v2557_v48  ;;  %vm2564_vm8 = vweird.f32 %v2976_v17 }
 0xc1f   :  { %vm2565_vm10 = vmor %vm2563_vm9, %vm2564_vm8  ;;  %v2590_v44 = vor.u32 1.1754944e-38, %v2589_v55  ;;  %vm2588_vm15 = vcmp.eq.f32.partialorder %v2587_v61, 8.507059e+37 }
 0xc20   :  { %v2560_v14 = vsub.f32 1.0, %v2559_v49 }
 0xc22   :  { %v2561_v60 = vmul.f32 %v2976_v17, %v2560_v14 }
 0xc23   :  { %v2978_v45 = vpop.eup %2977 }
 0xc24   :  { %v2579_v11 = vmul.f32 %v2978_v45, %v2577_v43  ;;  %v2562_v36 = vadd.f32 %v2976_v17, %v2561_v60  ;;  %vm2584_vm12 = vweird.f32 %v2978_v45 }
 0xc25   :  { %vm2585_vm14 = vmor %vm2583_vm13, %vm2584_vm12 }
 0xc26   :  { %v2580_v59 = vsub.f32 1.0, %v2579_v11  ;;  %v2566_v38 = vsel %vm2565_vm10, %v2976_v17, %v2562_v36 }
 0xc27   :  { %v2571_v47 = vsel %vm2568_vm11, %v2570_v24, %v2566_v38 }
 0xc28   :  { %v2594_v51 = vmul.f32 %v2593_v37, %v2571_v47  ;;  %v2581_v5 = vmul.f32 %v2978_v45, %v2580_v59 }
 0xc2a   :  { %v2595_v1 = vadd.f32 %v2594_v51, %v1676_v27  ;;  %v2582_v13 = vadd.f32 %v2978_v45, %v2581_v5 }
 0xc2c   :  { %2979 = vtanh.f32 %v2595_v1  ;;  %v2586_v28 = vsel %vm2585_vm14, %v2978_v45, %v2582_v13 }
 0xc2d   :  { %v2591_v21 = vsel %vm2588_vm15, %v2590_v44, %v2586_v28 }
 0xc2e   :  { %v2597_v58 = vsub.f32 1.0, %v2591_v21  ;;  %v2599_v3 = vmul.f32 %v2591_v21, %v2491_v4 }
 0xc32   :  { %v2980_v34 = vpop.eup %2979 }
 0xc33   :  { %v2598_v63 = vmul.f32 %v2980_v34, %v2597_v58 }
 0xc35   :  { %v2600_v9 = vadd.f32 %v2599_v3, %v2598_v63 }
 0xc37   :  { %2668 = vmatmul.f32.gmra.mxu0 %v2600_v9  ;;  %2602 = vst [vmem:[#allocation18] sm:$0xff] %v2600_v9 }
 0xc38   :  { %2703 = dma.vmem_to_hbm [thread:$0]  %s2699_s18, 128, %s2701_s29, [#allocation19]  }
 0xcb4   :  { %v2669_v2 = vpop.f32.mrf.mxu0 }
 0xcb5   :  { %v2670_v46 = vadd.f32 %v5072_v22, %v2669_v2 }
 0xcb7   :  { %2679 = vst [vmem:[#allocation17 + $0x38] sm:$0xff] %v2670_v46 }
 0xcb8   :  { %2692 = dma.vmem_to_hbm [thread:$0]  %s2685_s7, 1024, %s2687_s24, [#allocation5], %s3341_s20, %s3341_s20, %s3342_s5  }
 0xcb9   :  { %3329 = dma.done.wait [#allocation5], 1024  }
 0xcba   :  { %3330 = vsyncadd [#allocation5], 4294966272 }
 0xcbb   :  { %3331 = dma.done.wait [#allocation19], 128  }
 0xcbc   :  { %3332 = vsyncadd [#allocation19], 4294967168 }
 0xcbd   :  { %2712 = vsyncpa [#allocation4], 1 }
 0xcbe   :  { %2713 = vsyncpa [#allocation7], 1 }
 0xcbf   :  { %2714 = vsyncpa [#allocation10], 1 }
 0xcc0   :  { %2715 = vsyncpa [#allocation13], 1 }
 0xcc1   :  { %2716 = vsyncpa [#allocation16], 1 }
 0xcc2   :  { %2717 = vsyncpa [#allocation5], 1 }
 0xcc3   :  { %2718 = vsyncpa [#allocation19], 1 }

</bundles_post_ra>
